<compile_context>
chip_gen: v5e
topology: v5e:2x2
jax: 0.10.0
libtpu: 0.0.40
codegen_flags: <defaults>
</compile_context>

<pallas_src>
import functools

import jax
import jax.numpy as jnp
from jax import lax
from jax.experimental import pallas as pl
from jax.experimental.pallas import tpu as pltpu


# ----------------------------- small helpers ------------------------------

def _is_pow2(n: int) -> bool:
    return n > 0 and (n & (n - 1)) == 0


def _floor_div(x, d: int):
    """x // d for non-negative int32 data; shift when d is a power of two."""
    if _is_pow2(d):
        return x >> (d.bit_length() - 1)
    return x // d


def _mod(x, d: int):
    if _is_pow2(d):
        return x & (d - 1)
    return x % d


def _pick_tile_width(bhw: int, max_lanes) -> int:
    """Largest multiple-of-128 divisor of bhw that is <= max_lanes."""
    if max_lanes is None or bhw <= max_lanes:
        return bhw
    if bhw % 128 != 0:
        return bhw                      # ragged lane count: one full tile
    best = bhw
    tw = 128
    while tw <= max_lanes:
        if bhw % tw == 0:
            best = tw
        tw += 128
    return best if best <= max_lanes else bhw


# ----------------------- stage A: x_att + statistics -----------------------

def _stats_kernel(slab_ref, w_sm_ref, pooled_ref, separt_ref, *, B, HW, TW):
    """Smooth 1x1 conv tile, channel pool, per-batch SE partial stats."""
    f32 = jnp.float32
    t = pl.program_id(0)

    slab = slab_ref[...]                                        # (2C, TW) f32
    x_att = jnp.dot(w_sm_ref[...], slab.astype(jnp.bfloat16),
                    preferred_element_type=f32)                 # (C, TW) f32

    # ChannelPool: max first, then mean (PyTorch order) -> (2, TW) lane-dense.
    cmax = jnp.max(x_att, axis=0, keepdims=True)
    cmean = jnp.mean(x_att, axis=0, keepdims=True)
    pooled_ref[...] = jnp.concatenate([cmax, cmean], axis=0)

    # Per-batch SE partials; a tile may straddle a batch boundary, so lanes are
    # selected by their global batch id (iota-built, no helper array from HBM).
    g_idx = t * TW + lax.broadcasted_iota(jnp.int32, (1, TW), 1)
    b_lane = _floor_div(g_idx, HW)                              # (1, TW)
    sums, maxs = [], []
    for b in range(B):
        sel = b_lane == b
        sums.append(jnp.sum(jnp.where(sel, x_att, 0.0), axis=1, keepdims=True))
        maxs.append(jnp.max(jnp.where(sel, x_att, -jnp.inf), axis=1,
                            keepdims=True))
    separt_ref[0] = jnp.concatenate(
        [jnp.concatenate(sums, axis=1), jnp.concatenate(maxs, axis=1)], axis=0)


# --------------------- stage B: spatial + channel gates ---------------------

def _gate_kernel(pooled_ref, separt_ref, wq_ref, wse_ref, wfc1_ref, wfc2_ref,
                 scal_ref, spg_ref, chb_ref, v_scr, *, C, H, W, training):
    """7x7 spatial gate (conv + BN + sigmoid) and the batched SE branch."""
    f32 = jnp.float32
    HW = H * W
    pooled = pooled_ref[...]                                    # (2, BHW)
    BHW = pooled.shape[1]

    n_idx = lax.broadcasted_iota(jnp.int32, (1, BHW), 1)
    row_i = _floor_div(_mod(n_idx, HW), W)                      # image row of lane
    col_j = _mod(n_idx, W)                                      # image col of lane

    # Tap rows r = ki*2 + c (c: 0 = channel-max, 1 = channel-mean).  One lane
    # rotation moves BOTH pooled channels; hoisted boundary masks zero taps
    # that would wrap across an image row / image / batch edge.
    for ki in range(7):
        di = ki - 3
        if di == 0:
            blk = pooled
        else:
            valid = (row_i + di >= 0) & (row_i + di < H)
            blk = jnp.where(valid,
                            pltpu.roll(pooled, shift=(-di * W) % BHW, axis=1),
                            0.0)
        v_scr[2 * ki:2 * ki + 2, :] = blk
    v_scr[14:16, :] = jnp.zeros((2, BHW), f32)                  # padded rows

    # Q[kj] = sum_{c,ki} w7[c,ki,kj] * V[ki*2+c]   (one tiny MXU matmul)
    q_mat = jnp.dot(wq_ref[...], v_scr[...], preferred_element_type=f32)

    conv = q_mat[3:4, :]                                        # kj == 3, no shift
    for kj in range(7):
        dj = kj - 3
        if dj == 0:
            continue
        valid = (col_j + dj >= 0) & (col_j + dj < W)
        conv = conv + jnp.where(
            valid,
            pltpu.roll(q_mat[kj:kj + 1, :], shift=(-dj) % BHW, axis=1),
            0.0)

    # BatchNorm2d(1) + sigmoid; training => batch stats (biased variance).
    bn_w, bn_b = scal_ref[0], scal_ref[1]
    gamma, beta = scal_ref[2], scal_ref[3]
    if training:
        mu = jnp.mean(conv)
        var = jnp.mean((conv - mu) ** 2)
    else:
        mu, var = scal_ref[4], scal_ref[5]
    gate = jax.nn.sigmoid((conv - mu) * lax.rsqrt(var + 1e-5) * bn_w + bn_b)
    spg_ref[...] = gamma * gate                                 # (1, BHW)

    # SELayer batched over B: reduce per-tile partials, then 3 small matmuls.
    separt = separt_ref[...]                                    # (n_tiles, 2C, B)
    se_avg = jnp.sum(separt[:, :C, :], axis=0) * (1.0 / HW)     # (C, B)
    se_max = jnp.max(separt[:, C:, :], axis=0)                  # (C, B)
    se_in = jnp.concatenate([se_avg, se_max], axis=0)           # (2C, B)
    y = jnp.dot(wse_ref[...], se_in, preferred_element_type=f32)
    h = jnp.maximum(jnp.dot(wfc1_ref[...], y, preferred_element_type=f32), 0.0)
    s = jax.nn.sigmoid(jnp.dot(wfc2_ref[...], h, preferred_element_type=f32))
    chb_ref[...] = beta * s                                     # (C, B)


# ------------------- stage C: combine + final conv + ReLU -------------------

def _combine_kernel(slab_ref, spg_ref, chb_ref, w_sm_ref, w_c1_ref, o_ref,
                    *, B, HW, TW):
    """Recompute x_att, apply both gates, final 1x1 conv + residual + ReLU."""
    f32 = jnp.float32
    t = pl.program_id(0)

    slab = slab_ref[...]                                        # (2C, TW) f32
    x_att = jnp.dot(w_sm_ref[...], slab.astype(jnp.bfloat16),
                    preferred_element_type=f32)                 # (C, TW)

    # Per-batch channel gate, selected by each lane's global batch id.
    g_idx = t * TW + lax.broadcasted_iota(jnp.int32, (1, TW), 1)
    b_lane = _floor_div(g_idx, HW)                              # (1, TW)
    chb = chb_ref[...]                                          # (C, B), has *beta
    ch = jnp.where(b_lane == 0, chb[:, 0:1], 0.0)
    for b in range(1, B):
        ch = ch + jnp.where(b_lane == b, chb[:, b:b + 1], 0.0)

    # x_att + gamma*(x_att*sp) + beta*(x_att*ch) == x_att*(1 + gamma*sp + beta*ch)
    comb = x_att * ((1.0 + spg_ref[...]) + ch)
    out = jnp.dot(w_c1_ref[...], comb.astype(jnp.bfloat16),
                  preferred_element_type=f32)
    C = out.shape[0]
    o_ref[...] = jnp.maximum(slab[:C, :] + out, 0.0)            # residual = x


# --------------------------------- wrapper ---------------------------------

def skip_guidance_hr_forward(x, x_down, params, *, training=True,
                             tile_lanes=8192):
    """Forward pass of Skip_guidance_HR.  x, x_down: (B, C, H, W) float32."""
    B, C, H, W = x.shape
    assert x_down.shape == (B, C, H, W)
    HW = H * W
    BHW = B * HW
    f32, bf16 = jnp.float32, jnp.bfloat16

    # HBM-side layout change: channels on sublanes, batch*spatial on lanes,
    # x stacked on top of x_down (so the smooth conv is one K=2C matmul).
    slab = jnp.concatenate([x, x_down], axis=1)                 # (B, 2C, H, W)
    slab = jnp.transpose(slab, (1, 0, 2, 3)).reshape(2 * C, BHW).astype(f32)

    # bf16 operands (f32 accumulation) for the two big 1x1 convs.
    w_sm = params["w_smooth"].astype(bf16)                      # (C, 2C)
    w_c1 = params["w_conv1x1"].astype(bf16)                     # (C, C)
    # 7x7 conv weight packed as wq[kj, ki*2 + c] = w7[c, ki, kj], zero-padded.
    w7 = params["w_spatial"].astype(f32)                        # (2, 7, 7)
    wq_pad = jnp.pad(jnp.transpose(w7, (2, 1, 0)).reshape(7, 14),
                     ((0, 1), (0, 2)))
    w_se = params["w_se"].astype(f32)                           # (C, 2C)
    w_fc1 = params["w_fc1"].astype(f32)                         # (C//r, C)
    w_fc2 = params["w_fc2"].astype(f32)                         # (C, C//r)
    scal = params["scal"].astype(f32)                           # (6,)

    TW = _pick_tile_width(BHW, tile_lanes)
    n_tiles = BHW // TW
    assert TW * n_tiles == BHW

    def vlim(nbytes):
        return int(min(max(nbytes + (4 << 20), 32 << 20), 120 << 20))

    blk_slab = 2 * C * TW * 4
    par_a = pltpu.CompilerParams(
        dimension_semantics=("parallel",),
        vmem_limit_bytes=vlim(2 * blk_slab + 4 * TW * 4 + C * TW * 4))
    par_b = pltpu.CompilerParams(
        vmem_limit_bytes=vlim(30 * BHW * 4 + n_tiles * 2 * C * B * 4))
    par_c = pltpu.CompilerParams(
        dimension_semantics=("parallel",),
        vmem_limit_bytes=vlim(2 * blk_slab + 2 * C * TW * 4 + 2 * TW * 4))

    cost_a = pl.CostEstimate(
        flops=int(2 * 2 * C * C * BHW), transcendentals=0,
        bytes_accessed=int(slab.nbytes + (2 * BHW + n_tiles * 2 * C * B) * 4))
    cost_b = pl.CostEstimate(
        flops=int(2 * 8 * 16 * BHW + 16 * BHW),
        transcendentals=int(BHW + C * B),
        bytes_accessed=int((3 * BHW + (n_tiles + 1) * 2 * C * B) * 4))
    cost_c = pl.CostEstimate(
        flops=int(2 * 2 * C * C * BHW + 2 * C * C * BHW), transcendentals=0,
        bytes_accessed=int(slab.nbytes + (BHW + C * BHW) * 4))

    # ---- stage A: x_att tiles -> channel pool + per-batch SE partials ------
    pooled, se_part = pl.pallas_call(
        functools.partial(_stats_kernel, B=B, HW=HW, TW=TW),
        grid=(n_tiles,),
        in_specs=[pl.BlockSpec((2 * C, TW), lambda t: (0, t)),
                  pl.BlockSpec((C, 2 * C), lambda t: (0, 0))],
        out_specs=(pl.BlockSpec((2, TW), lambda t: (0, t)),
                   pl.BlockSpec((1, 2 * C, B), lambda t: (t, 0, 0))),
        out_shape=(jax.ShapeDtypeStruct((2, BHW), f32),
                   jax.ShapeDtypeStruct((n_tiles, 2 * C, B), f32)),
        compiler_params=par_a, cost_estimate=cost_a,
    )(slab, w_sm)

    # ---- stage B: 7x7 gate conv + BN + sigmoid, batched SE MLP -------------
    vmem = pl.BlockSpec(memory_space=pltpu.MemorySpace.VMEM)
    smem = pl.BlockSpec(memory_space=pltpu.MemorySpace.SMEM)
    sp_g, ch_b = pl.pallas_call(
        functools.partial(_gate_kernel, C=C, H=H, W=W, training=training),
        in_specs=[vmem] * 6 + [smem],
        out_specs=(vmem, vmem),
        out_shape=(jax.ShapeDtypeStruct((1, BHW), f32),
                   jax.ShapeDtypeStruct((C, B), f32)),
        scratch_shapes=[pltpu.VMEM((16, BHW), f32)],
        compiler_params=par_b, cost_estimate=cost_b,
    )(pooled, se_part, wq_pad, w_se, w_fc1, w_fc2, scal)

    # ---- stage C: combine gates, final 1x1 conv, residual, ReLU ------------
    out = pl.pallas_call(
        functools.partial(_combine_kernel, B=B, HW=HW, TW=TW),
        grid=(n_tiles,),
        in_specs=[pl.BlockSpec((2 * C, TW), lambda t: (0, t)),
                  pl.BlockSpec((1, TW), lambda t: (0, t)),
                  pl.BlockSpec((C, B), lambda t: (0, 0)),
                  pl.BlockSpec((C, 2 * C), lambda t: (0, 0)),
                  pl.BlockSpec((C, C), lambda t: (0, 0))],
        out_specs=pl.BlockSpec((C, TW), lambda t: (0, t)),
        out_shape=jax.ShapeDtypeStruct((C, BHW), f32),
        compiler_params=par_c, cost_estimate=cost_c,
    )(slab, sp_g, ch_b, w_sm, w_c1)

    return jnp.transpose(out.reshape(C, B, H, W), (1, 0, 2, 3))


# ------------------------------ parameters ---------------------------------

def init_params(key, C, reduction=16):
    # Matches the module's own init loops: every Conv2d / Linear / BatchNorm2d
    # weight ~ N(0, 0.02); biases (and BN bias) zero; gamma = beta = 1.0.
    # BN running stats are the fresh-module values (mean 0, var 1); they are
    # only used when training=False.
    std = 0.02
    ks = jax.random.split(key, 7)
    return dict(
        w_smooth=std * jax.random.normal(ks[0], (C, 2 * C), jnp.float32),
        w_conv1x1=std * jax.random.normal(ks[1], (C, C), jnp.float32),
        w_spatial=std * jax.random.normal(ks[2], (2, 7, 7), jnp.float32),
        w_se=std * jax.random.normal(ks[3], (C, 2 * C), jnp.float32),
        w_fc1=std * jax.random.normal(ks[4], (C // reduction, C), jnp.float32),
        w_fc2=std * jax.random.normal(ks[5], (C, C // reduction), jnp.float32),
        scal=jnp.concatenate([
            std * jax.random.normal(ks[6], (1,), jnp.float32),   # bn weight
            jnp.array([0.0, 1.0, 1.0, 0.0, 1.0], jnp.float32),   # bn_b, gamma,
        ]),                                                      # beta, r_mean, r_var
    )


# --------------------------- pure-JAX reference ----------------------------

def reference_forward(x, x_down, params, *, training=True):
    """Plain f32 JAX mirror of the PyTorch module, for parity checking."""
    w_sm, w_c1 = params["w_smooth"], params["w_conv1x1"]
    w7, w_se = params["w_spatial"], params["w_se"]
    w_fc1, w_fc2 = params["w_fc1"], params["w_fc2"]
    bn_w, bn_b, gamma, beta, r_mean, r_var = [params["scal"][i] for i in range(6)]

    cat = jnp.concatenate([x, x_down], axis=1)
    x_att = jnp.einsum("oc,bchw->bohw", w_sm, cat)

    pool = jnp.concatenate([jnp.max(x_att, axis=1, keepdims=True),
                            jnp.mean(x_att, axis=1, keepdims=True)], axis=1)
    conv = lax.conv_general_dilated(pool, w7[None], window_strides=(1, 1),
                                    padding=((3, 3), (3, 3)),
                                    dimension_numbers=("NCHW", "OIHW", "NCHW"))
    if training:
        mu = jnp.mean(conv)
        var = jnp.mean((conv - mu) ** 2)
    else:
        mu, var = r_mean, r_var
    sp = jax.nn.sigmoid((conv - mu) * lax.rsqrt(var + 1e-5) * bn_w + bn_b)

    avg = jnp.mean(x_att, axis=(2, 3))
    mx = jnp.max(x_att, axis=(2, 3))
    y = jnp.concatenate([avg, mx], axis=1) @ w_se.T
    hid = jnp.maximum(y @ w_fc1.T, 0.0)
    s = jax.nn.sigmoid(hid @ w_fc2.T)
    ch = s[:, :, None, None]

    comb = x_att + gamma * (x_att * sp) + beta * (x_att * ch)
    out = jnp.einsum("oc,bchw->bohw", w_c1, comb)
    return jnp.maximum(x + out, 0.0)


if __name__ == "__main__":
    key = jax.random.PRNGKey(0)
    kx, kd, kp = jax.random.split(key, 3)
    B, C, H, W = 2, 32, 16, 16
    x = jax.random.normal(kx, (B, C, H, W), jnp.float32)
    x_down = jax.random.normal(kd, (B, C, H, W), jnp.float32)
    params = init_params(kp, C)

    # tile_lanes=256 -> 2 spatial tiles so the test exercises the grid path.
    fwd = jax.jit(functools.partial(skip_guidance_hr_forward,
                                    training=True, tile_lanes=256))
    out = fwd(x, x_down, params)
    jax.block_until_ready(out)

    ref = reference_forward(x, x_down, params, training=True)
    assert out.shape == (B, C, H, W)
    assert bool(jnp.all(jnp.isfinite(out)))
    max_err = float(jnp.max(jnp.abs(out - ref)))
    assert max_err < 3e-2, f"max abs error vs f32 reference: {max_err}"
    print("KERNEL_OK")
</pallas_src>

<mosaic_0001>
module attributes {stable_mosaic.version = 11 : i64} {
  func.func @_stats_kernel(%arg0: i32, %arg1: memref<64x256xf32, #tpu.memory_space<vmem>>, %arg2: memref<32x64xbf16, #tpu.memory_space<vmem>>, %arg3: memref<2x256xf32, #tpu.memory_space<vmem>>, %arg4: memref<1x64x2xf32, #tpu.memory_space<vmem>>) attributes {dimension_semantics = [#tpu.dimension_semantics<parallel>], iteration_bounds = array<i64: 2>, scalar_prefetch = 0 : i64, scratch_operands = 0 : i64, tpu.core_type = #tpu.core_type<tc>, window_params = [{transform_indices = @transform_0, window_bounds = array<i64: 64, 256>}, {pipeline_mode = #tpu.pipeline_mode<synchronous>, transform_indices = @transform_1, window_bounds = array<i64: 32, 64>}, {transform_indices = @transform_2, window_bounds = array<i64: 2, 256>}, {transform_indices = @transform_3, window_bounds = array<i64: 1, 64, 2>}]} {
    %c0 = arith.constant 0 : index
    %c0_0 = arith.constant 0 : index
    %0 = vector.load %arg1[%c0, %c0_0] : memref<64x256xf32, #tpu.memory_space<vmem>>, vector<64x256xf32>
    %c0_1 = arith.constant 0 : index
    %c0_2 = arith.constant 0 : index
    %1 = vector.load %arg2[%c0_1, %c0_2] : memref<32x64xbf16, #tpu.memory_space<vmem>>, vector<32x64xbf16>
    %2 = arith.truncf %0 : vector<64x256xf32> to vector<64x256xbf16>
    %cst = arith.constant dense<0.000000e+00> : vector<32x256xf32>
    %3 = tpu.matmul %1, %2, %cst {dimension_numbers = #tpu.dot_dimension_numbers<[1], [0], [0], [1], [0, 0, 1, 1], [], []>} : vector<32x64xbf16>, vector<64x256xbf16>, vector<32x256xf32> -> vector<32x256xf32>
    %cst_3 = arith.constant dense<0xFF800000> : vector<256xf32>
    %4 = vector.multi_reduction <maximumf>, %3, %cst_3 [0] : vector<32x256xf32> to vector<256xf32>
    %5 = vector.shape_cast %4 : vector<256xf32> to vector<1x256xf32>
    %cst_4 = arith.constant dense<0.000000e+00> : vector<256xf32>
    %6 = vector.multi_reduction <add>, %3, %cst_4 [0] : vector<32x256xf32> to vector<256xf32>
    %7 = vector.shape_cast %6 : vector<256xf32> to vector<1x256xf32>
    %cst_5 = arith.constant 3.200000e+01 : f32
    %8 = vector.broadcast %cst_5 : f32 to vector<1x256xf32>
    %9 = arith.divf %7, %8 : vector<1x256xf32>
    %10 = tpu.concatenate %5, %9 in 0 : vector<1x256xf32>, vector<1x256xf32> -> vector<2x256xf32>
    %c0_6 = arith.constant 0 : index
    %c0_7 = arith.constant 0 : index
    %11 = vector.load %arg3[%c0_6, %c0_7] : memref<2x256xf32, #tpu.memory_space<vmem>>, vector<2x256xf32>
    tpu.vector_store %arg3[%c0_6, %c0_7], %10 {strides = array<i32>} : memref<2x256xf32, #tpu.memory_space<vmem>>, vector<2x256xf32>,
    %c256_i32 = arith.constant 256 : i32
    %12 = arith.muli %arg0, %c256_i32 : i32
    %13 = tpu.iota {dimensions = array<i32: 1>} : vector<1x256xi32>
    %14 = vector.broadcast %12 : i32 to vector<1x256xi32>
    %15 = arith.addi %14, %13 : vector<1x256xi32>
    %c8_i32 = arith.constant 8 : i32
    %16 = vector.broadcast %c8_i32 : i32 to vector<1x256xi32>
    %17 = arith.shrsi %15, %16 : vector<1x256xi32>
    %c0_i32 = arith.constant 0 : i32
    %18 = vector.broadcast %c0_i32 : i32 to vector<1x256xi32>
    %19 = arith.cmpi eq, %17, %18 : vector<1x256xi32>
    %cst_8 = arith.constant 0.000000e+00 : f32
    %20 = vector.shape_cast %19 : vector<1x256xi1> to vector<1x256xi1>
    %21 = vector.broadcast %20 : vector<1x256xi1> to vector<32x256xi1>
    %22 = vector.broadcast %cst_8 : f32 to vector<32x256xf32>
    %23 = arith.select %21, %3, %22 : vector<32x256xi1>, vector<32x256xf32>
    %cst_9 = arith.constant dense<0.000000e+00> : vector<32xf32>
    %24 = vector.multi_reduction <add>, %23, %cst_9 [1] : vector<32x256xf32> to vector<32xf32>
    %25 = vector.shape_cast %24 : vector<32xf32> to vector<32x1xf32>
    %cst_10 = arith.constant 0xFF800000 : f32
    %26 = vector.shape_cast %19 : vector<1x256xi1> to vector<1x256xi1>
    %27 = vector.broadcast %26 : vector<1x256xi1> to vector<32x256xi1>
    %28 = vector.broadcast %cst_10 : f32 to vector<32x256xf32>
    %29 = arith.select %27, %3, %28 : vector<32x256xi1>, vector<32x256xf32>
    %cst_11 = arith.constant dense<0xFF800000> : vector<32xf32>
    %30 = vector.multi_reduction <maximumf>, %29, %cst_11 [1] : vector<32x256xf32> to vector<32xf32>
    %31 = vector.shape_cast %30 : vector<32xf32> to vector<32x1xf32>
    %c1_i32 = arith.constant 1 : i32
    %32 = vector.broadcast %c1_i32 : i32 to vector<1x256xi32>
    %33 = arith.cmpi eq, %17, %32 : vector<1x256xi32>
    %cst_12 = arith.constant 0.000000e+00 : f32
    %34 = vector.shape_cast %33 : vector<1x256xi1> to vector<1x256xi1>
    %35 = vector.broadcast %34 : vector<1x256xi1> to vector<32x256xi1>
    %36 = vector.broadcast %cst_12 : f32 to vector<32x256xf32>
    %37 = arith.select %35, %3, %36 : vector<32x256xi1>, vector<32x256xf32>
    %cst_13 = arith.constant dense<0.000000e+00> : vector<32xf32>
    %38 = vector.multi_reduction <add>, %37, %cst_13 [1] : vector<32x256xf32> to vector<32xf32>
    %39 = vector.shape_cast %38 : vector<32xf32> to vector<32x1xf32>
    %cst_14 = arith.constant 0xFF800000 : f32
    %40 = vector.shape_cast %33 : vector<1x256xi1> to vector<1x256xi1>
    %41 = vector.broadcast %40 : vector<1x256xi1> to vector<32x256xi1>
    %42 = vector.broadcast %cst_14 : f32 to vector<32x256xf32>
    %43 = arith.select %41, %3, %42 : vector<32x256xi1>, vector<32x256xf32>
    %cst_15 = arith.constant dense<0xFF800000> : vector<32xf32>
    %44 = vector.multi_reduction <maximumf>, %43, %cst_15 [1] : vector<32x256xf32> to vector<32xf32>
    %45 = vector.shape_cast %44 : vector<32xf32> to vector<32x1xf32>
    %46 = tpu.concatenate %25, %39 in 1 : vector<32x1xf32>, vector<32x1xf32> -> vector<32x2xf32>
    %47 = tpu.concatenate %31, %45 in 1 : vector<32x1xf32>, vector<32x1xf32> -> vector<32x2xf32>
    %48 = tpu.concatenate %46, %47 in 0 : vector<32x2xf32>, vector<32x2xf32> -> vector<64x2xf32>
    %c0_16 = arith.constant 0 : index
    %c0_17 = arith.constant 0 : index
    %c0_18 = arith.constant 0 : index
    %49 = vector.load %arg4[%c0_16, %c0_17, %c0_18] : memref<1x64x2xf32, #tpu.memory_space<vmem>>, vector<1x64x2xf32>
    %50 = vector.shape_cast %49 : vector<1x64x2xf32> to vector<64x2xf32>
    %51 = vector.shape_cast %48 : vector<64x2xf32> to vector<1x64x2xf32>
    tpu.vector_store %arg4[%c0_16, %c0_17, %c0_18], %51 {strides = array<i32>} : memref<1x64x2xf32, #tpu.memory_space<vmem>>, vector<1x64x2xf32>,
    return
  }
  func.func @transform_0(%arg0: i32) -> (i32, i32) {
    %c0_i32 = arith.constant 0 : i32
    %c0_i32_0 = arith.constant 0 : i32
    return %c0_i32, %arg0 : i32, i32
  }
  func.func @transform_1(%arg0: i32) -> (i32, i32) {
    %c0_i32 = arith.constant 0 : i32
    %c0_i32_0 = arith.constant 0 : i32
    %c0_i32_1 = arith.constant 0 : i32
    return %c0_i32, %c0_i32_0 : i32, i32
  }
  func.func @transform_2(%arg0: i32) -> (i32, i32) {
    %c0_i32 = arith.constant 0 : i32
    %c0_i32_0 = arith.constant 0 : i32
    return %c0_i32, %arg0 : i32, i32
  }
  func.func @transform_3(%arg0: i32) -> (i32, i32, i32) {
    %c0_i32 = arith.constant 0 : i32
    %c0_i32_0 = arith.constant 0 : i32
    %c0_i32_1 = arith.constant 0 : i32
    return %arg0, %c0_i32, %c0_i32_0 : i32, i32, i32
  }
}

module attributes {stable_mosaic.version = 11 : i64} {
  func.func @_gate_kernel(%arg0: memref<2x512xf32, #tpu.memory_space<vmem>>, %arg1: memref<2x64x2xf32, #tpu.memory_space<vmem>>, %arg2: memref<8x16xf32, #tpu.memory_space<vmem>>, %arg3: memref<32x64xf32, #tpu.memory_space<vmem>>, %arg4: memref<2x32xf32, #tpu.memory_space<vmem>>, %arg5: memref<32x2xf32, #tpu.memory_space<vmem>>, %arg6: memref<6xf32, #tpu.memory_space<smem>>, %arg7: memref<1x512xf32, #tpu.memory_space<vmem>>, %arg8: memref<32x2xf32, #tpu.memory_space<vmem>>, %arg9: memref<16x512xf32, #tpu.memory_space<vmem>>) attributes {dimension_semantics = [], scalar_prefetch = 0 : i64, scratch_operands = 1 : i64, tpu.core_type = #tpu.core_type<tc>} {
    %c0 = arith.constant 0 : index
    %c0_0 = arith.constant 0 : index
    %0 = vector.load %arg0[%c0, %c0_0] : memref<2x512xf32, #tpu.memory_space<vmem>>, vector<2x512xf32>
    %1 = tpu.iota {dimensions = array<i32: 1>} : vector<1x512xi32>
    %c255_i32 = arith.constant 255 : i32
    %2 = vector.broadcast %c255_i32 : i32 to vector<1x512xi32>
    %3 = arith.andi %1, %2 : vector<1x512xi32>
    %c4_i32 = arith.constant 4 : i32
    %4 = vector.broadcast %c4_i32 : i32 to vector<1x512xi32>
    %5 = arith.shrsi %3, %4 : vector<1x512xi32>
    %c15_i32 = arith.constant 15 : i32
    %6 = vector.broadcast %c15_i32 : i32 to vector<1x512xi32>
    %7 = arith.andi %1, %6 : vector<1x512xi32>
    %c-3_i32 = arith.constant -3 : i32
    %8 = vector.broadcast %c-3_i32 : i32 to vector<1x512xi32>
    %9 = arith.addi %5, %8 : vector<1x512xi32>
    %c0_i32 = arith.constant 0 : i32
    %10 = vector.broadcast %c0_i32 : i32 to vector<1x512xi32>
    %11 = arith.cmpi sge, %9, %10 : vector<1x512xi32>
    %c-3_i32_1 = arith.constant -3 : i32
    %12 = vector.broadcast %c-3_i32_1 : i32 to vector<1x512xi32>
    %13 = arith.addi %5, %12 : vector<1x512xi32>
    %c16_i32 = arith.constant 16 : i32
    %14 = vector.broadcast %c16_i32 : i32 to vector<1x512xi32>
    %15 = arith.cmpi slt, %13, %14 : vector<1x512xi32>
    %16 = arith.andi %11, %15 : vector<1x512xi1>
    %c48_i32 = arith.constant 48 : i32
    %17 = tpu.dynamic_rotate %0 by %c48_i32 dim 1 : vector<2x512xf32>, i32 -> vector<2x512xf32>
    %cst = arith.constant 0.000000e+00 : f32
    %18 = vector.shape_cast %16 : vector<1x512xi1> to vector<1x512xi1>
    %19 = vector.broadcast %18 : vector<1x512xi1> to vector<2x512xi1>
    %20 = vector.broadcast %cst : f32 to vector<2x512xf32>
    %21 = arith.select %19, %17, %20 : vector<2x512xi1>, vector<2x512xf32>
    %c0_2 = arith.constant 0 : index
    %c0_3 = arith.constant 0 : index
    %22 = vector.load %arg9[%c0_2, %c0_3] : memref<16x512xf32, #tpu.memory_space<vmem>>, vector<2x512xf32>
    tpu.vector_store %arg9[%c0_2, %c0_3], %21 {strides = array<i32>} : memref<16x512xf32, #tpu.memory_space<vmem>>, vector<2x512xf32>,
    %c-2_i32 = arith.constant -2 : i32
    %23 = vector.broadcast %c-2_i32 : i32 to vector<1x512xi32>
    %24 = arith.addi %5, %23 : vector<1x512xi32>
    %c0_i32_4 = arith.constant 0 : i32
    %25 = vector.broadcast %c0_i32_4 : i32 to vector<1x512xi32>
    %26 = arith.cmpi sge, %24, %25 : vector<1x512xi32>
    %c-2_i32_5 = arith.constant -2 : i32
    %27 = vector.broadcast %c-2_i32_5 : i32 to vector<1x512xi32>
    %28 = arith.addi %5, %27 : vector<1x512xi32>
    %c16_i32_6 = arith.constant 16 : i32
    %29 = vector.broadcast %c16_i32_6 : i32 to vector<1x512xi32>
    %30 = arith.cmpi slt, %28, %29 : vector<1x512xi32>
    %31 = arith.andi %26, %30 : vector<1x512xi1>
    %c32_i32 = arith.constant 32 : i32
    %32 = tpu.dynamic_rotate %0 by %c32_i32 dim 1 : vector<2x512xf32>, i32 -> vector<2x512xf32>
    %cst_7 = arith.constant 0.000000e+00 : f32
    %33 = vector.shape_cast %31 : vector<1x512xi1> to vector<1x512xi1>
    %34 = vector.broadcast %33 : vector<1x512xi1> to vector<2x512xi1>
    %35 = vector.broadcast %cst_7 : f32 to vector<2x512xf32>
    %36 = arith.select %34, %32, %35 : vector<2x512xi1>, vector<2x512xf32>
    %c2 = arith.constant 2 : index
    %c0_8 = arith.constant 0 : index
    %37 = vector.load %arg9[%c2, %c0_8] : memref<16x512xf32, #tpu.memory_space<vmem>>, vector<2x512xf32>
    tpu.vector_store %arg9[%c2, %c0_8], %36 {strides = array<i32>} : memref<16x512xf32, #tpu.memory_space<vmem>>, vector<2x512xf32>,
    %c-1_i32 = arith.constant -1 : i32
    %38 = vector.broadcast %c-1_i32 : i32 to vector<1x512xi32>
    %39 = arith.addi %5, %38 : vector<1x512xi32>
    %c0_i32_9 = arith.constant 0 : i32
    %40 = vector.broadcast %c0_i32_9 : i32 to vector<1x512xi32>
    %41 = arith.cmpi sge, %39, %40 : vector<1x512xi32>
    %c-1_i32_10 = arith.constant -1 : i32
    %42 = vector.broadcast %c-1_i32_10 : i32 to vector<1x512xi32>
    %43 = arith.addi %5, %42 : vector<1x512xi32>
    %c16_i32_11 = arith.constant 16 : i32
    %44 = vector.broadcast %c16_i32_11 : i32 to vector<1x512xi32>
    %45 = arith.cmpi slt, %43, %44 : vector<1x512xi32>
    %46 = arith.andi %41, %45 : vector<1x512xi1>
    %c16_i32_12 = arith.constant 16 : i32
    %47 = tpu.dynamic_rotate %0 by %c16_i32_12 dim 1 : vector<2x512xf32>, i32 -> vector<2x512xf32>
    %cst_13 = arith.constant 0.000000e+00 : f32
    %48 = vector.shape_cast %46 : vector<1x512xi1> to vector<1x512xi1>
    %49 = vector.broadcast %48 : vector<1x512xi1> to vector<2x512xi1>
    %50 = vector.broadcast %cst_13 : f32 to vector<2x512xf32>
    %51 = arith.select %49, %47, %50 : vector<2x512xi1>, vector<2x512xf32>
    %c4 = arith.constant 4 : index
    %c0_14 = arith.constant 0 : index
    %52 = vector.load %arg9[%c4, %c0_14] : memref<16x512xf32, #tpu.memory_space<vmem>>, vector<2x512xf32>
    tpu.vector_store %arg9[%c4, %c0_14], %51 {strides = array<i32>} : memref<16x512xf32, #tpu.memory_space<vmem>>, vector<2x512xf32>,
    %c6 = arith.constant 6 : index
    %c0_15 = arith.constant 0 : index
    %53 = vector.load %arg9[%c6, %c0_15] : memref<16x512xf32, #tpu.memory_space<vmem>>, vector<2x512xf32>
    tpu.vector_store %arg9[%c6, %c0_15], %0 {strides = array<i32>} : memref<16x512xf32, #tpu.memory_space<vmem>>, vector<2x512xf32>,
    %c1_i32 = arith.constant 1 : i32
    %54 = vector.broadcast %c1_i32 : i32 to vector<1x512xi32>
    %55 = arith.addi %5, %54 : vector<1x512xi32>
    %c0_i32_16 = arith.constant 0 : i32
    %56 = vector.broadcast %c0_i32_16 : i32 to vector<1x512xi32>
    %57 = arith.cmpi sge, %55, %56 : vector<1x512xi32>
    %c1_i32_17 = arith.constant 1 : i32
    %58 = vector.broadcast %c1_i32_17 : i32 to vector<1x512xi32>
    %59 = arith.addi %5, %58 : vector<1x512xi32>
    %c16_i32_18 = arith.constant 16 : i32
    %60 = vector.broadcast %c16_i32_18 : i32 to vector<1x512xi32>
    %61 = arith.cmpi slt, %59, %60 : vector<1x512xi32>
    %62 = arith.andi %57, %61 : vector<1x512xi1>
    %c496_i32 = arith.constant 496 : i32
    %63 = tpu.dynamic_rotate %0 by %c496_i32 dim 1 : vector<2x512xf32>, i32 -> vector<2x512xf32>
    %cst_19 = arith.constant 0.000000e+00 : f32
    %64 = vector.shape_cast %62 : vector<1x512xi1> to vector<1x512xi1>
    %65 = vector.broadcast %64 : vector<1x512xi1> to vector<2x512xi1>
    %66 = vector.broadcast %cst_19 : f32 to vector<2x512xf32>
    %67 = arith.select %65, %63, %66 : vector<2x512xi1>, vector<2x512xf32>
    %c8 = arith.constant 8 : index
    %c0_20 = arith.constant 0 : index
    %68 = vector.load %arg9[%c8, %c0_20] : memref<16x512xf32, #tpu.memory_space<vmem>>, vector<2x512xf32>
    tpu.vector_store %arg9[%c8, %c0_20], %67 {strides = array<i32>} : memref<16x512xf32, #tpu.memory_space<vmem>>, vector<2x512xf32>,
    %c2_i32 = arith.constant 2 : i32
    %69 = vector.broadcast %c2_i32 : i32 to vector<1x512xi32>
    %70 = arith.addi %5, %69 : vector<1x512xi32>
    %c0_i32_21 = arith.constant 0 : i32
    %71 = vector.broadcast %c0_i32_21 : i32 to vector<1x512xi32>
    %72 = arith.cmpi sge, %70, %71 : vector<1x512xi32>
    %c2_i32_22 = arith.constant 2 : i32
    %73 = vector.broadcast %c2_i32_22 : i32 to vector<1x512xi32>
    %74 = arith.addi %5, %73 : vector<1x512xi32>
    %c16_i32_23 = arith.constant 16 : i32
    %75 = vector.broadcast %c16_i32_23 : i32 to vector<1x512xi32>
    %76 = arith.cmpi slt, %74, %75 : vector<1x512xi32>
    %77 = arith.andi %72, %76 : vector<1x512xi1>
    %c480_i32 = arith.constant 480 : i32
    %78 = tpu.dynamic_rotate %0 by %c480_i32 dim 1 : vector<2x512xf32>, i32 -> vector<2x512xf32>
    %cst_24 = arith.constant 0.000000e+00 : f32
    %79 = vector.shape_cast %77 : vector<1x512xi1> to vector<1x512xi1>
    %80 = vector.broadcast %79 : vector<1x512xi1> to vector<2x512xi1>
    %81 = vector.broadcast %cst_24 : f32 to vector<2x512xf32>
    %82 = arith.select %80, %78, %81 : vector<2x512xi1>, vector<2x512xf32>
    %c10 = arith.constant 10 : index
    %c0_25 = arith.constant 0 : index
    %83 = vector.load %arg9[%c10, %c0_25] : memref<16x512xf32, #tpu.memory_space<vmem>>, vector<2x512xf32>
    tpu.vector_store %arg9[%c10, %c0_25], %82 {strides = array<i32>} : memref<16x512xf32, #tpu.memory_space<vmem>>, vector<2x512xf32>,
    %c3_i32 = arith.constant 3 : i32
    %84 = vector.broadcast %c3_i32 : i32 to vector<1x512xi32>
    %85 = arith.addi %5, %84 : vector<1x512xi32>
    %c0_i32_26 = arith.constant 0 : i32
    %86 = vector.broadcast %c0_i32_26 : i32 to vector<1x512xi32>
    %87 = arith.cmpi sge, %85, %86 : vector<1x512xi32>
    %c3_i32_27 = arith.constant 3 : i32
    %88 = vector.broadcast %c3_i32_27 : i32 to vector<1x512xi32>
    %89 = arith.addi %5, %88 : vector<1x512xi32>
    %c16_i32_28 = arith.constant 16 : i32
    %90 = vector.broadcast %c16_i32_28 : i32 to vector<1x512xi32>
    %91 = arith.cmpi slt, %89, %90 : vector<1x512xi32>
    %92 = arith.andi %87, %91 : vector<1x512xi1>
    %c464_i32 = arith.constant 464 : i32
    %93 = tpu.dynamic_rotate %0 by %c464_i32 dim 1 : vector<2x512xf32>, i32 -> vector<2x512xf32>
    %cst_29 = arith.constant 0.000000e+00 : f32
    %94 = vector.shape_cast %92 : vector<1x512xi1> to vector<1x512xi1>
    %95 = vector.broadcast %94 : vector<1x512xi1> to vector<2x512xi1>
    %96 = vector.broadcast %cst_29 : f32 to vector<2x512xf32>
    %97 = arith.select %95, %93, %96 : vector<2x512xi1>, vector<2x512xf32>
    %c12 = arith.constant 12 : index
    %c0_30 = arith.constant 0 : index
    %98 = vector.load %arg9[%c12, %c0_30] : memref<16x512xf32, #tpu.memory_space<vmem>>, vector<2x512xf32>
    tpu.vector_store %arg9[%c12, %c0_30], %97 {strides = array<i32>} : memref<16x512xf32, #tpu.memory_space<vmem>>, vector<2x512xf32>,
    %cst_31 = arith.constant 0.000000e+00 : f32
    %99 = vector.broadcast %cst_31 : f32 to vector<2x512xf32>
    %c14 = arith.constant 14 : index
    %c0_32 = arith.constant 0 : index
    %100 = vector.load %arg9[%c14, %c0_32] : memref<16x512xf32, #tpu.memory_space<vmem>>, vector<2x512xf32>
    tpu.vector_store %arg9[%c14, %c0_32], %99 {strides = array<i32>} : memref<16x512xf32, #tpu.memory_space<vmem>>, vector<2x512xf32>,
    %c0_33 = arith.constant 0 : index
    %c0_34 = arith.constant 0 : index
    %101 = vector.load %arg2[%c0_33, %c0_34] : memref<8x16xf32, #tpu.memory_space<vmem>>, vector<8x16xf32>
    %c0_35 = arith.constant 0 : index
    %c0_36 = arith.constant 0 : index
    %102 = vector.load %arg9[%c0_35, %c0_36] : memref<16x512xf32, #tpu.memory_space<vmem>>, vector<16x512xf32>
    %cst_37 = arith.constant dense<0.000000e+00> : vector<8x512xf32>
    %103 = tpu.matmul %101, %102, %cst_37 {dimension_numbers = #tpu.dot_dimension_numbers<[1], [0], [0], [1], [0, 0, 1, 1], [], []>} : vector<8x16xf32>, vector<16x512xf32>, vector<8x512xf32> -> vector<8x512xf32>
    %104 = vector.extract_strided_slice %103 {offsets = [3, 0], sizes = [1, 512], strides = [1, 1]} : vector<8x512xf32> to vector<1x512xf32>
    %c-3_i32_38 = arith.constant -3 : i32
    %105 = vector.broadcast %c-3_i32_38 : i32 to vector<1x512xi32>
    %106 = arith.addi %7, %105 : vector<1x512xi32>
    %c0_i32_39 = arith.constant 0 : i32
    %107 = vector.broadcast %c0_i32_39 : i32 to vector<1x512xi32>
    %108 = arith.cmpi sge, %106, %107 : vector<1x512xi32>
    %c-3_i32_40 = arith.constant -3 : i32
    %109 = vector.broadcast %c-3_i32_40 : i32 to vector<1x512xi32>
    %110 = arith.addi %7, %109 : vector<1x512xi32>
    %c16_i32_41 = arith.constant 16 : i32
    %111 = vector.broadcast %c16_i32_41 : i32 to vector<1x512xi32>
    %112 = arith.cmpi slt, %110, %111 : vector<1x512xi32>
    %113 = arith.andi %108, %112 : vector<1x512xi1>
    %114 = vector.extract_strided_slice %103 {offsets = [0, 0], sizes = [1, 512], strides = [1, 1]} : vector<8x512xf32> to vector<1x512xf32>
    %c3_i32_42 = arith.constant 3 : i32
    %115 = tpu.dynamic_rotate %114 by %c3_i32_42 dim 1 : vector<1x512xf32>, i32 -> vector<1x512xf32>
    %cst_43 = arith.constant 0.000000e+00 : f32
    %116 = vector.broadcast %cst_43 : f32 to vector<1x512xf32>
    %117 = arith.select %113, %115, %116 : vector<1x512xi1>, vector<1x512xf32>
    %118 = arith.addf %104, %117 : vector<1x512xf32>
    %c-2_i32_44 = arith.constant -2 : i32
    %119 = vector.broadcast %c-2_i32_44 : i32 to vector<1x512xi32>
    %120 = arith.addi %7, %119 : vector<1x512xi32>
    %c0_i32_45 = arith.constant 0 : i32
    %121 = vector.broadcast %c0_i32_45 : i32 to vector<1x512xi32>
    %122 = arith.cmpi sge, %120, %121 : vector<1x512xi32>
    %c-2_i32_46 = arith.constant -2 : i32
    %123 = vector.broadcast %c-2_i32_46 : i32 to vector<1x512xi32>
    %124 = arith.addi %7, %123 : vector<1x512xi32>
    %c16_i32_47 = arith.constant 16 : i32
    %125 = vector.broadcast %c16_i32_47 : i32 to vector<1x512xi32>
    %126 = arith.cmpi slt, %124, %125 : vector<1x512xi32>
    %127 = arith.andi %122, %126 : vector<1x512xi1>
    %128 = vector.extract_strided_slice %103 {offsets = [1, 0], sizes = [1, 512], strides = [1, 1]} : vector<8x512xf32> to vector<1x512xf32>
    %c2_i32_48 = arith.constant 2 : i32
    %129 = tpu.dynamic_rotate %128 by %c2_i32_48 dim 1 : vector<1x512xf32>, i32 -> vector<1x512xf32>
    %cst_49 = arith.constant 0.000000e+00 : f32
    %130 = vector.broadcast %cst_49 : f32 to vector<1x512xf32>
    %131 = arith.select %127, %129, %130 : vector<1x512xi1>, vector<1x512xf32>
    %132 = arith.addf %118, %131 : vector<1x512xf32>
    %c-1_i32_50 = arith.constant -1 : i32
    %133 = vector.broadcast %c-1_i32_50 : i32 to vector<1x512xi32>
    %134 = arith.addi %7, %133 : vector<1x512xi32>
    %c0_i32_51 = arith.constant 0 : i32
    %135 = vector.broadcast %c0_i32_51 : i32 to vector<1x512xi32>
    %136 = arith.cmpi sge, %134, %135 : vector<1x512xi32>
    %c-1_i32_52 = arith.constant -1 : i32
    %137 = vector.broadcast %c-1_i32_52 : i32 to vector<1x512xi32>
    %138 = arith.addi %7, %137 : vector<1x512xi32>
    %c16_i32_53 = arith.constant 16 : i32
    %139 = vector.broadcast %c16_i32_53 : i32 to vector<1x512xi32>
    %140 = arith.cmpi slt, %138, %139 : vector<1x512xi32>
    %141 = arith.andi %136, %140 : vector<1x512xi1>
    %142 = vector.extract_strided_slice %103 {offsets = [2, 0], sizes = [1, 512], strides = [1, 1]} : vector<8x512xf32> to vector<1x512xf32>
    %c1_i32_54 = arith.constant 1 : i32
    %143 = tpu.dynamic_rotate %142 by %c1_i32_54 dim 1 : vector<1x512xf32>, i32 -> vector<1x512xf32>
    %cst_55 = arith.constant 0.000000e+00 : f32
    %144 = vector.broadcast %cst_55 : f32 to vector<1x512xf32>
    %145 = arith.select %141, %143, %144 : vector<1x512xi1>, vector<1x512xf32>
    %146 = arith.addf %132, %145 : vector<1x512xf32>
    %c1_i32_56 = arith.constant 1 : i32
    %147 = vector.broadcast %c1_i32_56 : i32 to vector<1x512xi32>
    %148 = arith.addi %7, %147 : vector<1x512xi32>
    %c0_i32_57 = arith.constant 0 : i32
    %149 = vector.broadcast %c0_i32_57 : i32 to vector<1x512xi32>
    %150 = arith.cmpi sge, %148, %149 : vector<1x512xi32>
    %c1_i32_58 = arith.constant 1 : i32
    %151 = vector.broadcast %c1_i32_58 : i32 to vector<1x512xi32>
    %152 = arith.addi %7, %151 : vector<1x512xi32>
    %c16_i32_59 = arith.constant 16 : i32
    %153 = vector.broadcast %c16_i32_59 : i32 to vector<1x512xi32>
    %154 = arith.cmpi slt, %152, %153 : vector<1x512xi32>
    %155 = arith.andi %150, %154 : vector<1x512xi1>
    %156 = vector.extract_strided_slice %103 {offsets = [4, 0], sizes = [1, 512], strides = [1, 1]} : vector<8x512xf32> to vector<1x512xf32>
    %c511_i32 = arith.constant 511 : i32
    %157 = tpu.dynamic_rotate %156 by %c511_i32 dim 1 : vector<1x512xf32>, i32 -> vector<1x512xf32>
    %cst_60 = arith.constant 0.000000e+00 : f32
    %158 = vector.broadcast %cst_60 : f32 to vector<1x512xf32>
    %159 = arith.select %155, %157, %158 : vector<1x512xi1>, vector<1x512xf32>
    %160 = arith.addf %146, %159 : vector<1x512xf32>
    %c2_i32_61 = arith.constant 2 : i32
    %161 = vector.broadcast %c2_i32_61 : i32 to vector<1x512xi32>
    %162 = arith.addi %7, %161 : vector<1x512xi32>
    %c0_i32_62 = arith.constant 0 : i32
    %163 = vector.broadcast %c0_i32_62 : i32 to vector<1x512xi32>
    %164 = arith.cmpi sge, %162, %163 : vector<1x512xi32>
    %c2_i32_63 = arith.constant 2 : i32
    %165 = vector.broadcast %c2_i32_63 : i32 to vector<1x512xi32>
    %166 = arith.addi %7, %165 : vector<1x512xi32>
    %c16_i32_64 = arith.constant 16 : i32
    %167 = vector.broadcast %c16_i32_64 : i32 to vector<1x512xi32>
    %168 = arith.cmpi slt, %166, %167 : vector<1x512xi32>
    %169 = arith.andi %164, %168 : vector<1x512xi1>
    %170 = vector.extract_strided_slice %103 {offsets = [5, 0], sizes = [1, 512], strides = [1, 1]} : vector<8x512xf32> to vector<1x512xf32>
    %c510_i32 = arith.constant 510 : i32
    %171 = tpu.dynamic_rotate %170 by %c510_i32 dim 1 : vector<1x512xf32>, i32 -> vector<1x512xf32>
    %cst_65 = arith.constant 0.000000e+00 : f32
    %172 = vector.broadcast %cst_65 : f32 to vector<1x512xf32>
    %173 = arith.select %169, %171, %172 : vector<1x512xi1>, vector<1x512xf32>
    %174 = arith.addf %160, %173 : vector<1x512xf32>
    %c3_i32_66 = arith.constant 3 : i32
    %175 = vector.broadcast %c3_i32_66 : i32 to vector<1x512xi32>
    %176 = arith.addi %7, %175 : vector<1x512xi32>
    %c0_i32_67 = arith.constant 0 : i32
    %177 = vector.broadcast %c0_i32_67 : i32 to vector<1x512xi32>
    %178 = arith.cmpi sge, %176, %177 : vector<1x512xi32>
    %c3_i32_68 = arith.constant 3 : i32
    %179 = vector.broadcast %c3_i32_68 : i32 to vector<1x512xi32>
    %180 = arith.addi %7, %179 : vector<1x512xi32>
    %c16_i32_69 = arith.constant 16 : i32
    %181 = vector.broadcast %c16_i32_69 : i32 to vector<1x512xi32>
    %182 = arith.cmpi slt, %180, %181 : vector<1x512xi32>
    %183 = arith.andi %178, %182 : vector<1x512xi1>
    %184 = vector.extract_strided_slice %103 {offsets = [6, 0], sizes = [1, 512], strides = [1, 1]} : vector<8x512xf32> to vector<1x512xf32>
    %c509_i32 = arith.constant 509 : i32
    %185 = tpu.dynamic_rotate %184 by %c509_i32 dim 1 : vector<1x512xf32>, i32 -> vector<1x512xf32>
    %cst_70 = arith.constant 0.000000e+00 : f32
    %186 = vector.broadcast %cst_70 : f32 to vector<1x512xf32>
    %187 = arith.select %183, %185, %186 : vector<1x512xi1>, vector<1x512xf32>
    %188 = arith.addf %174, %187 : vector<1x512xf32>
    %c0_71 = arith.constant 0 : index
    %189 = memref.load %arg6[%c0_71] : memref<6xf32, #tpu.memory_space<smem>>
    %c1 = arith.constant 1 : index
    %190 = memref.load %arg6[%c1] : memref<6xf32, #tpu.memory_space<smem>>
    %c2_72 = arith.constant 2 : index
    %191 = memref.load %arg6[%c2_72] : memref<6xf32, #tpu.memory_space<smem>>
    %c3 = arith.constant 3 : index
    %192 = memref.load %arg6[%c3] : memref<6xf32, #tpu.memory_space<smem>>
    %193 = vector.shape_cast %188 : vector<1x512xf32> to vector<1x1x512xf32>
    %cst_73 = arith.constant dense<0.000000e+00> : vector<1xf32>
    %194 = vector.multi_reduction <add>, %193, %cst_73 [1, 2] : vector<1x1x512xf32> to vector<1xf32>
    %195 = vector.shape_cast %194 : vector<1xf32> to vector<1x1x1xf32>
    %196 = vector.extract %195[0, 0, 0] : f32 from vector<1x1x1xf32>
    %cst_74 = arith.constant 5.120000e+02 : f32
    %197 = arith.divf %196, %cst_74 : f32
    %198 = vector.broadcast %197 : f32 to vector<1x512xf32>
    %199 = arith.subf %188, %198 : vector<1x512xf32>
    %200 = arith.mulf %199, %199 : vector<1x512xf32>
    %201 = vector.shape_cast %200 : vector<1x512xf32> to vector<1x1x512xf32>
    %cst_75 = arith.constant dense<0.000000e+00> : vector<1xf32>
    %202 = vector.multi_reduction <add>, %201, %cst_75 [1, 2] : vector<1x1x512xf32> to vector<1xf32>
    %203 = vector.shape_cast %202 : vector<1xf32> to vector<1x1x1xf32>
    %204 = vector.extract %203[0, 0, 0] : f32 from vector<1x1x1xf32>
    %cst_76 = arith.constant 5.120000e+02 : f32
    %205 = arith.divf %204, %cst_76 : f32
    %206 = vector.broadcast %197 : f32 to vector<1x512xf32>
    %207 = arith.subf %188, %206 : vector<1x512xf32>
    %cst_77 = arith.constant 9.99999974E-6 : f32
    %208 = arith.addf %205, %cst_77 : f32
    %209 = math.rsqrt %208 : f32
    %210 = vector.broadcast %209 : f32 to vector<1x512xf32>
    %211 = arith.mulf %207, %210 : vector<1x512xf32>
    %212 = vector.broadcast %189 : f32 to vector<1x512xf32>
    %213 = arith.mulf %211, %212 : vector<1x512xf32>
    %214 = vector.broadcast %190 : f32 to vector<1x512xf32>
    %215 = arith.addf %213, %214 : vector<1x512xf32>
    %216 = arith.negf %215 : vector<1x512xf32>
    %217 = math.exp %216 : vector<1x512xf32>
    %cst_78 = arith.constant 1.000000e+00 : f32
    %218 = vector.broadcast %cst_78 : f32 to vector<1x512xf32>
    %219 = arith.addf %218, %217 : vector<1x512xf32>
    %220 = arith.divf %218, %219 : vector<1x512xf32>
    %221 = vector.broadcast %191 : f32 to vector<1x512xf32>
    %222 = arith.mulf %221, %220 : vector<1x512xf32>
    %c0_79 = arith.constant 0 : index
    %c0_80 = arith.constant 0 : index
    %223 = vector.load %arg7[%c0_79, %c0_80] : memref<1x512xf32, #tpu.memory_space<vmem>>, vector<1x512xf32>
    tpu.vector_store %arg7[%c0_79, %c0_80], %222 {strides = array<i32>} : memref<1x512xf32, #tpu.memory_space<vmem>>, vector<1x512xf32>,
    %c0_81 = arith.constant 0 : index
    %c0_82 = arith.constant 0 : index
    %c0_83 = arith.constant 0 : index
    %224 = vector.load %arg1[%c0_81, %c0_82, %c0_83] : memref<2x64x2xf32, #tpu.memory_space<vmem>>, vector<2x64x2xf32>
    %225 = vector.extract_strided_slice %224 {offsets = [0, 0, 0], sizes = [2, 32, 2], strides = [1, 1, 1]} : vector<2x64x2xf32> to vector<2x32x2xf32>
    %cst_84 = arith.constant dense<0.000000e+00> : vector<32x2xf32>
    %226 = vector.multi_reduction <add>, %225, %cst_84 [0] : vector<2x32x2xf32> to vector<32x2xf32>
    %cst_85 = arith.constant 3.906250e-03 : f32
    %227 = vector.broadcast %cst_85 : f32 to vector<32x2xf32>
    %228 = arith.mulf %226, %227 : vector<32x2xf32>
    %229 = vector.extract_strided_slice %224 {offsets = [0, 32, 0], sizes = [2, 32, 2], strides = [1, 1, 1]} : vector<2x64x2xf32> to vector<2x32x2xf32>
    %cst_86 = arith.constant dense<0xFF800000> : vector<32x2xf32>
    %230 = vector.multi_reduction <maximumf>, %229, %cst_86 [0] : vector<2x32x2xf32> to vector<32x2xf32>
    %231 = tpu.concatenate %228, %230 in 0 : vector<32x2xf32>, vector<32x2xf32> -> vector<64x2xf32>
    %c0_87 = arith.constant 0 : index
    %c0_88 = arith.constant 0 : index
    %232 = vector.load %arg3[%c0_87, %c0_88] : memref<32x64xf32, #tpu.memory_space<vmem>>, vector<32x64xf32>
    %cst_89 = arith.constant dense<0.000000e+00> : vector<32x2xf32>
    %233 = tpu.matmul %232, %231, %cst_89 {dimension_numbers = #tpu.dot_dimension_numbers<[1], [0], [0], [1], [0, 0, 1, 1], [], []>} : vector<32x64xf32>, vector<64x2xf32>, vector<32x2xf32> -> vector<32x2xf32>
    %c0_90 = arith.constant 0 : index
    %c0_91 = arith.constant 0 : index
    %234 = vector.load %arg4[%c0_90, %c0_91] : memref<2x32xf32, #tpu.memory_space<vmem>>, vector<2x32xf32>
    %cst_92 = arith.constant dense<0.000000e+00> : vector<2x2xf32>
    %235 = tpu.matmul %234, %233, %cst_92 {dimension_numbers = #tpu.dot_dimension_numbers<[1], [0], [0], [1], [0, 0, 1, 1], [], []>} : vector<2x32xf32>, vector<32x2xf32>, vector<2x2xf32> -> vector<2x2xf32>
    %cst_93 = arith.constant 0.000000e+00 : f32
    %236 = vector.broadcast %cst_93 : f32 to vector<2x2xf32>
    %237 = arith.maximumf %235, %236 : vector<2x2xf32>
    %c0_94 = arith.constant 0 : index
    %c0_95 = arith.constant 0 : index
    %238 = vector.load %arg5[%c0_94, %c0_95] : memref<32x2xf32, #tpu.memory_space<vmem>>, vector<32x2xf32>
    %cst_96 = arith.constant dense<0.000000e+00> : vector<32x2xf32>
    %239 = tpu.matmul %238, %237, %cst_96 {dimension_numbers = #tpu.dot_dimension_numbers<[1], [0], [0], [1], [0, 0, 1, 1], [], []>} : vector<32x2xf32>, vector<2x2xf32>, vector<32x2xf32> -> vector<32x2xf32>
    %240 = arith.negf %239 : vector<32x2xf32>
    %241 = math.exp %240 : vector<32x2xf32>
    %cst_97 = arith.constant 1.000000e+00 : f32
    %242 = vector.broadcast %cst_97 : f32 to vector<32x2xf32>
    %243 = arith.addf %242, %241 : vector<32x2xf32>
    %244 = arith.divf %242, %243 : vector<32x2xf32>
    %245 = vector.broadcast %192 : f32 to vector<32x2xf32>
    %246 = arith.mulf %245, %244 : vector<32x2xf32>
    %c0_98 = arith.constant 0 : index
    %c0_99 = arith.constant 0 : index
    %247 = vector.load %arg8[%c0_98, %c0_99] : memref<32x2xf32, #tpu.memory_space<vmem>>, vector<32x2xf32>
    tpu.vector_store %arg8[%c0_98, %c0_99], %246 {strides = array<i32>} : memref<32x2xf32, #tpu.memory_space<vmem>>, vector<32x2xf32>,
    return
  }
}

module attributes {stable_mosaic.version = 11 : i64} {
  func.func @_combine_kernel(%arg0: i32, %arg1: memref<64x256xf32, #tpu.memory_space<vmem>>, %arg2: memref<1x256xf32, #tpu.memory_space<vmem>>, %arg3: memref<32x2xf32, #tpu.memory_space<vmem>>, %arg4: memref<32x64xbf16, #tpu.memory_space<vmem>>, %arg5: memref<32x32xbf16, #tpu.memory_space<vmem>>, %arg6: memref<32x256xf32, #tpu.memory_space<vmem>>) attributes {dimension_semantics = [#tpu.dimension_semantics<parallel>], iteration_bounds = array<i64: 2>, scalar_prefetch = 0 : i64, scratch_operands = 0 : i64, tpu.core_type = #tpu.core_type<tc>, window_params = [{transform_indices = @transform_0, window_bounds = array<i64: 64, 256>}, {transform_indices = @transform_1, window_bounds = array<i64: 1, 256>}, {pipeline_mode = #tpu.pipeline_mode<synchronous>, transform_indices = @transform_2, window_bounds = array<i64: 32, 2>}, {pipeline_mode = #tpu.pipeline_mode<synchronous>, transform_indices = @transform_3, window_bounds = array<i64: 32, 64>}, {pipeline_mode = #tpu.pipeline_mode<synchronous>, transform_indices = @transform_4, window_bounds = array<i64: 32, 32>}, {transform_indices = @transform_5, window_bounds = array<i64: 32, 256>}]} {
    %c0 = arith.constant 0 : index
    %c0_0 = arith.constant 0 : index
    %0 = vector.load %arg1[%c0, %c0_0] : memref<64x256xf32, #tpu.memory_space<vmem>>, vector<64x256xf32>
    %c0_1 = arith.constant 0 : index
    %c0_2 = arith.constant 0 : index
    %1 = vector.load %arg4[%c0_1, %c0_2] : memref<32x64xbf16, #tpu.memory_space<vmem>>, vector<32x64xbf16>
    %2 = arith.truncf %0 : vector<64x256xf32> to vector<64x256xbf16>
    %cst = arith.constant dense<0.000000e+00> : vector<32x256xf32>
    %3 = tpu.matmul %1, %2, %cst {dimension_numbers = #tpu.dot_dimension_numbers<[1], [0], [0], [1], [0, 0, 1, 1], [], []>} : vector<32x64xbf16>, vector<64x256xbf16>, vector<32x256xf32> -> vector<32x256xf32>
    %c256_i32 = arith.constant 256 : i32
    %4 = arith.muli %arg0, %c256_i32 : i32
    %5 = tpu.iota {dimensions = array<i32: 1>} : vector<1x256xi32>
    %6 = vector.broadcast %4 : i32 to vector<1x256xi32>
    %7 = arith.addi %6, %5 : vector<1x256xi32>
    %c8_i32 = arith.constant 8 : i32
    %8 = vector.broadcast %c8_i32 : i32 to vector<1x256xi32>
    %9 = arith.shrsi %7, %8 : vector<1x256xi32>
    %c0_3 = arith.constant 0 : index
    %c0_4 = arith.constant 0 : index
    %10 = vector.load %arg3[%c0_3, %c0_4] : memref<32x2xf32, #tpu.memory_space<vmem>>, vector<32x2xf32>
    %c0_i32 = arith.constant 0 : i32
    %11 = vector.broadcast %c0_i32 : i32 to vector<1x256xi32>
    %12 = arith.cmpi eq, %9, %11 : vector<1x256xi32>
    %13 = vector.extract_strided_slice %10 {offsets = [0, 0], sizes = [32, 1], strides = [1, 1]} : vector<32x2xf32> to vector<32x1xf32>
    %cst_5 = arith.constant 0.000000e+00 : f32
    %14 = vector.shape_cast %12 : vector<1x256xi1> to vector<1x256xi1>
    %15 = vector.broadcast %14 : vector<1x256xi1> to vector<32x256xi1>
    %16 = vector.shape_cast %13 : vector<32x1xf32> to vector<32x1xf32>
    %17 = vector.broadcast %16 : vector<32x1xf32> to vector<32x256xf32>
    %18 = vector.broadcast %cst_5 : f32 to vector<32x256xf32>
    %19 = arith.select %15, %17, %18 : vector<32x256xi1>, vector<32x256xf32>
    %c1_i32 = arith.constant 1 : i32
    %20 = vector.broadcast %c1_i32 : i32 to vector<1x256xi32>
    %21 = arith.cmpi eq, %9, %20 : vector<1x256xi32>
    %22 = vector.extract_strided_slice %10 {offsets = [0, 1], sizes = [32, 1], strides = [1, 1]} : vector<32x2xf32> to vector<32x1xf32>
    %cst_6 = arith.constant 0.000000e+00 : f32
    %23 = vector.shape_cast %21 : vector<1x256xi1> to vector<1x256xi1>
    %24 = vector.broadcast %23 : vector<1x256xi1> to vector<32x256xi1>
    %25 = vector.shape_cast %22 : vector<32x1xf32> to vector<32x1xf32>
    %26 = vector.broadcast %25 : vector<32x1xf32> to vector<32x256xf32>
    %27 = vector.broadcast %cst_6 : f32 to vector<32x256xf32>
    %28 = arith.select %24, %26, %27 : vector<32x256xi1>, vector<32x256xf32>
    %29 = arith.addf %19, %28 : vector<32x256xf32>
    %c0_7 = arith.constant 0 : index
    %c0_8 = arith.constant 0 : index
    %30 = vector.load %arg2[%c0_7, %c0_8] : memref<1x256xf32, #tpu.memory_space<vmem>>, vector<1x256xf32>
    %cst_9 = arith.constant 1.000000e+00 : f32
    %31 = vector.broadcast %cst_9 : f32 to vector<1x256xf32>
    %32 = arith.addf %31, %30 : vector<1x256xf32>
    %33 = vector.broadcast %32 : vector<1x256xf32> to vector<32x256xf32>
    %34 = arith.addf %33, %29 : vector<32x256xf32>
    %35 = arith.mulf %3, %34 : vector<32x256xf32>
    %c0_10 = arith.constant 0 : index
    %c0_11 = arith.constant 0 : index
    %36 = vector.load %arg5[%c0_10, %c0_11] : memref<32x32xbf16, #tpu.memory_space<vmem>>, vector<32x32xbf16>
    %37 = arith.truncf %35 : vector<32x256xf32> to vector<32x256xbf16>
    %cst_12 = arith.constant dense<0.000000e+00> : vector<32x256xf32>
    %38 = tpu.matmul %36, %37, %cst_12 {dimension_numbers = #tpu.dot_dimension_numbers<[1], [0], [0], [1], [0, 0, 1, 1], [], []>} : vector<32x32xbf16>, vector<32x256xbf16>, vector<32x256xf32> -> vector<32x256xf32>
    %39 = vector.extract_strided_slice %0 {offsets = [0, 0], sizes = [32, 256], strides = [1, 1]} : vector<64x256xf32> to vector<32x256xf32>
    %40 = arith.addf %39, %38 : vector<32x256xf32>
    %cst_13 = arith.constant 0.000000e+00 : f32
    %41 = vector.broadcast %cst_13 : f32 to vector<32x256xf32>
    %42 = arith.maximumf %40, %41 : vector<32x256xf32>
    %c0_14 = arith.constant 0 : index
    %c0_15 = arith.constant 0 : index
    %43 = vector.load %arg6[%c0_14, %c0_15] : memref<32x256xf32, #tpu.memory_space<vmem>>, vector<32x256xf32>
    tpu.vector_store %arg6[%c0_14, %c0_15], %42 {strides = array<i32>} : memref<32x256xf32, #tpu.memory_space<vmem>>, vector<32x256xf32>,
    return
  }
  func.func @transform_0(%arg0: i32) -> (i32, i32) {
    %c0_i32 = arith.constant 0 : i32
    %c0_i32_0 = arith.constant 0 : i32
    return %c0_i32, %arg0 : i32, i32
  }
  func.func @transform_1(%arg0: i32) -> (i32, i32) {
    %c0_i32 = arith.constant 0 : i32
    %c0_i32_0 = arith.constant 0 : i32
    return %c0_i32, %arg0 : i32, i32
  }
  func.func @transform_2(%arg0: i32) -> (i32, i32) {
    %c0_i32 = arith.constant 0 : i32
    %c0_i32_0 = arith.constant 0 : i32
    %c0_i32_1 = arith.constant 0 : i32
    return %c0_i32, %c0_i32_0 : i32, i32
  }
  func.func @transform_3(%arg0: i32) -> (i32, i32) {
    %c0_i32 = arith.constant 0 : i32
    %c0_i32_0 = arith.constant 0 : i32
    %c0_i32_1 = arith.constant 0 : i32
    return %c0_i32, %c0_i32_0 : i32, i32
  }
  func.func @transform_4(%arg0: i32) -> (i32, i32) {
    %c0_i32 = arith.constant 0 : i32
    %c0_i32_0 = arith.constant 0 : i32
    %c0_i32_1 = arith.constant 0 : i32
    return %c0_i32, %c0_i32_0 : i32, i32
  }
  func.func @transform_5(%arg0: i32) -> (i32, i32) {
    %c0_i32 = arith.constant 0 : i32
    %c0_i32_0 = arith.constant 0 : i32
    return %c0_i32, %arg0 : i32, i32
  }
}

</mosaic_0001>

<bundles_post_ra>
// kernel: skip_guidance_hr_forward.3
= control target key start
LH: loop header
LB: loop body
LE: loop exit
PB: predicated region body
PF: predicated region fallthrough
CT: control target
= control target key end

     0   :  { %s701_s12 = smov 0   ;;  %s703_s13 = smov 0   ;;  %s945_s0 = inlined_call_operand.vmem [shape: f32[64,512], index: 0, kind: input, shape index: {}]   ;;  %s946_s1 = inlined_call_operand.vmem [shape: bf16[32,64], index: 1, kind: input, shape index: {}]   ;;  %s947_s2 = inlined_call_operand.vmem [shape: f32[2,512], index: 2, kind: output, shape index: {0}]   ;;  %s948_s3 = inlined_call_operand.vmem [shape: f32[2,64,2], index: 3, kind: output, shape index: {1}]  }
   0x1   :  { %s705_s14 = smov 0  }
   0x2 LB: > { %s717_s15 = sadd.s32 4294967295, %s678_s14   ;;  %s720_s16 = sadd.s32 1, %s678_s14   ;;  %s678_s14 = sphi %s705_s14, %s960_s14   ;;  %s674_s13 = sphi %s703_s13, %s959_s13   ;;  %s670_s12 = sphi %s701_s12, %s958_s12  }
   0x3   : > { %s18_s17 = ssub.s32 %s678_s14, %s720_s16  ;;  %s21_s18 = sadd.s32 1, %s674_s13 }
   0x4   : > { %p19_p0 = scmp.eq.s32.totalorder %s18_s17, 0  ;;  %p28_p1 = scmp.ne.s32.totalorder %s674_s13, %s670_s12 }
   0x5   : > { %p29_p2 = scmp.eq.s32.totalorder %s678_s14, 0  ;;  %p592_p4 = scmp.ge.s32.totalorder %s678_s14, 2 }
   0x6   : > { %s729_s19 = scalar_select %p19_p0, %s674_s13, %s21_s18  }
   0x7   : > { %p30_p3 = por %p29_p2, %p28_p1  ;;  %130 = sbr.rel (%p592_p4) target bundleno = 32 (0x20), region = 20 }
   0xc   : > { %133 = sbr.rel (!%p30_p3) target bundleno = 32 (0x20), region = 24  ;;  %s135_s20 = sand.u32 (%p30_p3), 1, %s674_s13  }
   0xd   : > { %s617_s21 = sshll.u32 (%p30_p3), %s678_s14, 4  ;;  %s593_s22 = sshll.u32 (%p30_p3), %s135_s20, 7 }
   0xe   : > { %s737_s25 = scalar_lea.vmem (%p30_p3), %s945_s0, %s617_s21  ;;  %s137_s26 = scalar_lea.vmem (%p30_p3), [#allocation2], %s593_s22 }
   0xf   : > { %v153_v0 = vld [vmem:[%s737_s25] sm:$0xff] (%p30_p3)  ;;  %v155_v1 = vld [vmem:[%s737_s25 + $0x8] sm:$0xff] (%p30_p3) }
  0x10   : > { %v157_v2 = vld [vmem:[%s737_s25 + $0x20] sm:$0xff] (%p30_p3)  ;;  %154 = vst [vmem:[%s137_s26] sm:$0xff] (%p30_p3), %v153_v0  ;;  %v159_v3 = vld [vmem:[%s737_s25 + $0x28] sm:$0xff] (%p30_p3) }
  0x11   : > { %156 = vst [vmem:[%s137_s26 + $0x8] sm:$0xff] %v155_v1  ;;  %v161_v4 = vld [vmem:[%s737_s25 + $0x40] sm:$0xff]  ;;  %v163_v5 = vld [vmem:[%s737_s25 + $0x48] sm:$0xff] }
  0x12   : > { %158 = vst [vmem:[%s137_s26 + $0x10] sm:$0xff] %v157_v2  ;;  %v165_v6 = vld [vmem:[%s737_s25 + $0x60] sm:$0xff]  ;;  %v167_v7 = vld [vmem:[%s737_s25 + $0x68] sm:$0xff] }
  0x13   : > { %160 = vst [vmem:[%s137_s26 + $0x18] sm:$0xff] %v159_v3  ;;  %v169_v8 = vld [vmem:[%s737_s25 + $0x80] sm:$0xff]  ;;  %v171_v9 = vld [vmem:[%s737_s25 + $0x88] sm:$0xff] }
  0x14   : > { %162 = vst [vmem:[%s137_s26 + $0x20] sm:$0xff] %v161_v4  ;;  %v173_v10 = vld [vmem:[%s737_s25 + $0xa0] sm:$0xff]  ;;  %v175_v11 = vld [vmem:[%s737_s25 + $0xa8] sm:$0xff] }
  0x15   : > { %164 = vst [vmem:[%s137_s26 + $0x28] sm:$0xff] %v163_v5  ;;  %v177_v12 = vld [vmem:[%s737_s25 + $0xc0] sm:$0xff]  ;;  %v179_v13 = vld [vmem:[%s737_s25 + $0xc8] sm:$0xff] }
  0x16   : > { %166 = vst [vmem:[%s137_s26 + $0x30] sm:$0xff] %v165_v6  ;;  %v181_v14 = vld [vmem:[%s737_s25 + $0xe0] sm:$0xff]  ;;  %v183_v15 = vld [vmem:[%s737_s25 + $0xe8] sm:$0xff] }
  0x17   : > { %168 = vst [vmem:[%s137_s26 + $0x38] sm:$0xff] %v167_v7 }
  0x18   : > { %170 = vst [vmem:[%s137_s26 + $0x40] sm:$0xff] %v169_v8 }
  0x19   : > { %172 = vst [vmem:[%s137_s26 + $0x48] sm:$0xff] %v171_v9 }
  0x1a   : > { %174 = vst [vmem:[%s137_s26 + $0x50] sm:$0xff] %v173_v10 }
  0x1b   : > { %176 = vst [vmem:[%s137_s26 + $0x58] sm:$0xff] %v175_v11 }
  0x1c   : > { %178 = vst [vmem:[%s137_s26 + $0x60] sm:$0xff] %v177_v12 }
  0x1d   : > { %180 = vst [vmem:[%s137_s26 + $0x68] sm:$0xff] %v179_v13 }
  0x1e   : > { %182 = vst [vmem:[%s137_s26 + $0x70] sm:$0xff] %v181_v14 }
  0x1f   : > { %184 = vst [vmem:[%s137_s26 + $0x78] sm:$0xff] %v183_v15 }
  0x20 PF: > { %p596_p5 = scmp.ge.s32.totalorder %s678_s14, 1  ;;  %p189_p6 = scmp.lt.s32.totalorder %s678_s14, 3 }
  0x22   : > { %p190_p7 = pnand %p596_p5, %p189_p6 }
  0x23   : > { %s196_s27 = sand.u32 (!%p190_p7), 1, %s670_s12   ;;  %s614_s7 = sshll.u32 (!%p190_p7), %s717_s15, 8 }
  0x24   : > { %193 = sbr.rel (%p190_p7) target bundleno = 347 (0x15b), region = 47  ;;  %s597_s28 = sshll.u32 (!%p190_p7), %s196_s27, 7 }
  0x25   : > { %s198_s29 = scalar_lea.vmem (!%p190_p7), [#allocation2], %s597_s28  ;;  %s598_s8 = sshll.u32 (!%p190_p7), %s717_s15, 1 }
  0x26   : > { %p852_p8 = scmp.lt.s32.totalorder (!%p190_p7), %s598_s8, 3  ;;  %p231_p9 = scmp.lt.s32.totalorder (!%p190_p7), %s717_s15, 1 }
  0x29   : > { %v249_v16 = vld [vmem:[%s198_s29 + $0x60] sm:$0xff]  ;;  %v251_v17 = vld [vmem:[%s198_s29 + $0x70] sm:$0xff]  ;;  %v250_v18 = vld [vmem:[%s198_s29 + $0x68] sm:$0xff]  ;;  %vm275_vm0 = vcmask 523264   ;;  %v376_v42 = vlaneseq  ;;  %v379_v45 = vstv %s614_s7  ;;  %v680_v53 = vmov 32.0   ;;  %s962_s8 = smov (!%p852_p8, %s598_s8), 3 }
  0x2a   : > { %v263_v19 = vpack.c.bf16 %v251_v17, %v249_v16  ;;  %v252_v20 = vld [vmem:[%s198_s29 + $0x78] sm:$0xff]  ;;  %v245_v21 = vld [vmem:[%s198_s29 + $0x40] sm:$0xff]  ;;  %v247_v22 = vld [vmem:[%s198_s29 + $0x50] sm:$0xff]  ;;  %654 = vrcp.f32 %v680_v53  ;;  %vm365_vm6 = vcmask 1040384   ;;  %s599_s10 = sshll.u32 %s962_s8, 1  ;;  %vm371_vm7 = vcmask 1041408  }
  0x2b   : > { %v264_v23 = vpack.c.bf16 %v252_v20, %v250_v18  ;;  %v246_v24 = vld [vmem:[%s198_s29 + $0x48] sm:$0xff]  ;;  %v248_v25 = vld [vmem:[%s198_s29 + $0x58] sm:$0xff]  ;;  %v261_v26 = vpack.c.bf16 %v247_v22, %v245_v21  ;;  %v241_v28 = vld [vmem:[%s198_s29 + $0x20] sm:$0xff]  ;;  %v377_v43 = vand.u32 127, %v376_v42  ;;  %s229_s14 = scalar_lea.vmem %s947_s2, %s599_s10  ;;  %s964_s15 = smov (!%p231_p9, %s717_s15), 1  ;;  %vm476_vm8 = vcmask 7168  }
  0x2c   : > { %286 = vmatpush.bf16.msra.mxu0 %v263_v19  ;;  %621 = vmatpush.bf16.msra.mxu2 %v263_v19  ;;  %v262_v27 = vpack.c.bf16 %v248_v25, %v246_v24  ;;  %v243_v29 = vld [vmem:[%s198_s29 + $0x30] sm:$0xff]  ;;  %v242_v30 = vld [vmem:[%s198_s29 + $0x28] sm:$0xff]  ;;  %v244_v31 = vld [vmem:[%s198_s29 + $0x38] sm:$0xff]  ;;  %s618_s17 = sshll.u32 %s964_s15, 6  ;;  %vm485_vm9 = vcmask 15360  }
  0x2d   : > { %305 = vmatpush.bf16.msra.mxu1 %v264_v23  ;;  %625 = vmatpush.bf16.msra.mxu3 %v264_v23  ;;  %v259_v32 = vpack.c.bf16 %v243_v29, %v241_v28  ;;  %v260_v33 = vpack.c.bf16 %v244_v31, %v242_v30  ;;  %v237_v34 = vld [vmem:[%s198_s29] sm:$0xff]  ;;  %v239_v35 = vld [vmem:[%s198_s29 + $0x10] sm:$0xff]  ;;  %v238_v36 = vld [vmem:[%s198_s29 + $0x8] sm:$0xff]  ;;  %v378_v44 = vadd.s32 128, %v377_v43  ;;  %v380_v46 = vadd.s32 %v379_v45, %v377_v43  ;;  %s235_s21 = scalar_lea.vmem %s948_s3, %s618_s17 }
  0x2e   : > { %v240_v37 = vld [vmem:[%s198_s29 + $0x18] sm:$0xff]  ;;  %v257_v38 = vpack.c.bf16 %v239_v35, %v237_v34  ;;  %v619_v40 = vld [vmem:[%s946_s1] sm:$0xff]  ;;  %v620_v41 = vld [vmem:[%s946_s1 + $0x8] sm:$0xff] }
  0x2f   : > { %v258_v39 = vpack.c.bf16 %v240_v37, %v238_v36  ;;  %v381_v47 = vadd.s32 %v379_v45, %v378_v44  ;;  %v382_v48 = vshra.s32 %v380_v46, 8 }
  0x30   : > { %287 = vmatpush.bf16.msra.mxu0 %v261_v26  ;;  %622 = vmatpush.bf16.msra.mxu2 %v261_v26  ;;  %v789_v63 = vpop.eup %654 }
  0x31   : > { %306 = vmatpush.bf16.msra.mxu1 %v262_v27  ;;  %626 = vmatpush.bf16.msra.mxu3 %v262_v27  ;;  %v383_v49 = vshra.s32 %v381_v47, 8  ;;  %vm765_vm1 = vcmp.eq.s32.totalorder %v382_v48, 0  ;;  %vm781_vm3 = vcmp.eq.s32.totalorder %v382_v48, 1  ;;  %v357_v12 = vmul.f32 32.0, %v789_v63 }
  0x32   : > { %vm361_vm5 = vweird.f32 %v789_v63 }
  0x33   : > { %vm769_vm2 = vcmp.eq.s32.totalorder %v383_v49, 0  ;;  %vm785_vm4 = vcmp.eq.s32.totalorder %v383_v49, 1  ;;  %v358_v18 = vsub.f32 1.0, %v357_v12 }
  0x34   : > { %288 = vmatpush.bf16.msra.mxu0 %v259_v32  ;;  %623 = vmatpush.bf16.msra.mxu2 %v259_v32 }
  0x35   : > { %307 = vmatpush.bf16.msra.mxu1 %v260_v33  ;;  %627 = vmatpush.bf16.msra.mxu3 %v260_v33  ;;  %v359_v35 = vmul.f32 %v789_v63, %v358_v18 }
  0x37   : > { %v360_v47 = vadd.f32 %v789_v63, %v359_v35 }
  0x38   : > { %289 = vmatpush.bf16.msra.mxu0 %v257_v38  ;;  %624 = vmatpush.bf16.msra.mxu2 %v257_v38 }
  0x39   : > { %308 = vmatpush.bf16.msra.mxu1 %v258_v39  ;;  %628 = vmatpush.bf16.msra.mxu3 %v258_v39 }
  0x3b   : > { %610 = vmatmul.msk.bf16.vlgmr.msra.gmra.mxu0 %vm275_vm0, %v619_v40  ;;  %611 = vmatmul.msk.bf16.vlgmr.msra.gmra.mxu2 %vm275_vm0, %v620_v41 }
  0x3c   : > { %612 = vmatmul.msk.bf16.vlgmr.msra.gmra.mxu1 %vm275_vm0, %v619_v40  ;;  %613 = vmatmul.msk.bf16.vlgmr.msra.gmra.mxu3 %vm275_vm0, %v620_v41 }
  0xb8   : > { %v291_v52 = vpop.f32.mrf.mxu0 }
  0xb9   : > { %v310_v54 = vpop.f32.mrf.mxu1  ;;  %v410_v55 = vsel %vm765_vm1, %v291_v52, -inf  ;;  %v390_v56 = vsel %vm765_vm1, %v291_v52, 0.0  ;;  %v436_v3 = vsel %vm781_vm3, %v291_v52, 0.0  ;;  %v456_v7 = vsel %vm781_vm3, %v291_v52, -inf }
  0xba   : > { %v411_v57 = vsel %vm769_vm2, %v310_v54, -inf  ;;  %v391_v58 = vsel %vm769_vm2, %v310_v54, 0.0  ;;  %v437_v6 = vsel %vm785_vm4, %v310_v54, 0.0  ;;  %v457_v8 = vsel %vm785_vm4, %v310_v54, -inf }
  0xbb   : > { %v418_v59 = vmax.f32 %v410_v55, %v411_v57  ;;  %v398_v60 = vadd.f32 %v391_v58, %v390_v56  ;;  %v444_v14 = vadd.f32 %v437_v6, %v436_v3  ;;  %v464_v15 = vmax.f32 %v456_v7, %v457_v8 }
  0xbc   : > { %v362_v7 = vsel %vm361_vm5, %v789_v63, %v360_v47 }
  0xbd   : > { %419 = vmax.xlane.f32.xlu2 %v418_v59  ;;  %399 = vadd.xlane.f32.xlu0 %v398_v60 }
  0xbe   : > { %v791_v0 = vpop.f32.mrf.mxu2 }
  0xbf   : > { %v793_v1 = vpop.f32.mrf.mxu3  ;;  %v394_v2 = vsel %vm765_vm1, %v791_v0, 0.0  ;;  %v320_v16 = vmax.f32 %v291_v52, %v791_v0  ;;  %v440_v21 = vsel %vm781_vm3, %v791_v0, 0.0  ;;  %v414_v23 = vsel %vm765_vm1, %v791_v0, -inf }
  0xc0   : > { %v800_v4 = vpop.f32.mrf.mxu0  ;;  %v395_v5 = vsel %vm769_vm2, %v793_v1, 0.0  ;;  %v441_v22 = vsel %vm785_vm4, %v793_v1, 0.0  ;;  %v329_v24 = vmax.f32 %v310_v54, %v793_v1  ;;  %v415_v28 = vsel %vm769_vm2, %v793_v1, -inf }
  0xc1   : > { %v338_v9 = vadd.f32 %v800_v4, %v291_v52  ;;  %v812_v10 = vpop.f32.mrf.mxu1  ;;  %v404_v11 = vadd.f32 %v395_v5, %v394_v2  ;;  %v412_v31 = vsel %vm765_vm1, %v800_v4, -inf  ;;  %v450_v36 = vadd.f32 %v441_v22, %v440_v21 }
  0xc2   : > { %v347_v13 = vadd.f32 %v812_v10, %v310_v54  ;;  %v413_v32 = vsel %vm769_vm2, %v812_v10, -inf  ;;  %v424_v41 = vmax.f32 %v414_v23, %v415_v28  ;;  %v392_v56 = vsel %vm765_vm1, %v800_v4, 0.0 }
  0xc3   : > { %405 = vadd.xlane.f32.xlu1 %v404_v11  ;;  %v339_v17 = vadd.f32 %v338_v9, %v791_v0  ;;  %v421_v42 = vmax.f32 %v412_v31, %v413_v32  ;;  %v393_v57 = vsel %vm769_vm2, %v812_v10, 0.0  ;;  %v460_v23 = vsel %vm781_vm3, %v791_v0, -inf }
  0xc4   : > { %v348_v20 = vadd.f32 %v347_v13, %v793_v1  ;;  %v461_v50 = vsel %vm785_vm4, %v793_v1, -inf  ;;  %v438_v51 = vsel %vm781_vm3, %v800_v4, 0.0  ;;  %v458_v31 = vsel %vm781_vm3, %v800_v4, -inf }
  0xc5   : > { %445 = vadd.xlane.f32.xlu2 %v444_v14  ;;  %465 = vmax.xlane.f32.xlu0 %v464_v15  ;;  %v401_v14 = vadd.f32 %v393_v57, %v392_v56  ;;  %v470_v1 = vmax.f32 %v460_v23, %v461_v50  ;;  %v459_v32 = vsel %vm785_vm4, %v812_v10, -inf }
  0xc6   : > { %v818_v19 = vpop.f32.mrf.mxu2  ;;  %v467_v35 = vmax.f32 %v458_v31, %v459_v32 }
  0xc7   : > { %v321_v25 = vmax.f32 %v800_v4, %v818_v19  ;;  %v340_v26 = vadd.f32 %v339_v17, %v818_v19  ;;  %v834_v27 = vpop.f32.mrf.mxu3  ;;  %v396_v52 = vsel %vm765_vm1, %v818_v19, 0.0  ;;  %v442_v60 = vsel %vm781_vm3, %v818_v19, 0.0 }
  0xc8   : > { %v330_v29 = vmax.f32 %v812_v10, %v834_v27  ;;  %v349_v30 = vadd.f32 %v348_v20, %v834_v27  ;;  %v397_v53 = vsel %vm769_vm2, %v834_v27, 0.0  ;;  %v443_v2 = vsel %vm785_vm4, %v834_v27, 0.0 }
  0xc9   : > { %v322_v33 = vmax.f32 %v320_v16, %v321_v25  ;;  %v341_v34 = vrot.slane %v340_v26, 4  ;;  %v407_v6 = vadd.f32 %v397_v53, %v396_v52  ;;  %v453_v13 = vadd.f32 %v443_v2, %v442_v60 }
  0xca   : > { %v331_v37 = vmax.f32 %v329_v24, %v330_v29  ;;  %v350_v38 = vrot.slane %v349_v30, 4  ;;  %v416_v17 = vsel %vm765_vm1, %v818_v19, -inf  ;;  %v417_v63 = vsel %vm769_vm2, %v834_v27, -inf }
  0xcb   : > { %v323_v39 = vrot.slane %v322_v33, 4  ;;  %v342_v40 = vadd.f32 %v341_v34, %v340_v26  ;;  %451 = vadd.xlane.f32.xlu1 %v450_v36  ;;  %v439_v25 = vsel %vm785_vm4, %v812_v10, 0.0  ;;  %v427_v0 = vmax.f32 %v416_v17, %v417_v63 }
  0xcc   : > { %v332_v43 = vrot.slane %v331_v37, 4  ;;  %v351_v44 = vadd.f32 %v350_v38, %v349_v30  ;;  %v447_v30 = vadd.f32 %v439_v25, %v438_v51  ;;  %v463_v34 = vsel %vm785_vm4, %v834_v27, -inf }
  0xcd   : > { %v324_v45 = vmax.f32 %v322_v33, %v323_v39  ;;  %v343_v46 = vrot.slane %v342_v40, 2  ;;  %425 = vmax.xlane.f32.xlu0 %v424_v41  ;;  %422 = vmax.xlane.f32.xlu2 %v421_v42  ;;  %v462_v33 = vsel %vm781_vm3, %v818_v19, -inf }
  0xce   : > { %v333_v48 = vmax.f32 %v331_v37, %v332_v43  ;;  %v352_v49 = vrot.slane %v351_v44, 2  ;;  %v473_v36 = vmax.f32 %v462_v33, %v463_v34 }
  0xcf   : > { %v325_v54 = vrot.slane %v324_v45, 2  ;;  %v344_v55 = vadd.f32 %v343_v46, %v342_v40 }
  0xd0   : > { %v334_v58 = vrot.slane %v333_v48, 2  ;;  %v353_v59 = vadd.f32 %v352_v49, %v351_v44 }
  0xd1   : > { %v326_v3 = vmax.f32 %v324_v45, %v325_v54  ;;  %v345_v5 = vrot.slane %v344_v55, 1 }
  0xd2   : > { %v335_v8 = vmax.f32 %v333_v48, %v334_v58  ;;  %v354_v9 = vrot.slane %v353_v59, 1 }
  0xd3   : > { %v327_v11 = vrot.slane %v326_v3, 1  ;;  %v346_v12 = vadd.f32 %v345_v5, %v344_v55  ;;  %408 = vadd.xlane.f32.xlu1 %v407_v6 }
  0xd4   : > { %v336_v15 = vrot.slane %v335_v8, 1  ;;  %v355_v16 = vadd.f32 %v354_v9, %v353_v59 }
  0xd5   : > { %454 = vadd.xlane.f32.xlu2 %v453_v13  ;;  %402 = vadd.xlane.f32.xlu0 %v401_v14  ;;  %v328_v18 = vmax.f32 %v326_v3, %v327_v11  ;;  %v363_v20 = vmul.f32 %v362_v7, %v346_v12 }
  0xd6   : > { %v337_v21 = vmax.f32 %v335_v8, %v336_v15  ;;  %v364_v22 = vmul.f32 %v362_v7, %v355_v16 }
  0xd7   : > { %v366_v28 = vsel %vm365_vm6, %v328_v18, %v363_v20 }
  0xd8   : > { %v367_v24 = vsel %vm365_vm6, %v337_v21, %v364_v22 }
  0xd9   : > { %v370_v26 = vrot.slane %v367_v24, 6 }
  0xdb   : > { %v372_v29 = vsel %vm371_vm7, %v366_v28, %v370_v26  ;;  %428 = vmax.xlane.f32.xlu1 %v427_v0 }
  0xdc   : > { %374 = vst [vmem:[%s229_s14] sm:$0xf] %v372_v29 }
  0xdd   : > { %471 = vmax.xlane.f32.xlu2 %v470_v1  ;;  %448 = vadd.xlane.f32.xlu0 %v447_v30 }
  0xe3   : > { %468 = vmax.xlane.f32.xlu1 %v467_v35 }
  0xe5   : > { %474 = vmax.xlane.f32.xlu0 %v473_v36 }
 0x130   : > { %v420_v37 = vpop.xlane.xlu2 %419  ;;  %v400_v38 = vpop.xlane.xlu0 %399 }
 0x136   : > { %v406_v4 = vpop.xlane.xlu1 %405 }
 0x138   : > { %v446_v61 = vpop.xlane.xlu2 %445  ;;  %v466_v10 = vpop.xlane.xlu0 %465 }
 0x139   : > { %v477_v62 = vsel %vm476_vm8, %v400_v38, %v446_v61  ;;  %v481_v19 = vsel %vm476_vm8, %v420_v37, %v466_v10 }
 0x13a   : > { %486 = vst.msk [vmem:[%s235_s21] sm:$0xff] %vm485_vm9, %v477_v62 }
 0x13b   : > { %490 = vst.msk [vmem:[%s235_s21 + $0x20] sm:$0xff] %vm485_vm9, %v481_v19 }
 0x13e   : > { %v452_v27 = vpop.xlane.xlu1 %451 }
 0x13f   : > { %v479_v39 = vsel %vm476_vm8, %v406_v4, %v452_v27 }
 0x140   : > { %488 = vst.msk [vmem:[%s235_s21 + $0x10] sm:$0xff] %vm485_vm9, %v479_v39  ;;  %v426_v40 = vpop.xlane.xlu0 %425  ;;  %v423_v41 = vpop.xlane.xlu2 %422 }
 0x146   : > { %v409_v42 = vpop.xlane.xlu1 %408 }
 0x148   : > { %v455_v43 = vpop.xlane.xlu2 %454  ;;  %v403_v44 = vpop.xlane.xlu0 %402 }
 0x149   : > { %v480_v45 = vsel %vm476_vm8, %v409_v42, %v455_v43 }
 0x14a   : > { %489 = vst.msk [vmem:[%s235_s21 + $0x18] sm:$0xff] %vm485_vm9, %v480_v45 }
 0x14e   : > { %v429_v46 = vpop.xlane.xlu1 %428 }
 0x150   : > { %v472_v47 = vpop.xlane.xlu2 %471  ;;  %v449_v48 = vpop.xlane.xlu0 %448 }
 0x151   : > { %v483_v49 = vsel %vm476_vm8, %v426_v40, %v472_v47  ;;  %v478_v52 = vsel %vm476_vm8, %v403_v44, %v449_v48 }
 0x152   : > { %492 = vst.msk [vmem:[%s235_s21 + $0x30] sm:$0xff] %vm485_vm9, %v483_v49 }
 0x153   : > { %487 = vst.msk [vmem:[%s235_s21 + $0x8] sm:$0xff] %vm485_vm9, %v478_v52 }
 0x156   : > { %v469_v53 = vpop.xlane.xlu1 %468 }
 0x157   : > { %v482_v54 = vsel %vm476_vm8, %v423_v41, %v469_v53 }
 0x158   : > { %491 = vst.msk [vmem:[%s235_s21 + $0x28] sm:$0xff] %vm485_vm9, %v482_v54  ;;  %v475_v55 = vpop.xlane.xlu0 %474 }
 0x159   : > { %v484_v56 = vsel %vm476_vm8, %v429_v46, %v475_v55 }
 0x15a   : > { %493 = vst.msk [vmem:[%s235_s21 + $0x38] sm:$0xff] %vm485_vm9, %v484_v56 }
 0x15b PF: > { %p11_p10 = scmp.ge.s32.totalorder %s720_s16, 4   ;;  %s958_s12 = smov %s674_s13 }
 0x15c   : > { %s959_s13 = smov %s729_s19  ;;  %s960_s14 = smov %s720_s16 }
 0x15d   :  { %13 = sbr.rel (!%p11_p10) target bundleno = 2 (0x2), region = 98 }

// kernel: skip_guidance_hr_forward.5
= control target key start
LH: loop header
LB: loop body
LE: loop exit
PB: predicated region body
PF: predicated region fallthrough
CT: control target
= control target key end

     0   :  { %s808_s18 = smov 0   ;;  %s810_s19 = smov 0   ;;  %s1041_s0 = inlined_call_operand.vmem [shape: f32[64,512], index: 0, kind: input, shape index: {}]   ;;  %s1042_s1 = inlined_call_operand.vmem [shape: f32[1,512], index: 1, kind: input, shape index: {}]   ;;  %s1043_s2 = inlined_call_operand.vmem [shape: f32[32,2], index: 2, kind: input, shape index: {}]   ;;  %s1044_s3 = inlined_call_operand.vmem [shape: bf16[32,64], index: 3, kind: input, shape index: {}]   ;;  %s1045_s4 = inlined_call_operand.vmem [shape: bf16[32,32], index: 4, kind: input, shape index: {}]   ;;  %s1046_s5 = inlined_call_operand.vmem [shape: f32[32,512], index: 5, kind: output, shape index: {}]  }
   0x1   :  { %s812_s20 = smov 0  }
   0x2 LB: > { %s824_s21 = sadd.s32 4294967295, %s774_s20   ;;  %s827_s22 = sadd.s32 1, %s774_s20   ;;  %s774_s20 = sphi %s812_s20, %s1058_s20   ;;  %s770_s19 = sphi %s810_s19, %s1057_s19   ;;  %s766_s18 = sphi %s808_s18, %s1056_s18  }
   0x3   : > { %s19_s23 = ssub.s32 %s774_s20, %s827_s22  ;;  %s22_s24 = sadd.s32 1, %s770_s19 }
   0x4   : > { %p20_p0 = scmp.eq.s32.totalorder %s19_s23, 0  ;;  %p29_p1 = scmp.ne.s32.totalorder %s770_s19, %s766_s18 }
   0x5   : > { %p30_p2 = scmp.eq.s32.totalorder %s774_s20, 0  ;;  %p148_p3 = scmp.eq.s32.totalorder %s824_s21, 1 }
   0x6   : > { %s837_s25 = scalar_select %p20_p0, %s770_s19, %s22_s24  }
   0x7   : > { %p31_p4 = por %p30_p2, %p29_p1  ;;  %p839_p5 = por %p148_p3, %p29_p1 }
   0x8   : > { %p678_p6 = scmp.ge.s32.totalorder %s774_s20, 2 }
   0xa   : > { %179 = sbr.rel (%p678_p6) target bundleno = 35 (0x23), region = 28 }
   0xf   : > { %182 = sbr.rel (!%p31_p4) target bundleno = 35 (0x23), region = 32  ;;  %s184_s27 = sand.u32 (%p31_p4), 1, %s770_s19  }
  0x10   : > { %s716_s28 = sshll.u32 (%p31_p4), %s774_s20, 4  ;;  %s679_s29 = sshll.u32 (%p31_p4), %s184_s27, 7 }
  0x11   : > { %s849_s7 = scalar_lea.vmem (%p31_p4), %s1041_s0, %s716_s28  ;;  %s186_s8 = scalar_lea.vmem (%p31_p4), [#allocation2], %s679_s29 }
  0x12   : > { %v202_v0 = vld [vmem:[%s849_s7] sm:$0xff] (%p31_p4)  ;;  %v204_v1 = vld [vmem:[%s849_s7 + $0x8] sm:$0xff] (%p31_p4) }
  0x13   : > { %v206_v2 = vld [vmem:[%s849_s7 + $0x20] sm:$0xff] (%p31_p4)  ;;  %203 = vst [vmem:[%s186_s8] sm:$0xff] (%p31_p4), %v202_v0  ;;  %v208_v3 = vld [vmem:[%s849_s7 + $0x28] sm:$0xff] (%p31_p4) }
  0x14   : > { %205 = vst [vmem:[%s186_s8 + $0x8] sm:$0xff] %v204_v1  ;;  %v210_v4 = vld [vmem:[%s849_s7 + $0x40] sm:$0xff]  ;;  %v212_v5 = vld [vmem:[%s849_s7 + $0x48] sm:$0xff] }
  0x15   : > { %207 = vst [vmem:[%s186_s8 + $0x10] sm:$0xff] %v206_v2  ;;  %v214_v6 = vld [vmem:[%s849_s7 + $0x60] sm:$0xff]  ;;  %v216_v7 = vld [vmem:[%s849_s7 + $0x68] sm:$0xff] }
  0x16   : > { %209 = vst [vmem:[%s186_s8 + $0x18] sm:$0xff] %v208_v3  ;;  %v218_v8 = vld [vmem:[%s849_s7 + $0x80] sm:$0xff]  ;;  %v220_v9 = vld [vmem:[%s849_s7 + $0x88] sm:$0xff] }
  0x17   : > { %211 = vst [vmem:[%s186_s8 + $0x20] sm:$0xff] %v210_v4  ;;  %v222_v10 = vld [vmem:[%s849_s7 + $0xa0] sm:$0xff]  ;;  %v224_v11 = vld [vmem:[%s849_s7 + $0xa8] sm:$0xff] }
  0x18   : > { %213 = vst [vmem:[%s186_s8 + $0x28] sm:$0xff] %v212_v5  ;;  %v226_v12 = vld [vmem:[%s849_s7 + $0xc0] sm:$0xff]  ;;  %v228_v13 = vld [vmem:[%s849_s7 + $0xc8] sm:$0xff] }
  0x19   : > { %215 = vst [vmem:[%s186_s8 + $0x30] sm:$0xff] %v214_v6  ;;  %v230_v14 = vld [vmem:[%s849_s7 + $0xe0] sm:$0xff]  ;;  %v232_v15 = vld [vmem:[%s849_s7 + $0xe8] sm:$0xff] }
  0x1a   : > { %217 = vst [vmem:[%s186_s8 + $0x38] sm:$0xff] %v216_v7 }
  0x1b   : > { %219 = vst [vmem:[%s186_s8 + $0x40] sm:$0xff] %v218_v8 }
  0x1c   : > { %221 = vst [vmem:[%s186_s8 + $0x48] sm:$0xff] %v220_v9 }
  0x1d   : > { %223 = vst [vmem:[%s186_s8 + $0x50] sm:$0xff] %v222_v10 }
  0x1e   : > { %225 = vst [vmem:[%s186_s8 + $0x58] sm:$0xff] %v224_v11 }
  0x1f   : > { %227 = vst [vmem:[%s186_s8 + $0x60] sm:$0xff] %v226_v12 }
  0x20   : > { %229 = vst [vmem:[%s186_s8 + $0x68] sm:$0xff] %v228_v13 }
  0x21   : > { %231 = vst [vmem:[%s186_s8 + $0x70] sm:$0xff] %v230_v14 }
  0x22   : > { %233 = vst [vmem:[%s186_s8 + $0x78] sm:$0xff] %v232_v15 }
  0x23 PF: > { %p682_p7 = scmp.ge.s32.totalorder %s774_s20, 1  ;;  %p246_p8 = scmp.lt.s32.totalorder %s774_s20, 3 }
  0x25   : > { %p247_p9 = pnand %p682_p7, %p246_p8 }
  0x26   : > { %s253_s9 = sand.u32 (!%p247_p9), 1, %s766_s18   ;;  %s685_s30 = sshll.u32 (!%p247_p9), %s824_s21, 1 }
  0x27   : > { %250 = sbr.rel (%p247_p9) target bundleno = 394 (0x18a), region = 59  ;;  %s683_s12 = sshll.u32 (!%p247_p9), %s253_s9, 7 }
  0x28   : > { %s878_s15 = scalar_lea.vmem (!%p247_p9), [#allocation2], %s683_s12  ;;  %s698_s6 = sshll.u32 (!%p247_p9), %s824_s21, 8 }
  0x29   : > { %p285_p10 = scmp.lt.s32.totalorder (!%p247_p9), %s685_s30, 3 }
  0x2c   : > { %v385_v16 = vld [vmem:[%s1043_s2 + $0x10] sm:$0xff]  ;;  %v776_v17 = vmov 0   ;;  %v777_v18 = vmov 1   ;;  %v383_v19 = vld [vmem:[%s1043_s2] sm:$0xff]  ;;  %v304_v22 = vld [vmem:[%s878_s15 + $0x68] sm:$0xff]  ;;  %vm329_vm0 = vcmask 523264   ;;  %v375_v49 = vlaneseq }
  0x2d   : > { %748 = vset.pattern.permute.xlu0 %v776_v17  ;;  %749 = vset.pattern.permute.xlu1 %v777_v18  ;;  %v303_v20 = vld [vmem:[%s878_s15 + $0x60] sm:$0xff]  ;;  %v305_v21 = vld [vmem:[%s878_s15 + $0x70] sm:$0xff]  ;;  %v306_v24 = vld [vmem:[%s878_s15 + $0x78] sm:$0xff]  ;;  %v378_v55 = vstv %s698_s6  ;;  %s1060_s30 = smov (!%p285_p10, %s685_s30), 3  ;;  %vm500_vm5 = vcmask 261120   ;;  %s721_s18 = sshll.u32 (%p839_p5), %s824_s21, 4 }
  0x2e   : > { %405 = vperm.xlu0 %748, %v385_v16   ;;  %436 = vperm.xlu1 %749, %v385_v16   ;;  %v317_v23 = vpack.c.bf16 %v305_v21, %v303_v20  ;;  %v299_v25 = vld [vmem:[%s878_s15 + $0x40] sm:$0xff]  ;;  %v301_v26 = vld [vmem:[%s878_s15 + $0x50] sm:$0xff]  ;;  %v318_v27 = vpack.c.bf16 %v306_v24, %v304_v22  ;;  %v300_v28 = vld [vmem:[%s878_s15 + $0x48] sm:$0xff]  ;;  %v376_v51 = vand.u32 127, %v375_v49  ;;  %s287_s10 = scalar_lea.vmem %s1042_s1, %s1060_s30  ;;  %s578_s20 = scalar_lea.vmem (%p839_p5), %s1046_s5, %s721_s18 }
  0x2f   : > { %750 = vset.pattern.permute.xlu2 %v776_v17  ;;  %v302_v29 = vld [vmem:[%s878_s15 + $0x58] sm:$0xff]  ;;  %v315_v30 = vpack.c.bf16 %v301_v26, %v299_v25  ;;  %v889_v32 = vld [vmem:[%s878_s15 + $0x20] sm:$0xff]  ;;  %v892_v33 = vld [vmem:[%s878_s15 + $0x30] sm:$0xff] }
  0x30   : > { %395 = vperm.xlu2 %750, %v383_v19   ;;  %340 = vmatpush.bf16.msra.mxu0 %v317_v23  ;;  %v316_v31 = vpack.c.bf16 %v302_v29, %v300_v28  ;;  %v386_v34 = vld [vmem:[%s1043_s2 + $0x18] sm:$0xff]  ;;  %v898_v35 = vld [vmem:[%s878_s15 + $0x28] sm:$0xff]  ;;  %v313_v37 = vpack.c.bf16 %v892_v33, %v889_v32  ;;  %v908_v39 = vld [vmem:[%s878_s15] sm:$0xff]  ;;  %v377_v54 = vadd.s32 128, %v376_v51  ;;  %v379_v58 = vadd.s32 %v378_v55, %v376_v51 }
  0x31   : > { %359 = vmatpush.bf16.msra.mxu1 %v318_v27  ;;  %v901_v36 = vld [vmem:[%s878_s15 + $0x38] sm:$0xff]  ;;  %v911_v40 = vld [vmem:[%s878_s15 + $0x10] sm:$0xff]  ;;  %v384_v41 = vld [vmem:[%s1043_s2 + $0x8] sm:$0xff] }
  0x32   : > { %v314_v38 = vpack.c.bf16 %v901_v36, %v898_v35  ;;  %v917_v42 = vld [vmem:[%s878_s15 + $0x8] sm:$0xff]  ;;  %v920_v43 = vld [vmem:[%s878_s15 + $0x18] sm:$0xff]  ;;  %v311_v44 = vpack.c.bf16 %v911_v40, %v908_v39  ;;  %v717_v46 = vld [vmem:[%s1044_s3] sm:$0xff]  ;;  %v380_v60 = vadd.s32 %v378_v55, %v377_v54  ;;  %v381_v62 = vshra.s32 %v379_v58, 8  ;;  %s684_s15 = sshll.u32 %s253_s9, 6 }
  0x33   : > { %v312_v45 = vpack.c.bf16 %v920_v43, %v917_v42  ;;  %v718_v47 = vld [vmem:[%s1044_s3 + $0x8] sm:$0xff]  ;;  %v459_v1 = vld [vmem:[%s287_s10] sm:$0x3]  ;;  %s1001_s16 = scalar_lea.vmem [#allocation3], %s684_s15 }
  0x34   : > { %341 = vmatpush.bf16.msra.mxu0 %v315_v30  ;;  %v382_v0 = vshra.s32 %v380_v60, 8  ;;  %vm941_vm1 = vcmp.eq.s32.totalorder %v381_v62, 0  ;;  %vm949_vm3 = vcmp.eq.s32.totalorder %v381_v62, 1  ;;  %v460_v8 = vadd.f32 1.0, %v459_v1 }
  0x35   : > { %360 = vmatpush.bf16.msra.mxu1 %v316_v31 }
  0x36   : > { %410 = vperm.xlu0 %748, %v386_v34   ;;  %440 = vperm.xlu1 %749, %v386_v34   ;;  %vm945_vm2 = vcmp.eq.s32.totalorder %v382_v0, 0  ;;  %vm953_vm4 = vcmp.eq.s32.totalorder %v382_v0, 1 }
  0x38   : > { %400 = vperm.xlu2 %750, %v384_v41   ;;  %342 = vmatpush.bf16.msra.mxu0 %v313_v37 }
  0x39   : > { %361 = vmatpush.bf16.msra.mxu1 %v314_v38 }
  0x3c   : > { %343 = vmatpush.bf16.msra.mxu0 %v311_v44 }
  0x3d   : > { %362 = vmatpush.bf16.msra.mxu1 %v312_v45  ;;  %v463_v45 = vperm.slane %v460_v8, 1 }
  0x3e   : > { %751 = vset.pattern.permute.xlu0 %v777_v18  ;;  %432 = vperm.xlu1 %749, %v384_v41   ;;  %v462_v41 = vperm.slane %v460_v8, 0  ;;  %v719_v8 = vld [vmem:[%s1045_s4] sm:$0xff] }
  0x3f   : > { %428 = vperm.xlu0 %751, %v383_v19   ;;  %694 = vmatmul.msk.bf16.vlgmr.msra.gmra.mxu0 %vm329_vm0, %v717_v46 }
  0x40   : > { %696 = vmatmul.msk.bf16.vlgmr.msra.gmra.mxu1 %vm329_vm0, %v717_v46 }
  0x4f   : > { %695 = vmatmul.msk.bf16.gmra.mxu0 %vm329_vm0, %v718_v47 }
  0x50   : > { %697 = vmatmul.msk.bf16.gmra.mxu1 %vm329_vm0, %v718_v47 }
  0x8a   : > { %v396_v57 = vpop.permute.xlu2 %395 }
  0x8b   : > { %v413_v25 = vsel %vm941_vm1, %v396_v57, 0.0  ;;  %v414_v26 = vsel %vm945_vm2, %v396_v57, 0.0 }
  0x92   : > { %v401_v4 = vpop.permute.xlu2 %400 }
  0x93   : > { %v415_v17 = vsel %vm941_vm1, %v401_v4, 0.0  ;;  %v416_v22 = vsel %vm945_vm2, %v401_v4, 0.0 }
  0xa0   : > { %v437_v48 = vpop.permute.xlu1 %436  ;;  %v406_v50 = vpop.permute.xlu0 %405 }
  0xa1   : > { %v417_v9 = vsel %vm941_vm1, %v406_v50, 0.0  ;;  %v418_v10 = vsel %vm945_vm2, %v406_v50, 0.0  ;;  %v447_v11 = vsel %vm949_vm3, %v437_v48, 0.0  ;;  %v448_v12 = vsel %vm953_vm4, %v437_v48, 0.0 }
  0xa2   : > { %v455_v27 = vadd.f32 %v447_v11, %v417_v9  ;;  %v456_v31 = vadd.f32 %v448_v12, %v418_v10 }
  0xa4   : > { %v470_v47 = vadd.f32 %v462_v41, %v455_v27  ;;  %v471_v50 = vadd.f32 %v463_v45, %v456_v31 }
  0xa8   : > { %v441_v56 = vpop.permute.xlu1 %440  ;;  %v411_v59 = vpop.permute.xlu0 %410 }
  0xa9   : > { %v419_v14 = vsel %vm941_vm1, %v411_v59, 0.0  ;;  %v449_v15 = vsel %vm949_vm3, %v441_v56, 0.0  ;;  %v420_v19 = vsel %vm945_vm2, %v411_v59, 0.0  ;;  %v450_v20 = vsel %vm953_vm4, %v441_v56, 0.0 }
  0xaa   : > { %v457_v28 = vadd.f32 %v449_v15, %v419_v14  ;;  %v458_v34 = vadd.f32 %v450_v20, %v420_v19 }
  0xac   : > { %v472_v48 = vadd.f32 %v462_v41, %v457_v28  ;;  %v473_v54 = vadd.f32 %v463_v45, %v458_v34 }
  0xb0   : > { %v433_v3 = vpop.permute.xlu1 %432 }
  0xb1   : > { %v429_v13 = vpop.permute.xlu0 %428  ;;  %v445_v16 = vsel %vm949_vm3, %v433_v3, 0.0  ;;  %v446_v21 = vsel %vm953_vm4, %v433_v3, 0.0 }
  0xb2   : > { %v443_v24 = vsel %vm949_vm3, %v429_v13, 0.0  ;;  %v444_v29 = vsel %vm953_vm4, %v429_v13, 0.0  ;;  %v453_v30 = vadd.f32 %v445_v16, %v415_v17  ;;  %v454_v37 = vadd.f32 %v446_v21, %v416_v22 }
  0xb3   : > { %v451_v38 = vadd.f32 %v443_v24, %v413_v25  ;;  %v452_v44 = vadd.f32 %v444_v29, %v414_v26 }
  0xb4   : > { %v468_v46 = vadd.f32 %v462_v41, %v453_v30  ;;  %v469_v49 = vadd.f32 %v463_v45, %v454_v37 }
  0xb5   : > { %v466_v55 = vadd.f32 %v462_v41, %v451_v38  ;;  %v467_v59 = vadd.f32 %v463_v45, %v452_v44 }
  0xbc   : > { %v934_v52 = vpop.f32.mrf.mxu0 }
  0xbd   : > { %v936_v53 = vpop.f32.mrf.mxu1  ;;  %v474_v4 = vmul.f32 %v466_v55, %v934_v52 }
  0xbe   : > { %v475_v5 = vmul.f32 %v467_v59, %v936_v53 }
  0xc4   : > { %v347_v61 = vpop.f32.mrf.mxu0 }
  0xc5   : > { %v366_v63 = vpop.f32.mrf.mxu1  ;;  %v476_v0 = vmul.f32 %v468_v46, %v347_v61  ;;  %v720_v61 = vld [vmem:[%s1045_s4 + $0x8] sm:$0xff] }
  0xc6   : > { %v477_v2 = vmul.f32 %v469_v49, %v366_v63 }
  0xc7   : > { %v486_v6 = vpack.c.bf16 %v476_v0, %v474_v4 }
  0xc8   : > { %v487_v7 = vpack.c.bf16 %v477_v2, %v475_v5 }
  0xcc   : > { %v350_v18 = vpop.f32.mrf.mxu0 }
  0xcd   : > { %v369_v23 = vpop.f32.mrf.mxu1  ;;  %v478_v56 = vmul.f32 %v470_v47, %v350_v18 }
  0xce   : > { %v479_v60 = vmul.f32 %v471_v50, %v369_v23 }
  0xd4   : > { %v352_v51 = vpop.f32.mrf.mxu0 }
  0xd5   : > { %v480_v57 = vmul.f32 %v472_v48, %v352_v51  ;;  %v371_v58 = vpop.f32.mrf.mxu1 }
  0xd6   : > { %v481_v62 = vmul.f32 %v473_v54, %v371_v58 }
  0xd7   : > { %v488_v1 = vpack.c.bf16 %v480_v57, %v478_v56 }
  0xd8   : > { %v489_v3 = vpack.c.bf16 %v481_v62, %v479_v60 }
  0xd9   : > { %513 = vmatpush.bf16.msra.mxu2 %v488_v1 }
  0xda   : > { %532 = vmatpush.bf16.msra.mxu3 %v489_v3 }
  0xdd   : > { %514 = vmatpush.bf16.msra.mxu2 %v486_v6 }
  0xde   : > { %533 = vmatpush.bf16.msra.mxu3 %v487_v7 }
  0xe0   : > { %707 = vmatmul.msk.bf16.vlgmr.msra.gmra.mxu2 %vm500_vm5, %v719_v8 }
  0xe1   : > { %709 = vmatmul.msk.bf16.vlgmr.msra.gmra.mxu3 %vm500_vm5, %v719_v8 }
  0xf0   : > { %708 = vmatmul.msk.bf16.gmra.mxu2 %vm500_vm5, %v720_v61 }
  0xf1   : > { %710 = vmatmul.msk.bf16.gmra.mxu3 %vm500_vm5, %v720_v61 }
 0x163   : > { %v516_v52 = vpop.f32.mrf.mxu2 }
 0x164   : > { %v545_v53 = vadd.f32 %v516_v52, %v908_v39  ;;  %v535_v63 = vpop.f32.mrf.mxu3 }
 0x165   : > { %v546_v9 = vadd.f32 %v535_v63, %v917_v42 }
 0x166   : > { %v553_v10 = vmax.f32 %v545_v53, 0.0 }
 0x167   : > { %v554_v11 = vmax.f32 %v546_v9, 0.0 }
 0x168   : > { %561 = vst [vmem:[%s1001_s16] sm:$0xff] %v553_v10 }
 0x169   : > { %562 = vst [vmem:[%s1001_s16 + $0x8] sm:$0xff] %v554_v11 }
 0x16b   : > { %v518_v12 = vpop.f32.mrf.mxu2 }
 0x16c   : > { %v547_v13 = vadd.f32 %v518_v12, %v911_v40  ;;  %v537_v14 = vpop.f32.mrf.mxu3 }
 0x16d   : > { %v548_v39 = vadd.f32 %v537_v14, %v920_v43 }
 0x16e   : > { %v555_v15 = vmax.f32 %v547_v13, 0.0 }
 0x16f   : > { %v556_v42 = vmax.f32 %v548_v39, 0.0 }
 0x170   : > { %563 = vst [vmem:[%s1001_s16 + $0x10] sm:$0xff] %v555_v15 }
 0x171   : > { %564 = vst [vmem:[%s1001_s16 + $0x18] sm:$0xff] %v556_v42 }
 0x173   : > { %v521_v16 = vpop.f32.mrf.mxu2 }
 0x174   : > { %v549_v17 = vadd.f32 %v521_v16, %v889_v32  ;;  %v540_v18 = vpop.f32.mrf.mxu3  ;;  %v591_v32 = vld [vmem:[%s1001_s16] sm:$0xff] (%p839_p5) }
 0x175   : > { %v550_v19 = vadd.f32 %v540_v18, %v898_v35  ;;  %592 = vst [vmem:[%s578_s20] sm:$0xff] (%p839_p5), %v591_v32 }
 0x176   : > { %v557_v20 = vmax.f32 %v549_v17, 0.0 }
 0x177   : > { %v558_v21 = vmax.f32 %v550_v19, 0.0  ;;  %v595_v35 = vld [vmem:[%s1001_s16 + $0x10] sm:$0xff] (%p839_p5) }
 0x178   : > { %565 = vst [vmem:[%s1001_s16 + $0x20] sm:$0xff] %v557_v20 }
 0x179   : > { %566 = vst [vmem:[%s1001_s16 + $0x28] sm:$0xff] %v558_v21 }
 0x17a   : > { %596 = vst [vmem:[%s578_s20 + $0x20] sm:$0xff] (%p839_p5), %v595_v35 }
 0x17b   : > { %v523_v40 = vpop.f32.mrf.mxu2 }
 0x17c   : > { %v551_v22 = vadd.f32 %v523_v40, %v892_v33  ;;  %v542_v43 = vpop.f32.mrf.mxu3  ;;  %v593_v33 = vld [vmem:[%s1001_s16 + $0x8] sm:$0xff] (%p839_p5) }
 0x17d   : > { %v552_v23 = vadd.f32 %v542_v43, %v901_v36  ;;  %575 = sbr.rel (!%p839_p5) target bundleno = 394 (0x18a), region = 67  ;;  %v597_v36 = vld [vmem:[%s1001_s16 + $0x18] sm:$0xff] (%p839_p5)  ;;  %594 = vst [vmem:[%s578_s20 + $0x8] sm:$0xff] (%p839_p5), %v593_v33 }
 0x17e   : > { %v559_v24 = vmax.f32 %v551_v22, 0.0  ;;  %598 = vst [vmem:[%s578_s20 + $0x28] sm:$0xff] (%p839_p5), %v597_v36 }
 0x17f   : > { %v560_v25 = vmax.f32 %v552_v23, 0.0  ;;  %v599_v26 = vld [vmem:[%s1001_s16 + $0x20] sm:$0xff] (%p839_p5) }
 0x180   : > { %567 = vst [vmem:[%s1001_s16 + $0x30] sm:$0xff] %v559_v24  ;;  %v601_v27 = vld [vmem:[%s1001_s16 + $0x28] sm:$0xff] (%p839_p5) }
 0x181   : > { %568 = vst [vmem:[%s1001_s16 + $0x38] sm:$0xff] %v560_v25 }
 0x182   : > { %600 = vst [vmem:[%s578_s20 + $0x40] sm:$0xff] %v599_v26 }
 0x183   : > { %602 = vst [vmem:[%s578_s20 + $0x48] sm:$0xff] %v601_v27 }
 0x187   : > { %v603_v28 = vld [vmem:[%s1001_s16 + $0x30] sm:$0xff] }
 0x188   : > { %v605_v29 = vld [vmem:[%s1001_s16 + $0x38] sm:$0xff]  ;;  %604 = vst [vmem:[%s578_s20 + $0x60] sm:$0xff] %v603_v28 }
 0x189   : > { %606 = vst [vmem:[%s578_s20 + $0x68] sm:$0xff] %v605_v29 }
 0x18a PF: > { %p12_p11 = scmp.ge.s32.totalorder %s827_s22, 4   ;;  %s1056_s18 = smov %s770_s19 }
 0x18b   : > { %s1057_s19 = smov %s837_s25  ;;  %s1058_s20 = smov %s827_s22 }
 0x18c   :  { %14 = sbr.rel (!%p12_p11) target bundleno = 2 (0x2), region = 124 }

// kernel: skip_guidance_hr_forward.4
= control target key start
LH: loop header
LB: loop body
LE: loop exit
PB: predicated region body
PF: predicated region fallthrough
CT: control target
= control target key end

     0   :  { %14 = vsyncpa [#allocation4], 0  ;;  %s1460_s30 = smov [#allocation3]   ;;  %s2168_s0 = inlined_call_operand.vmem [shape: f32[2,512], index: 0, kind: input, shape index: {}]   ;;  %s2169_s1 = inlined_call_operand.vmem [shape: f32[2,64,2], index: 1, kind: input, shape index: {}]   ;;  %s2170_s2 = inlined_call_operand.vmem [shape: f32[8,16], index: 2, kind: input, shape index: {}]   ;;  %s2171_s3 = inlined_call_operand.vmem [shape: f32[32,64], index: 3, kind: input, shape index: {}]   ;;  %s2172_s4 = inlined_call_operand.vmem [shape: f32[2,32], index: 4, kind: input, shape index: {}]   ;;  %s2173_s5 = inlined_call_operand.vmem [shape: f32[32,2], index: 5, kind: input, shape index: {}]   ;;  %s2174_s6 = inlined_call_operand.vmem [shape: f32[6], index: 6, kind: input, shape index: {}]   ;;  %s2175_s7 = inlined_call_operand.vmem [shape: f32[1,512], index: 7, kind: output, shape index: {0}]   ;;  %s2176_s8 = inlined_call_operand.vmem [shape: f32[32,2], index: 8, kind: output, shape index: {1}]  }
   0x1   :  { %s32_s29 = sshll.u32 %s2174_s6, 4  ;;  %s33_s29 = int_to_ptr.vmem [resolvable:$true] %s32_s29 }
   0x2   :  { %35 = dma.vmem_to_smem %s33_s29, 16, %s1460_s30, [#allocation4]  }
   0x3   :  { %1458 = dma.done.wait [#allocation4], 16  }
   0x4   :  { %1459 = vsyncadd [#allocation4], 4294967280 }
   0x5   :  { %40 = sfence }
   0x6   :  { %v41_v0 = vld [vmem:[%s2168_s0] sm:$0xff]  ;;  %s1461_s6 = smov 32   ;;  %s1462_s0 = smov 16   ;;  %v42_v29 = vlaneseq }
   0x7   :  { %76 = vst [vmem:[#allocation1] ss:$4 sm:$0xff] %v41_v0  ;;  %s1463_s11 = smov 48   ;;  %s1464_s12 = smov 112  }
   0x8   :  { %s1465_s13 = smov 96   ;;  %s1466_s14 = smov 80   ;;  %v1537_v30 = vand.u32 127, %v42_v29 }
   0x9   :  { %s1469_s17 = smov 2   ;;  %s1470_s18 = smov 1  }
   0xa   :  { %v47_v31 = vand.u32 255, %v1537_v30  ;;  %v1544_v35 = vadd.s32 384, %v1537_v30  ;;  %v1547_v36 = vadd.s32 128, %v1537_v30  ;;  %v1550_v37 = vadd.s32 256, %v1537_v30  ;;  %s1471_s19 = smov 127   ;;  %s1472_s20 = smov 126  }
   0xb   :  { %vm147_vm2 = vcmp.lt.s32.totalorder %v1537_v30, 32  ;;  %s1473_s21 = smov 125   ;;  %s881_s30 = sld [smem:[#allocation3]] }
   0xc   :  { %v1540_v32 = vshra.s32 %v47_v31, 4  ;;  %v50_v38 = vand.u32 255, %v1544_v35  ;;  %v48_v39 = vand.u32 255, %v1547_v36  ;;  %v49_v40 = vand.u32 255, %v1550_v37  ;;  %s1358_s9 = sld [smem:[#allocation3 + $0x1]] }
   0xe   :  { %v77_v1 = vld.sshfl [vmem:[#allocation1] sm:$0xff pattern:$0x73625140]  ;;  %v1526_v2 = vld.sshfl [vmem:[#allocation1 + $0x8] sm:$0xff pattern:$0x73625140] }
   0xf   :  { %v1528_v3 = vld.sshfl [vmem:[#allocation1 + $0x10] sm:$0xff pattern:$0x73625140]  ;;  %v80_v4 = vld.sshfl [vmem:[#allocation1 + $0x18] sm:$0xff pattern:$0x73625140] }
  0x10   :  { %130 = vst [vmem:[#allocation1] ss:$4 sm:$0xff] %v41_v0  ;;  %v114_v34 = vadd.s32 4294967294, %v1540_v32  ;;  %v1558_v43 = vshra.s32 %v50_v38, 4  ;;  %v1560_v45 = vshra.s32 %v48_v39, 4  ;;  %v1562_v47 = vshra.s32 %v49_v40, 4 }
  0x12   :  { %vm118_vm0 = vcmp.ge.s32.totalorder %v114_v34, 0  ;;  %vm122_vm1 = vcmp.lt.s32.totalorder %v114_v34, 16  ;;  %v117_v48 = vadd.s32 4294967294, %v1558_v43  ;;  %v115_v49 = vadd.s32 4294967294, %v1560_v45 }
  0x13   :  { %vm126_vm3 = vmand %vm118_vm0, %vm122_vm1  ;;  %v116_v50 = vadd.s32 4294967294, %v1562_v47  ;;  %v182_v58 = vadd.s32 4294967295, %v1562_v47  ;;  %v181_v62 = vadd.s32 4294967295, %v1560_v45 }
  0x14   :  { %vm121_vm4 = vcmp.ge.s32.totalorder %v117_v48, 0  ;;  %vm125_vm5 = vcmp.lt.s32.totalorder %v117_v48, 16  ;;  %vm119_vm6 = vcmp.ge.s32.totalorder %v115_v49, 0  ;;  %vm123_vm7 = vcmp.lt.s32.totalorder %v115_v49, 16 }
  0x15   :  { %vm120_vm8 = vcmp.ge.s32.totalorder %v116_v50, 0  ;;  %vm124_vm9 = vcmp.lt.s32.totalorder %v116_v50, 16  ;;  %vm129_vm10 = vmand %vm121_vm4, %vm125_vm5  ;;  %vm186_vm13 = vcmp.ge.s32.totalorder %v182_v58, 0  ;;  %vm190_vm14 = vcmp.lt.s32.totalorder %v182_v58, 16 }
  0x16   :  { %vm127_vm11 = vmand %vm119_vm6, %vm123_vm7  ;;  %vm185_vm15 = vcmp.ge.s32.totalorder %v181_v62, 0  ;;  %vm189_vm0 = vcmp.lt.s32.totalorder %v181_v62, 16 }
  0x17   :  { %v133_v5 = vld.sshfl [vmem:[#allocation1 + $0x10] sm:$0xff pattern:$0x73625140]  ;;  %v132_v6 = vld.sshfl [vmem:[#allocation1 + $0x8] sm:$0xff pattern:$0x73625140]  ;;  %vm128_vm12 = vmand %vm120_vm8, %vm124_vm9 }
  0x18   :  { %143 = vrot.lane.b32.xlu1 %v133_v5, %s1461_s6  ;;  %141 = vrot.lane.b32.xlu0 %v132_v6, %s1461_s6  ;;  %v131_v7 = vld.sshfl [vmem:[#allocation1] sm:$0xff pattern:$0x73625140]  ;;  %v134_v8 = vld.sshfl [vmem:[#allocation1 + $0x18] sm:$0xff pattern:$0x73625140]  ;;  %vm194_vm1 = vmand %vm186_vm13, %vm190_vm14 }
  0x19   :  { %139 = vrot.lane.b32.xlu2 %v131_v7, %s1461_s6  ;;  %196 = vst [vmem:[#allocation1] ss:$4 sm:$0xff] %v41_v0  ;;  %v183_v6 = vadd.s32 4294967295, %v1558_v43 }
  0x1b   :  { %vm187_vm6 = vcmp.ge.s32.totalorder %v183_v6, 0  ;;  %vm191_vm7 = vcmp.lt.s32.totalorder %v183_v6, 16 }
  0x1c   :  { %vm195_vm9 = vmand %vm187_vm6, %vm191_vm7 }
  0x20   :  { %v198_v9 = vld.sshfl [vmem:[#allocation1 + $0x8] sm:$0xff pattern:$0x73625140]  ;;  %v197_v10 = vld.sshfl [vmem:[#allocation1] sm:$0xff pattern:$0x73625140] }
  0x21   :  { %145 = vrot.lane.b32.xlu2 %v134_v8, %s1461_s6  ;;  %207 = vrot.lane.b32.xlu1 %v198_v9, %s1462_s0  ;;  %v199_v11 = vld.sshfl [vmem:[#allocation1 + $0x10] sm:$0xff pattern:$0x73625140]  ;;  %v200_v12 = vld.sshfl [vmem:[#allocation1 + $0x18] sm:$0xff pattern:$0x73625140] }
  0x22   :  { %205 = vrot.lane.b32.xlu0 %v197_v10, %s1462_s0  ;;  %247 = vst [vmem:[#allocation1 + $0x3] ss:$4 sm:$0xff] %v41_v0 }
  0x29   :  { %209 = vrot.lane.b32.xlu2 %v199_v11, %s1462_s0  ;;  %v248_v13 = vld.sshfl [vmem:[#allocation1] sm:$0xff pattern:$0x73625140]  ;;  %v249_v14 = vld.sshfl [vmem:[#allocation1 + $0x8] sm:$0xff pattern:$0x73625140] }
  0x2a   :  { %211 = vrot.lane.b32.xlu0 %v200_v12, %s1462_s0  ;;  %v250_v15 = vld.sshfl [vmem:[#allocation1 + $0x10] sm:$0xff pattern:$0x73625140]  ;;  %v251_v16 = vld.sshfl [vmem:[#allocation1 + $0x18] sm:$0xff pattern:$0x73625140] }
  0x2b   :  { %276 = vst [vmem:[#allocation1] ss:$4 sm:$0xff] %v41_v0 }
  0x2c   :  { %256 = vst [vmem:[#allocation2 + $0x30] sm:$0xc0] %v248_v13 }
  0x2d   :  { %257 = vst [vmem:[#allocation2] sm:$0xc0] %v249_v14  ;;  %v261_v14 = vadd.s32 1, %v1560_v45 }
  0x2e   :  { %258 = vst [vmem:[#allocation2 + $0x18] sm:$0xc0] %v250_v15  ;;  %v1467_v15 = vmov 0.0  }
  0x2f   :  { %259 = vst [vmem:[#allocation2 + $0x10] sm:$0xc0] %v251_v16 }
  0x30   :  { %446 = vst [vmem:[#allocation2 + $0x8] sm:$0xc0] %v1467_v15 }
  0x31   :  { %85 = vrot.lane.b32.xlu2 %v77_v1, %s1463_s11  ;;  %447 = vst [vmem:[#allocation2 + $0x20] sm:$0xc0] %v1467_v15 }
  0x32   :  { %v279_v17 = vld.sshfl [vmem:[#allocation1 + $0x10] sm:$0xff pattern:$0x73625140]  ;;  %v277_v18 = vld.sshfl [vmem:[#allocation1] sm:$0xff pattern:$0x73625140] }
  0x33   :  { %289 = vrot.lane.b32.xlu0 %v279_v17, %s1464_s12  ;;  %285 = vrot.lane.b32.xlu1 %v277_v18, %s1464_s12  ;;  %v278_v19 = vld.sshfl [vmem:[#allocation1 + $0x8] sm:$0xff pattern:$0x73625140]  ;;  %v280_v20 = vld.sshfl [vmem:[#allocation1 + $0x18] sm:$0xff pattern:$0x73625140] }
  0x34   :  { %330 = vst [vmem:[#allocation1] ss:$4 sm:$0xff] %v41_v0  ;;  %v260_v18 = vadd.s32 1, %v1540_v32 }
  0x35   :  { %448 = vst [vmem:[#allocation2 + $0x28] sm:$0xc0] %v1467_v15 }
  0x36   :  { %449 = vst [vmem:[#allocation2 + $0x38] sm:$0xc0] %v1467_v15  ;;  %vm268_vm13 = vcmp.lt.s32.totalorder %v260_v18, 16 }
  0x39   :  { %287 = vrot.lane.b32.xlu2 %v278_v19, %s1464_s12 }
  0x3b   :  { %291 = vrot.lane.b32.xlu1 %v280_v20, %s1464_s12  ;;  %v334_v21 = vld.sshfl [vmem:[#allocation1 + $0x18] sm:$0xff pattern:$0x73625140]  ;;  %v331_v22 = vld.sshfl [vmem:[#allocation1] sm:$0xff pattern:$0x73625140] }
  0x3c   :  { %339 = vrot.lane.b32.xlu0 %v331_v22, %s1465_s13  ;;  %v333_v23 = vld.sshfl [vmem:[#allocation1 + $0x10] sm:$0xff pattern:$0x73625140]  ;;  %v332_v24 = vld.sshfl [vmem:[#allocation1 + $0x8] sm:$0xff pattern:$0x73625140] }
  0x3d   :  { %396 = vst [vmem:[#allocation1] ss:$4 sm:$0xff] %v41_v0 }
  0x43   :  { %343 = vrot.lane.b32.xlu1 %v333_v23, %s1465_s13 }
  0x44   :  { %341 = vrot.lane.b32.xlu0 %v332_v24, %s1465_s13  ;;  %v397_v25 = vld.sshfl [vmem:[#allocation1] sm:$0xff pattern:$0x73625140]  ;;  %v399_v26 = vld.sshfl [vmem:[#allocation1 + $0x10] sm:$0xff pattern:$0x73625140] }
  0x45   :  { %405 = vrot.lane.b32.xlu2 %v397_v25, %s1466_s14  ;;  %v398_v27 = vld.sshfl [vmem:[#allocation1 + $0x8] sm:$0xff pattern:$0x73625140]  ;;  %v400_v28 = vld.sshfl [vmem:[#allocation1 + $0x18] sm:$0xff pattern:$0x73625140] }
  0x46   :  { %v380_v24 = vadd.s32 3, %v1540_v32  ;;  %v61_v25 = vadd.s32 4294967293, %v1562_v47 }
  0x4b   :  { %345 = vrot.lane.b32.xlu1 %v334_v21, %s1465_s13 }
  0x4c   :  { %409 = vrot.lane.b32.xlu0 %v399_v26, %s1466_s14 }
  0x4d   :  { %407 = vrot.lane.b32.xlu2 %v398_v27, %s1466_s14  ;;  %v262_v27 = vadd.s32 1, %v1562_v47 }
  0x4f   :  { %vm270_vm6 = vcmp.lt.s32.totalorder %v262_v27, 16 }
  0x53   :  { %411 = vrot.lane.b32.xlu1 %v400_v28, %s1466_s14 }
  0x54   :  { %87 = vrot.lane.b32.xlu0 %v1526_v2, %s1463_s11 }
  0x55   :  { %91 = vrot.lane.b32.xlu2 %v80_v4, %s1463_s11 }
  0x5b   :  { %89 = vrot.lane.b32.xlu1 %v1528_v3, %s1463_s11  ;;  %v180_v3 = vadd.s32 4294967295, %v1540_v32  ;;  %s1359_s11 = sld [smem:[#allocation3 + $0x2]] }
  0x5d   :  { %vm184_vm4 = vcmp.ge.s32.totalorder %v180_v3, 0  ;;  %vm188_vm5 = vcmp.lt.s32.totalorder %v180_v3, 16 }
  0x5e   :  { %vm192_vm8 = vmand %vm184_vm4, %vm188_vm5  ;;  %vm266_vm5 = vcmp.ge.s32.totalorder %v262_v27, 0 }
  0x73   :  { %v140_v33 = vpop.permute.xlu2 %139 }
  0x7b   :  { %v146_v41 = vpop.permute.xlu2 %145 }
  0x7c   :  { %v151_v42 = vsel %vm147_vm2, %v146_v41, %v140_v33 }
  0x7d   :  { %v160_v44 = vsel %vm126_vm3, %v151_v42, 0.0  ;;  %vm193_vm3 = vmand %vm185_vm15, %vm189_vm0  ;;  %vm293_vm15 = vcmp.lt.s32.totalorder %v1537_v30, 112  ;;  %vm384_vm0 = vcmp.ge.s32.totalorder %v380_v24, 0  ;;  %v59_v42 = vadd.s32 4294967293, %v1540_v32 }
  0x7e   :  { %v168_v46 = vrot.slane %v160_v44, 6 }
  0x80   :  { %176 = vst [vmem:[#allocation2 + $0x30] sm:$0xc] %v168_v46 }
  0x83   :  { %v210_v51 = vpop.permute.xlu2 %209 }
  0x8a   :  { %v144_v52 = vpop.permute.xlu1 %143  ;;  %v142_v53 = vpop.permute.xlu0 %141 }
  0x8b   :  { %v148_v54 = vsel %vm147_vm2, %v144_v52, %v146_v41  ;;  %v149_v55 = vsel %vm147_vm2, %v142_v53, %v144_v52  ;;  %v150_v56 = vsel %vm147_vm2, %v140_v33, %v142_v53  ;;  %v1573_v57 = vpop.permute.xlu2 %85  ;;  %vm213_vm2 = vcmp.lt.s32.totalorder %v1537_v30, 16 }
  0x8c   :  { %v163_v59 = vsel %vm129_vm10, %v148_v54, 0.0  ;;  %v161_v60 = vsel %vm127_vm11, %v150_v56, 0.0  ;;  %v162_v61 = vsel %vm128_vm12, %v149_v55, 0.0  ;;  %vm265_vm10 = vcmp.ge.s32.totalorder %v261_v14, 0 }
  0x8d   :  { %v171_v63 = vrot.slane %v163_v59, 6  ;;  %v169_v0 = vrot.slane %v161_v60, 6  ;;  %v170_v1 = vrot.slane %v162_v61, 6  ;;  %vm269_vm11 = vcmp.lt.s32.totalorder %v261_v14, 16 }
  0x8e   :  { %vm264_vm12 = vcmp.ge.s32.totalorder %v260_v18, 0  ;;  %vm1593_vm14 = vmand %vm265_vm10, %vm269_vm11  ;;  %v263_v33 = vadd.s32 1, %v1558_v43  ;;  %vm63_vm10 = vcmp.ge.s32.totalorder %v59_v42, 0  ;;  %vm67_vm11 = vcmp.lt.s32.totalorder %v59_v42, 16 }
  0x8f   :  { %179 = vst [vmem:[#allocation2 + $0x10] sm:$0xc] %v171_v63  ;;  %v315_v55 = vadd.s32 2, %v1560_v45  ;;  %v316_v61 = vadd.s32 2, %v1562_v47  ;;  %v317_v63 = vadd.s32 2, %v1558_v43  ;;  %v60_v14 = vadd.s32 4294967293, %v1560_v45 }
  0x90   :  { %177 = vst [vmem:[#allocation2] sm:$0xc] %v169_v0  ;;  %vm267_vm7 = vcmp.ge.s32.totalorder %v263_v33, 0 }
  0x91   :  { %178 = vst [vmem:[#allocation2 + $0x18] sm:$0xc] %v170_v1  ;;  %v381_v1 = vadd.s32 3, %v1560_v45  ;;  %v1748_v45 = vand.u32 15, %v1547_v36  ;;  %v1763_v36 = vand.u32 15, %v1544_v35 }
  0x93   :  { %v208_v2 = vpop.permute.xlu1 %207  ;;  %v288_v9 = vpop.permute.xlu2 %287 }
  0x94   :  { %v215_v4 = vsel %vm213_vm2, %v208_v2, %v210_v51  ;;  %v206_v5 = vpop.permute.xlu0 %205 }
  0x95   :  { %v228_v7 = vsel %vm194_vm1, %v215_v4, 0.0  ;;  %v216_v8 = vsel %vm213_vm2, %v206_v5, %v208_v2  ;;  %vm388_vm1 = vcmp.lt.s32.totalorder %v380_v24, 16  ;;  %v450_v24 = vld [vmem:[%s2170_s2] sm:$0xff]  ;;  %s1468_s2 = smov 3  }
  0x96   :  { %v236_v10 = vrot.slane %v228_v7, 4  ;;  %v227_v11 = vsel %vm193_vm3, %v216_v8, 0.0  ;;  %vm413_vm3 = vcmp.lt.s32.totalorder %v1537_v30, 80  ;;  %vm392_vm4 = vmand %vm384_vm0, %vm388_vm1  ;;  %vm319_vm1 = vcmp.ge.s32.totalorder %v315_v55, 0 }
  0x97   :  { %v235_v12 = vrot.slane %v227_v11, 4  ;;  %v382_v8 = vadd.s32 3, %v1562_v47 }
  0x98   :  { %244 = vst [vmem:[#allocation2 + $0x18] sm:$0x30] %v236_v10  ;;  %v383_v10 = vadd.s32 3, %v1558_v43 }
  0x99   :  { %243 = vst [vmem:[#allocation2] sm:$0x30] %v235_v12 }
  0x9c   :  { %v212_v13 = vpop.permute.xlu0 %211 }
  0x9d   :  { %v214_v16 = vsel %vm213_vm2, %v210_v51, %v212_v13  ;;  %v217_v17 = vsel %vm213_vm2, %v212_v13, %v206_v5  ;;  %vm1598_vm2 = vmand %vm264_vm12, %vm268_vm13  ;;  %vm93_vm13 = vcmp.lt.s32.totalorder %v1537_v30, 48  ;;  %v314_v51 = vadd.s32 2, %v1540_v32 }
  0x9e   :  { %v226_v19 = vsel %vm192_vm8, %v217_v17, 0.0  ;;  %v229_v20 = vsel %vm195_vm9, %v214_v16, 0.0  ;;  %vm271_vm8 = vcmp.lt.s32.totalorder %v263_v33, 16  ;;  %vm1620_vm9 = vmand %vm266_vm5, %vm270_vm6  ;;  %vm347_vm5 = vcmp.lt.s32.totalorder %v1537_v30, 96 }
  0x9f   :  { %v234_v21 = vrot.slane %v226_v19, 4  ;;  %v237_v22 = vrot.slane %v229_v20, 4  ;;  %v1590_v23 = vpop.permute.xlu2 %405  ;;  %vm275_vm12 = vmand %vm267_vm7, %vm271_vm8  ;;  %vm318_vm0 = vcmp.ge.s32.totalorder %v314_v51, 0  ;;  %vm320_vm7 = vcmp.ge.s32.totalorder %v316_v61, 0 }
  0xa0   :  { %vm324_vm8 = vcmp.lt.s32.totalorder %v316_v61, 16 }
  0xa1   :  { %242 = vst [vmem:[#allocation2 + $0x30] sm:$0x30] %v234_v21 }
  0xa2   :  { %245 = vst [vmem:[#allocation2 + $0x10] sm:$0x30] %v237_v22 }
  0xa5   :  { %v290_v28 = vpop.permute.xlu0 %289  ;;  %v286_v31 = vpop.permute.xlu1 %285 }
  0xa6   :  { %v295_v34 = vsel %vm293_vm15, %v288_v9, %v290_v28  ;;  %v296_v38 = vsel %vm293_vm15, %v286_v31, %v288_v9 }
  0xa7   :  { %v307_v39 = vsel %vm1593_vm14, %v295_v34, 0.0  ;;  %v306_v40 = vsel %vm1598_vm2, %v296_v38, 0.0  ;;  %v1613_v41 = vpop.permute.xlu2 %407  ;;  %vm71_vm14 = vmand %vm63_vm10, %vm67_vm11  ;;  %vm323_vm2 = vcmp.lt.s32.totalorder %v315_v55, 16  ;;  %vm325_vm10 = vcmp.lt.s32.totalorder %v317_v63, 16 }
  0xa8   :  { %311 = vst [vmem:[#allocation2 + $0x20] sm:$0x3] %v307_v39  ;;  %v416_v44 = vsel %vm413_vm3, %v1590_v23, %v1613_v41  ;;  %vm327_vm6 = vmand %vm319_vm1, %vm323_vm2  ;;  %vm385_vm11 = vcmp.ge.s32.totalorder %v381_v1, 0  ;;  %vm386_vm1 = vcmp.ge.s32.totalorder %v382_v8, 0  ;;  %vm390_vm2 = vcmp.lt.s32.totalorder %v382_v8, 16 }
  0xa9   :  { %310 = vst [vmem:[#allocation2 + $0x8] sm:$0x3] %v306_v40  ;;  %v426_v46 = vsel %vm392_vm4, %v416_v44, 0.0 }
  0xaa   :  { %v434_v48 = vrot.slane %v426_v46, 4 }
  0xac   :  { %442 = vst [vmem:[#allocation2 + $0x8] sm:$0x30] %v434_v48 }
  0xad   :  { %v292_v50 = vpop.permute.xlu1 %291 }
  0xae   :  { %v294_v52 = vsel %vm293_vm15, %v290_v28, %v292_v50  ;;  %v297_v53 = vsel %vm293_vm15, %v292_v50, %v286_v31  ;;  %v340_v54 = vpop.permute.xlu0 %339  ;;  %vm322_vm15 = vcmp.lt.s32.totalorder %v314_v51, 16  ;;  %v62_v28 = vadd.s32 4294967293, %v1558_v43 }
  0xaf   :  { %v308_v56 = vsel %vm1620_vm9, %v294_v52, 0.0  ;;  %v309_v58 = vsel %vm275_vm12, %v297_v53, 0.0  ;;  %v1633_v59 = vpop.permute.xlu2 %91  ;;  %vm326_vm4 = vmand %vm318_vm0, %vm322_vm15  ;;  %vm321_vm9 = vcmp.ge.s32.totalorder %v317_v63, 0  ;;  %vm389_vm12 = vcmp.lt.s32.totalorder %v381_v1, 16 }
  0xb0   :  { %312 = vst [vmem:[#allocation2 + $0x28] sm:$0x3] %v308_v56  ;;  %v97_v32 = vsel %vm93_vm13, %v1633_v59, %v1573_v57  ;;  %vm329_vm0 = vmand %vm321_vm9, %vm325_vm10  ;;  %vm459_vm9 = vcmask 130048  }
  0xb1   :  { %313 = vst [vmem:[#allocation2 + $0x38] sm:$0x3] %v309_v58  ;;  %v106_v60 = vsel %vm71_vm14, %v97_v32, 0.0  ;;  %vm328_vm14 = vmand %vm320_vm7, %vm324_vm8  ;;  %vm68_vm7 = vcmp.lt.s32.totalorder %v60_v14, 16 }
  0xb2   :  { %110 = vst [vmem:[#allocation2 + $0x30] sm:$0x3] %v106_v60  ;;  %vm393_vm15 = vmand %vm385_vm11, %vm389_vm12  ;;  %vm65_vm12 = vcmp.ge.s32.totalorder %v61_v25, 0 }
  0xb3   :  { %vm1657_vm8 = vmand %vm386_vm1, %vm390_vm2  ;;  %vm628_vm2 = vcmp.lt.s32.totalorder %v1537_v30, 2 }
  0xb5   :  { %v344_v62 = vpop.permute.xlu1 %343 }
  0xb6   :  { %v342_v0 = vpop.permute.xlu0 %341 }
  0xb7   :  { %v349_v2 = vsel %vm347_vm5, %v342_v0, %v344_v62  ;;  %v350_v3 = vsel %vm347_vm5, %v340_v54, %v342_v0 }
  0xb8   :  { %v360_v4 = vsel %vm326_vm4, %v350_v3, 0.0  ;;  %v361_v5 = vsel %vm327_vm6, %v349_v2, 0.0  ;;  %vm387_vm4 = vcmp.ge.s32.totalorder %v383_v10, 0  ;;  %vm391_vm6 = vcmp.lt.s32.totalorder %v383_v10, 16 }
  0xb9   :  { %v368_v6 = vrot.slane %v360_v4, 6  ;;  %v369_v7 = vrot.slane %v361_v5, 6  ;;  %v451_v26 = vld [vmem:[#allocation2 + $0x30] sm:$0xff]  ;;  %vm395_vm10 = vmand %vm387_vm4, %vm391_vm6 }
  0xbb   :  { %376 = vst [vmem:[#allocation2 + $0x8] sm:$0xc] %v368_v6 }
  0xbc   :  { %377 = vst [vmem:[#allocation2 + $0x20] sm:$0xc] %v369_v7 }
  0xbd   :  { %v346_v9 = vpop.permute.xlu1 %345 }
  0xbe   :  { %v348_v11 = vsel %vm347_vm5, %v344_v62, %v346_v9  ;;  %v351_v12 = vsel %vm347_vm5, %v346_v9, %v340_v54  ;;  %v410_v13 = vpop.permute.xlu0 %409  ;;  %vm64_vm5 = vcmp.ge.s32.totalorder %v60_v14, 0 }
  0xbf   :  { %v362_v15 = vsel %vm328_vm14, %v348_v11, 0.0  ;;  %v363_v16 = vsel %vm329_vm0, %v351_v12, 0.0  ;;  %v415_v17 = vsel %vm413_vm3, %v1613_v41, %v410_v13  ;;  %vm72_vm11 = vmand %vm64_vm5, %vm68_vm7  ;;  %vm69_vm14 = vcmp.lt.s32.totalorder %v61_v25, 16 }
  0xc0   :  { %v370_v18 = vrot.slane %v362_v15, 6  ;;  %v371_v19 = vrot.slane %v363_v16, 6  ;;  %v427_v20 = vsel %vm393_vm15, %v415_v17, 0.0  ;;  %vm66_vm0 = vcmp.ge.s32.totalorder %v62_v28, 0 }
  0xc1   :  { %v435_v21 = vrot.slane %v427_v20, 4  ;;  %vm70_vm15 = vcmp.lt.s32.totalorder %v62_v28, 16  ;;  %v654_v28 = vadd.s32 4294967295, %v1748_v45  ;;  %vm685_vm5 = vcmp.lt.s32.totalorder %v1537_v30, 1 }
  0xc2   :  { %378 = vst [vmem:[#allocation2 + $0x28] sm:$0xc] %v370_v18  ;;  %v455_v22 = vld [vmem:[#allocation2 + $0x8] sm:$0xff]  ;;  %vm74_vm1 = vmand %vm66_vm0, %vm70_vm15  ;;  %vm799_vm0 = vcmp.lt.s32.totalorder %v1537_v30, 126 }
  0xc3   :  { %379 = vst [vmem:[#allocation2 + $0x38] sm:$0xc] %v371_v19  ;;  %477 = vmatpush.msra.mxu0 %v455_v22  ;;  %vm658_vm6 = vcmp.ge.s32.totalorder %v654_v28, 0 }
  0xc4   :  { %443 = vst [vmem:[#allocation2 + $0x20] sm:$0x30] %v435_v21 }
  0xc5   :  { %478 = vmatpush.msra.mxu0 %v451_v26  ;;  %v412_v27 = vpop.permute.xlu1 %411 }
  0xc6   :  { %v414_v31 = vsel %vm413_vm3, %v410_v13, %v412_v27  ;;  %v417_v33 = vsel %vm413_vm3, %v412_v27, %v1590_v23  ;;  %v88_v34 = vpop.permute.xlu0 %87  ;;  %1354 = vmatmul.msk.f32.vlgmr.msra.gmra.mxu0 %vm459_vm9, %v450_v24  ;;  %vm73_vm3 = vmand %vm65_vm12, %vm69_vm14  ;;  %v544_v27 = vadd.s32 4294967293, %v1748_v45 }
  0xc7   :  { %v428_v47 = vsel %vm1657_vm8, %v414_v31, 0.0  ;;  %v429_v38 = vsel %vm395_vm10, %v417_v33, 0.0  ;;  %v96_v39 = vsel %vm93_vm13, %v1573_v57, %v88_v34  ;;  %v1759_v31 = vand.u32 15, %v1550_v37 }
  0xc8   :  { %v436_v43 = vrot.slane %v428_v47, 4  ;;  %v437_v40 = vrot.slane %v429_v38, 4  ;;  %v107_v41 = vsel %vm72_vm11, %v96_v39, 0.0  ;;  %vm548_vm4 = vcmp.ge.s32.totalorder %v544_v27, 0 }
  0xc9   :  { %111 = vst [vmem:[#allocation2] sm:$0x3] %v107_v41  ;;  %v545_v39 = vadd.s32 4294967293, %v1759_v31  ;;  %v1850_v28 = vadd.s32 4294967294, %v1759_v31 }
  0xca   :  { %444 = vst [vmem:[#allocation2 + $0x28] sm:$0x30] %v436_v43  ;;  %v546_v43 = vadd.s32 4294967293, %v1763_v36 }
  0xcb   :  { %445 = vst [vmem:[#allocation2 + $0x38] sm:$0x30] %v437_v40  ;;  %v456_v23 = vld [vmem:[#allocation2 + $0x20] sm:$0xff]  ;;  %v655_v40 = vadd.s32 4294967295, %v1759_v31  ;;  %vm549_vm11 = vcmp.ge.s32.totalorder %v545_v39, 0  ;;  %v1859_v39 = vadd.s32 4294967294, %v1763_v36 }
  0xcc   :  { %497 = vmatpush.msra.mxu1 %v456_v23  ;;  %vm550_vm12 = vcmp.ge.s32.totalorder %v546_v43, 0 }
  0xcd   :  { %v90_v42 = vpop.permute.xlu1 %89  ;;  %vm659_vm14 = vcmp.ge.s32.totalorder %v655_v40, 0 }
  0xce   :  { %v94_v44 = vsel %vm93_vm13, %v90_v42, %v1633_v59  ;;  %v95_v57 = vsel %vm93_vm13, %v88_v34, %v90_v42  ;;  %vm567_vm13 = vcmp.lt.s32.totalorder %v1537_v30, 3  ;;  %v593_v34 = vadd.s32 4294967294, %v1748_v45 }
  0xcf   :  { %v108_v46 = vsel %vm73_vm3, %v95_v57, 0.0  ;;  %v109_v48 = vsel %vm74_vm1, %v94_v44, 0.0 }
  0xd0   :  { %112 = vst [vmem:[#allocation2 + $0x18] sm:$0x3] %v108_v46  ;;  %v452_v49 = vld [vmem:[#allocation2] sm:$0xff]  ;;  %vm597_vm7 = vcmp.ge.s32.totalorder %v593_v34, 0 }
  0xd1   :  { %113 = vst [vmem:[#allocation2 + $0x10] sm:$0x3] %v109_v48  ;;  %498 = vmatpush.msra.mxu1 %v452_v49  ;;  %v457_v50 = vld [vmem:[#allocation2 + $0x28] sm:$0xff] }
  0xd2   :  { %1355 = vmatmul.msk.f32.vlgmr.msra.gmra.mxu1 %vm459_vm9, %v450_v24  ;;  %v458_v51 = vld [vmem:[#allocation2 + $0x38] sm:$0xff] }
  0xd3   :  { %517 = vmatpush.msrb.mxu1 %v457_v50  ;;  %537 = vmatpush.msra.mxu3 %v458_v51 }
  0xd7   :  { %v453_v52 = vld [vmem:[#allocation2 + $0x18] sm:$0xff] }
  0xd8   :  { %518 = vmatpush.msrb.mxu1 %v453_v52  ;;  %v454_v53 = vld [vmem:[#allocation2 + $0x10] sm:$0xff]  ;;  %v1797_v52 = vadd.s32 4294967295, %v1763_v36 }
  0xd9   :  { %538 = vmatpush.msra.mxu3 %v454_v53 }
  0xda   :  { %1356 = vmatmul.msk.f32.vlgmr.msrb.gmra.mxu1 %vm459_vm9, %v450_v24  ;;  %1357 = vmatmul.msk.f32.vlgmr.msra.gmra.mxu3 %vm459_vm9, %v450_v24  ;;  %v1751_v24 = vand.u32 15, %v1537_v30  ;;  %vm742_vm9 = vcmp.lt.s32.totalorder %v1537_v30, 127 }
  0xdc   :  { %v543_v47 = vadd.s32 4294967293, %v1751_v24  ;;  %v710_v37 = vadd.s32 1, %v1751_v24  ;;  %v1780_v23 = vadd.s32 2, %v1751_v24  ;;  %v592_v46 = vadd.s32 4294967294, %v1751_v24 }
  0xdd   :  { %v1792_v48 = vadd.s32 4294967295, %v1751_v24 }
  0xde   :  { %vm547_vm8 = vcmp.ge.s32.totalorder %v543_v47, 0  ;;  %vm718_vm10 = vcmp.lt.s32.totalorder %v710_v37, 16  ;;  %vm775_vm15 = vcmp.lt.s32.totalorder %v1780_v23, 16  ;;  %vm596_vm3 = vcmp.ge.s32.totalorder %v592_v46, 0 }
  0xdf   :  { %vm657_vm1 = vcmp.ge.s32.totalorder %v1792_v48, 0  ;;  %v1870_v37 = vadd.s32 2, %v1759_v31  ;;  %v1924_v48 = vadd.s32 3, %v1759_v31 }
 0x143   :  { %v1685_v54 = vpop.f32.mrf.mxu0 }
 0x144   :  { %559 = vrot.lane.b32.xlu0 %v1685_v54, %s1468_s2  ;;  %v612_v59 = vrot.slane %v1685_v54, 1  ;;  %v726_v32 = vrot.slane %v1685_v54, 4  ;;  %v669_v60 = vrot.slane %v1685_v54, 2  ;;  %v783_v1 = vrot.slane %v1685_v54, 5 }
 0x145   :  { %v840_v3 = vrot.slane %v1685_v54, 6 }
 0x14f   :  { %v1689_v55 = vpop.f32.mrf.mxu1 }
 0x150   :  { %561 = vrot.lane.b32.xlu1 %v1689_v55, %s1468_s2  ;;  %v613_v56 = vrot.slane %v1689_v55, 1  ;;  %v670_v58 = vrot.slane %v1689_v55, 2  ;;  %v727_v61 = vrot.slane %v1689_v55, 4  ;;  %v784_v63 = vrot.slane %v1689_v55, 5 }
 0x151   :  { %v841_v10 = vrot.slane %v1689_v55, 6 }
 0x152   :  { %622 = vrot.lane.b32.xlu2 %v613_v56, %s1469_s17  ;;  %679 = vrot.lane.b32.xlu0 %v670_v58, %s1470_s18 }
 0x157   :  { %v1704_v62 = vpop.f32.mrf.mxu1 }
 0x158   :  { %620 = vrot.lane.b32.xlu1 %v612_v59, %s1469_s17  ;;  %v785_v7 = vrot.slane %v1704_v62, 5  ;;  %v671_v8 = vrot.slane %v1704_v62, 2  ;;  %v614_v9 = vrot.slane %v1704_v62, 1  ;;  %v728_v11 = vrot.slane %v1704_v62, 4 }
 0x159   :  { %v842_v12 = vrot.slane %v1704_v62, 6 }
 0x15a   :  { %734 = vrot.lane.b32.xlu0 %v726_v32, %s1471_s19  ;;  %677 = vrot.lane.b32.xlu2 %v669_v60, %s1470_s18  ;;  %v1806_v32 = vadd.s32 1, %v1748_v45 }
 0x15d   :  { %v1710_v0 = vpop.f32.mrf.mxu3 }
 0x15e   :  { %v615_v2 = vrot.slane %v1710_v0, 1  ;;  %v672_v4 = vrot.slane %v1710_v0, 2  ;;  %v729_v5 = vrot.slane %v1710_v0, 4  ;;  %v786_v6 = vrot.slane %v1710_v0, 5 }
 0x15f   :  { %v843_v13 = vrot.slane %v1710_v0, 6 }
 0x160   :  { %736 = vrot.lane.b32.xlu1 %v727_v61, %s1471_s19 }
 0x162   :  { %563 = vrot.lane.b32.xlu0 %v1704_v62, %s1468_s2  ;;  %793 = vrot.lane.b32.xlu2 %v784_v63, %s1472_s20  ;;  %v1813_v63 = vadd.s32 1, %v1759_v31 }
 0x168   :  { %791 = vrot.lane.b32.xlu1 %v783_v1, %s1472_s20  ;;  %v1816_v1 = vadd.s32 1, %v1763_v36 }
 0x16a   :  { %626 = vrot.lane.b32.xlu0 %v615_v2, %s1469_s17  ;;  %848 = vrot.lane.b32.xlu2 %v840_v3, %s1473_s21  ;;  %v1819_v2 = vadd.s32 3, %v1763_v36 }
 0x170   :  { %683 = vrot.lane.b32.xlu1 %v672_v4, %s1470_s18 }
 0x172   :  { %740 = vrot.lane.b32.xlu0 %v729_v5, %s1471_s19  ;;  %565 = vrot.lane.b32.xlu2 %v1710_v0, %s1468_s2 }
 0x178   :  { %797 = vrot.lane.b32.xlu1 %v786_v6, %s1472_s20 }
 0x17a   :  { %795 = vrot.lane.b32.xlu0 %v785_v7, %s1472_s20  ;;  %681 = vrot.lane.b32.xlu2 %v671_v8, %s1470_s18 }
 0x180   :  { %624 = vrot.lane.b32.xlu1 %v614_v9, %s1469_s17 }
 0x182   :  { %850 = vrot.lane.b32.xlu0 %v841_v10, %s1473_s21  ;;  %738 = vrot.lane.b32.xlu2 %v728_v11, %s1471_s19  ;;  %v1109_v11 = vld [vmem:[%s2169_s1 + $0x78] sm:$0xff] }
 0x188   :  { %852 = vrot.lane.b32.xlu1 %v842_v12, %s1473_s21 }
 0x18a   :  { %854 = vrot.lane.b32.xlu2 %v843_v13, %s1473_s21  ;;  %v1839_v13 = vadd.s32 2, %v1763_v36 }
 0x1ac   :  { %v1733_v14 = vpop.permute.xlu2 %622 }
 0x1b4   :  { %v1735_v15 = vpop.permute.xlu2 %677 }
 0x1b6   :  { %v560_v16 = vpop.permute.xlu0 %559 }
 0x1bc   :  { %v1737_v17 = vpop.permute.xlu2 %793 }
 0x1c2   :  { %v562_v18 = vpop.permute.xlu1 %561 }
 0x1c3   :  { %v570_v38 = vsel %vm567_vm13, %v560_v16, %v562_v18 }
 0x1c4   :  { %v1739_v19 = vpop.permute.xlu0 %679  ;;  %v1741_v20 = vpop.permute.xlu2 %848  ;;  %v573_v41 = vsel %vm548_vm4, %v570_v38, 0.0  ;;  %vm660_vm4 = vcmp.ge.s32.totalorder %v1797_v52, 0  ;;  %v1107_v52 = vld [vmem:[%s2169_s1 + $0x68] sm:$0xff] }
 0x1c5   :  { %v688_v44 = vsel %vm685_vm5, %v1735_v15, %v1739_v19  ;;  %v581_v53 = vrot.slane %v573_v41, 5  ;;  %v1867_v41 = vadd.s32 2, %v1748_v45 }
 0x1c6   :  { %v691_v56 = vsel %vm658_vm6, %v688_v44, 0.0  ;;  %vm1110_vm6 = vcmask 15360   ;;  %v1879_v44 = vadd.s32 3, %v1751_v24  ;;  %v1108_v24 = vld [vmem:[%s2169_s1 + $0x70] sm:$0xff] }
 0x1c7   :  { %v589_v3 = vadd.f32 %v581_v53, %v1689_v55  ;;  %v699_v4 = vrot.slane %v691_v56, 5  ;;  %v1101_v55 = vld [vmem:[%s2169_s1 + $0x38] sm:$0xff] }
 0x1ca   :  { %v1743_v21 = vpop.permute.xlu1 %620 }
 0x1cb   :  { %v631_v35 = vsel %vm628_vm2, %v1743_v21, %v1733_v14 }
 0x1cc   :  { %v1745_v22 = vpop.permute.xlu0 %734  ;;  %v566_v25 = vpop.permute.xlu2 %565  ;;  %v634_v49 = vsel %vm597_vm7, %v631_v35, 0.0  ;;  %vm720_vm7 = vcmp.lt.s32.totalorder %v1813_v63, 16  ;;  %v1102_v63 = vld [vmem:[%s2169_s1 + $0x40] sm:$0xff] }
 0x1cd   :  { %v571_v57 = vsel %vm567_vm13, %v566_v25, %v560_v16  ;;  %v642_v60 = vrot.slane %v634_v49, 5  ;;  %v1136_v16 = vsel %vm1110_vm6, %v1101_v55, -inf  ;;  %v1097_v55 = vld [vmem:[%s2169_s1 + $0x18] sm:$0xff] }
 0x1ce   :  { %v572_v58 = vsel %vm547_vm8, %v571_v57, 0.0  ;;  %vm721_vm8 = vcmp.lt.s32.totalorder %v1816_v1, 16 }
 0x1cf   :  { %v580_v5 = vrot.slane %v572_v58, 5  ;;  %v650_v12 = vadd.f32 %v642_v60, %v589_v3  ;;  %v1134_v60 = vsel %vm1110_vm6, %v1108_v24, -inf }
 0x1d1   :  { %v1873_v36 = vadd.f32 %v699_v4, %v650_v12  ;;  %v1099_v4 = vld [vmem:[%s2169_s1 + $0x28] sm:$0xff] }
 0x1d2   :  { %v1753_v26 = vpop.permute.xlu1 %736 }
 0x1d3   :  { %v745_v7 = vsel %vm742_vm9, %v1745_v22, %v1753_v26 }
 0x1d4   :  { %v564_v33 = vpop.permute.xlu0 %563  ;;  %v682_v50 = vpop.permute.xlu2 %681  ;;  %v1853_v34 = vsel %vm718_vm10, %v745_v7, 0.0  ;;  %vm598_vm10 = vcmp.ge.s32.totalorder %v1850_v28, 0  ;;  %v1130_v7 = vsel %vm1110_vm6, %v1099_v4, -inf }
 0x1d5   :  { %v569_v59 = vsel %vm567_vm13, %v562_v18, %v564_v33  ;;  %v568_v61 = vsel %vm567_vm13, %v564_v33, %v566_v25  ;;  %v687_v9 = vsel %vm685_vm5, %v1739_v19, %v682_v50  ;;  %vm719_vm13 = vcmp.lt.s32.totalorder %v1806_v32, 16 }
 0x1d6   :  { %v574_v6 = vsel %vm549_vm11, %v569_v59, 0.0  ;;  %v575_v8 = vsel %vm550_vm12, %v568_v61, 0.0  ;;  %v1137_v18 = vsel %vm1110_vm6, %v1109_v11, -inf  ;;  %v1856_v38 = vsel %vm659_vm14, %v687_v9, 0.0  ;;  %v1106_v9 = vld [vmem:[%s2169_s1 + $0x60] sm:$0xff] }
 0x1d7   :  { %v582_v19 = vrot.slane %v574_v6, 5  ;;  %v1138_v33 = vmax.f32 %v1136_v16, %v1137_v18  ;;  %v583_v47 = vrot.slane %v575_v8, 5  ;;  %v755_v57 = vrot.slane %v1853_v34, 5  ;;  %v1105_v18 = vld [vmem:[%s2169_s1 + $0x58] sm:$0xff] }
 0x1d8   :  { %v700_v53 = vrot.slane %v1856_v38, 5  ;;  %vm599_vm11 = vcmp.ge.s32.totalorder %v1859_v39, 0  ;;  %vm832_vm12 = vcmp.lt.s32.totalorder %v1879_v44, 16  ;;  %vm778_vm14 = vcmp.lt.s32.totalorder %v1839_v13, 16  ;;  %v1139_v13 = vld [vmem:[%s2171_s3] sm:$0xff] }
 0x1d9   :  { %1379 = vmatpush.msrb.mxu3 %v1138_v33  ;;  %1164 = vmatpush.msrb.mxu0 %v1138_v33  ;;  %v1883_v49 = vadd.f32 %v582_v19, %v1704_v62  ;;  %v1889_v56 = vadd.f32 %v583_v47, %v1710_v0  ;;  %v1901_v62 = vadd.s32 3, %v1748_v45  ;;  %v1100_v0 = vld [vmem:[%s2169_s1 + $0x30] sm:$0xff]  ;;  %v1131_v8 = vsel %vm1110_vm6, %v1107_v52, -inf }
 0x1da   :  { %v1782_v42 = vpop.permute.xlu1 %791  ;;  %v1133_v59 = vsel %vm1110_vm6, %v1100_v0, -inf  ;;  %v1132_v16 = vmax.f32 %v1130_v7, %v1131_v8  ;;  %v1096_v19 = vld [vmem:[%s2169_s1 + $0x10] sm:$0xff]  ;;  %v1128_v33 = vsel %vm1110_vm6, %v1106_v9, -inf  ;;  %v1120_v47 = vsel %vm1110_vm6, %v1097_v55, 0.0 }
 0x1db   :  { %v802_v35 = vsel %vm799_vm0, %v1782_v42, %v1737_v17  ;;  %v1135_v3 = vmax.f32 %v1133_v59, %v1134_v60  ;;  %v1117_v1 = vsel %vm1110_vm6, %v1096_v19, 0.0 }
 0x1dc   :  { %v1794_v51 = vpop.permute.xlu0 %626  ;;  %v739_v43 = vpop.permute.xlu2 %738  ;;  %v1893_v58 = vsel %vm775_vm15, %v802_v35, 0.0  ;;  %vm776_vm15 = vcmp.lt.s32.totalorder %v1867_v41, 16  ;;  %v1095_v35 = vld [vmem:[%s2169_s1 + $0x8] sm:$0xff] }
 0x1dd   :  { %v632_v25 = vsel %vm628_vm2, %v1794_v51, %v1743_v21  ;;  %v588_v21 = vadd.f32 %v580_v5, %v1685_v54  ;;  %v1098_v5 = vld [vmem:[%s2169_s1 + $0x20] sm:$0xff]  ;;  %1380 = vmatpush.msrb.mxu3 %v1135_v3  ;;  %1165 = vmatpush.msrb.mxu0 %v1135_v3 }
 0x1de   :  { %v633_v40 = vsel %vm596_vm3, %v632_v25, 0.0  ;;  %v1104_v25 = vld [vmem:[%s2169_s1 + $0x50] sm:$0xff]  ;;  %vm835_vm3 = vcmp.lt.s32.totalorder %v1819_v2, 16 }
 0x1df   :  { %v641_v23 = vrot.slane %v633_v40, 5  ;;  %1381 = vmatpush.msrb.mxu3 %v1132_v16  ;;  %1166 = vmatpush.msrb.mxu0 %v1132_v16  ;;  %v1118_v24 = vsel %vm1110_vm6, %v1104_v25, 0.0 }
 0x1e0   :  { %v1119_v59 = vadd.f32 %v1118_v24, %v1117_v1 }
 0x1e1   :  { %v649_v32 = vadd.f32 %v641_v23, %v588_v21  ;;  %v1114_v23 = vsel %vm1110_vm6, %v1095_v35, 0.0  ;;  %v1141_v35 = vld [vmem:[%s2171_s3 + $0x10] sm:$0xff] }
 0x1e2   :  { %v684_v10 = vpop.permute.xlu1 %683 }
 0x1e3   :  { %v689_v54 = vsel %vm685_vm5, %v684_v10, %v1735_v15  ;;  %v686_v46 = vsel %vm685_vm5, %v682_v50, %v684_v10  ;;  %v744_v15 = vsel %vm742_vm9, %v1753_v26, %v739_v43  ;;  %vm856_vm5 = vcmp.lt.s32.totalorder %v1537_v30, 125  ;;  %v1142_v30 = vld [vmem:[%s2171_s3 + $0x18] sm:$0xff] }
 0x1e4   :  { %v741_v27 = vpop.permute.xlu0 %740  ;;  %v690_v50 = vsel %vm657_vm1, %v689_v54, 0.0  ;;  %v1917_v45 = vsel %vm660_vm4, %v686_v46, 0.0  ;;  %v1127_v10 = vsel %vm1110_vm6, %v1098_v5, -inf  ;;  %v1952_v11 = vsel %vm719_vm13, %v744_v15, 0.0  ;;  %v1094_v15 = vld [vmem:[%s2169_s1] sm:$0xff]  ;;  %v855_v7 = vpop.permute.xlu2 %854 }
 0x1e5   :  { %v743_v61 = vsel %vm742_vm9, %v739_v43, %v741_v27  ;;  %v746_v6 = vsel %vm742_vm9, %v741_v27, %v1745_v22  ;;  %v812_v22 = vrot.slane %v1893_v58, 5  ;;  %v698_v12 = vrot.slane %v690_v50, 5  ;;  %v1103_v43 = vld [vmem:[%s2169_s1 + $0x48] sm:$0xff] }
 0x1e6   :  { %vm777_vm9 = vcmp.lt.s32.totalorder %v1870_v37, 16  ;;  %v701_v27 = vrot.slane %v1917_v45, 5  ;;  %v1975_v40 = vsel %vm720_vm7, %v743_v61, 0.0  ;;  %v1979_v21 = vsel %vm721_vm8, %v746_v6, 0.0 }
 0x1e7   :  { %v1129_v54 = vmax.f32 %v1127_v10, %v1128_v33  ;;  %v1121_v46 = vsel %vm1110_vm6, %v1105_v18, 0.0  ;;  %v706_v50 = vadd.f32 %v698_v12, %v649_v32  ;;  %vm834_vm1 = vcmp.lt.s32.totalorder %v1924_v48, 16  ;;  %v1140_v48 = vld [vmem:[%s2171_s3 + $0x8] sm:$0xff] }
 0x1e8   :  { %v1122_v0 = vadd.f32 %v1121_v46, %v1120_v47  ;;  %v1115_v60 = vsel %vm1110_vm6, %v1103_v43, 0.0  ;;  %v1111_v61 = vsel %vm1110_vm6, %v1094_v15, 0.0  ;;  %vm833_vm4 = vcmp.lt.s32.totalorder %v1901_v62, 16 }
 0x1e9   :  { %1382 = vmatpush.msrb.mxu3 %v1129_v54  ;;  %1167 = vmatpush.msrb.mxu0 %v1129_v54  ;;  %v1116_v5 = vadd.f32 %v1115_v60, %v1114_v23  ;;  %v1112_v6 = vsel %vm1110_vm6, %v1102_v63, 0.0  ;;  %v1125_v10 = vmul.f32 0.00390625, %v1119_v59  ;;  %v763_v28 = vadd.f32 %v755_v57, %v706_v50 }
 0x1ea   :  { %v1911_v26 = vpop.permute.xlu1 %797  ;;  %v1126_v52 = vmul.f32 0.00390625, %v1122_v0  ;;  %v1113_v55 = vadd.f32 %v1112_v6, %v1111_v61  ;;  %v860_v39 = vsel %vm856_vm5, %v855_v7, %v1741_v20  ;;  %v756_v57 = vrot.slane %v1952_v11, 5 }
 0x1eb   :  { %v803_v3 = vsel %vm799_vm0, %v1911_v26, %v1782_v42  ;;  %v1124_v19 = vmul.f32 0.00390625, %v1116_v5  ;;  %v757_v41 = vrot.slane %v1975_v40, 5  ;;  %v864_v11 = vsel %vm835_vm3, %v860_v39, 0.0 }
 0x1ec   :  { %v796_v31 = vpop.permute.xlu0 %795  ;;  %1383 = vmatpush.msrb.mxu3 %v1126_v52  ;;  %1168 = vmatpush.msrb.mxu0 %v1126_v52  ;;  %v1123_v33 = vmul.f32 0.00390625, %v1113_v55  ;;  %v820_v46 = vadd.f32 %v812_v22, %v763_v28  ;;  %v764_v2 = vadd.f32 %v756_v57, %v1873_v36  ;;  %v872_v24 = vrot.slane %v864_v11, 5  ;;  %v1185_v57 = vld [vmem:[%s2172_s4] sm:$0x3] }
 0x1ed   :  { %v801_v42 = vsel %vm799_vm0, %v1737_v17, %v796_v31  ;;  %v1474_v55 = vmov 512.0   ;;  %vm1186_vm7 = vcmask 261120   ;;  %vm1227_vm8 = vcmask 1041408  }
 0x1ee   :  { %1384 = vmatpush.msrb.mxu3 %v1125_v10  ;;  %1169 = vmatpush.msrb.mxu0 %v1125_v10  ;;  %1410 = vrcp.f32 %v1474_v55 }
 0x1f0   :  { %1385 = vmatpush.msrb.mxu3 %v1124_v19  ;;  %1170 = vmatpush.msrb.mxu0 %v1124_v19 }
 0x1f2   :  { %v625_v4 = vpop.permute.xlu1 %624  ;;  %1386 = vmatpush.msrb.mxu3 %v1123_v33  ;;  %1171 = vmatpush.msrb.mxu0 %v1123_v33 }
 0x1f3   :  { %v629_v8 = vsel %vm628_vm2, %v625_v4, %v1794_v51  ;;  %v630_v9 = vsel %vm628_vm2, %v1733_v14, %v625_v4  ;;  %v800_v14 = vsel %vm799_vm0, %v796_v31, %v1911_v26  ;;  %v807_v26 = vsel %vm778_vm14, %v803_v3, 0.0 }
 0x1f4   :  { %v635_v12 = vsel %vm598_vm10, %v630_v9, 0.0  ;;  %v636_v16 = vsel %vm599_vm11, %v629_v8, 0.0  ;;  %v851_v18 = vpop.permute.xlu0 %850  ;;  %v805_v31 = vsel %vm776_vm15, %v801_v42, 0.0  ;;  %vm1143_vm2 = vcmask 523264   ;;  %v1411_v42 = vpop.eup %1410 }
 0x1f5   :  { %v643_v51 = vrot.slane %v635_v12, 5  ;;  %v644_v25 = vrot.slane %v636_v16, 5  ;;  %v859_v17 = vsel %vm856_vm5, %v1741_v20, %v851_v18  ;;  %v806_v20 = vsel %vm777_vm9, %v800_v14, 0.0  ;;  %1367 = vmatmul.msk.f32.vlgmr.msrb.gmra.mxu3 %vm1143_vm2, %v1141_v35  ;;  %1365 = vmatmul.msk.f32.vlgmr.msrb.gmra.mxu0 %vm1143_vm2, %v1139_v13 }
 0x1f6   :  { %v861_v32 = vsel %vm832_vm12, %v859_v17, 0.0  ;;  %v815_v43 = vrot.slane %v807_v26, 5  ;;  %v813_v54 = vrot.slane %v805_v31, 5  ;;  %v814_v40 = vrot.slane %v806_v20, 5 }
 0x1f7   :  { %v651_v47 = vadd.f32 %v643_v51, %v1883_v49  ;;  %v652_v34 = vadd.f32 %v644_v25, %v1889_v56  ;;  %v869_v44 = vrot.slane %v861_v32, 5  ;;  %v758_v49 = vrot.slane %v1979_v21, 5 }
 0x1f8   :  { %v821_v23 = vadd.f32 %v813_v54, %v764_v2  ;;  %vm897_vm0 = vcmask 1040384   ;;  %v915_v12 = vmul.f32 512.0, %v1411_v42  ;;  %vm919_vm13 = vweird.f32 %v1411_v42 }
 0x1f9   :  { %v708_v37 = vadd.f32 %v700_v53, %v651_v47  ;;  %v709_v56 = vadd.f32 %v701_v27, %v652_v34  ;;  %v2057_v53 = vadd.f32 %v869_v44, %v820_v46 }
 0x1fa   :  { %v853_v15 = vpop.permute.xlu1 %852  ;;  %v916_v16 = vsub.f32 1.0, %v915_v12 }
 0x1fb   :  { %v766_v63 = vadd.f32 %v758_v49, %v709_v56  ;;  %v765_v21 = vadd.f32 %v757_v41, %v708_v37  ;;  %v857_v38 = vsel %vm856_vm5, %v853_v15, %v855_v7  ;;  %v858_v58 = vsel %vm856_vm5, %v851_v18, %v853_v15 }
 0x1fc   :  { %v863_v45 = vsel %vm834_vm1, %v857_v38, 0.0  ;;  %v862_v27 = vsel %vm833_vm4, %v858_v58, 0.0  ;;  %v889_v36 = vrot.slane %v2057_v53, 3  ;;  %v917_v17 = vmul.f32 %v1411_v42, %v916_v16 }
 0x1fd   :  { %v822_v22 = vadd.f32 %v814_v40, %v765_v21  ;;  %v871_v0 = vrot.slane %v863_v45, 5  ;;  %v823_v1 = vadd.f32 %v815_v43, %v766_v63  ;;  %v870_v50 = vrot.slane %v862_v27, 5  ;;  %1368 = vmatmul.msk.f32.gmra.mxu3 %vm1143_vm2, %v1142_v30  ;;  %1366 = vmatmul.msk.f32.gmra.mxu0 %vm1143_vm2, %v1140_v48  ;;  %v1211_v27 = vld [vmem:[%s2173_s5] sm:$0xff] }
 0x1fe   :  { %v898_v52 = vsel %vm897_vm0, %v889_v36, 0.0  ;;  %v918_v32 = vadd.f32 %v1411_v42, %v917_v17 }
 0x1ff   :  { %v879_v59 = vadd.f32 %v871_v0, %v822_v22  ;;  %v878_v60 = vadd.f32 %v870_v50, %v821_v23  ;;  %v880_v61 = vadd.f32 %v872_v24, %v823_v1  ;;  %v1212_v0 = vld [vmem:[%s2173_s5 + $0x8] sm:$0xff]  ;;  %v1213_v1 = vld [vmem:[%s2173_s5 + $0x10] sm:$0xff]  ;;  %v1214_v24 = vld [vmem:[%s2173_s5 + $0x18] sm:$0xff]  ;;  %s1360_s5 = sld [smem:[#allocation3 + $0x3]] }
 0x200   :  { %v920_v34 = vsel %vm919_vm13, %v1411_v42, %v918_v32 }
 0x201   :  { %v890_v62 = vrot.slane %v878_v60, 3  ;;  %v891_v3 = vrot.slane %v879_v59, 3  ;;  %v892_v4 = vrot.slane %v880_v61, 3 }
 0x203   :  { %v899_v5 = vsel %vm897_vm0, %v890_v62, 0.0  ;;  %v901_v7 = vsel %vm897_vm0, %v891_v3, 0.0  ;;  %v903_v9 = vsel %vm897_vm0, %v892_v4, 0.0 }
 0x204   :  { %v900_v6 = vadd.f32 %v899_v5, %v898_v52 }
 0x206   :  { %v902_v8 = vadd.f32 %v901_v7, %v900_v6 }
 0x208   :  { %v904_v10 = vadd.f32 %v903_v9, %v902_v8 }
 0x20a   :  { %905 = vadd.xlane.f32.xlu0 %v904_v10 }
 0x272   :  { %v1173_v18 = vpop.f32.mrf.mxu0 }
 0x278   :  { %v1179_v14 = vpop.f32.mrf.mxu3 }
 0x27a   :  { %v1176_v31 = vpop.f32.mrf.mxu0 }
 0x27d   :  { %v906_v19 = vpop.xlane.xlu0 %905 }
 0x27e   :  { %v907_v51 = vrot.slane %v906_v19, 4 }
 0x280   :  { %v908_v25 = vadd.f32 %v907_v51, %v906_v19  ;;  %v1182_v33 = vpop.f32.mrf.mxu3 }
 0x281   :  { %1202 = vmatpush.msra.mxu1 %v1182_v33 }
 0x282   :  { %v909_v28 = vrot.slane %v908_v25, 2 }
 0x283   :  { %1203 = vmatpush.msra.mxu1 %v1179_v14 }
 0x284   :  { %v910_v39 = vadd.f32 %v909_v28, %v908_v25 }
 0x285   :  { %1204 = vmatpush.msra.mxu1 %v1176_v31 }
 0x286   :  { %v911_v26 = vrot.slane %v910_v39, 1 }
 0x287   :  { %1205 = vmatpush.msra.mxu1 %v1173_v18 }
 0x288   :  { %v912_v47 = vadd.f32 %v911_v26, %v910_v39  ;;  %1369 = vmatmul.msk.f32.vlgmr.msra.gmra.mxu1 %vm1186_vm7, %v1185_v57 }
 0x28a   :  { %1387 = vpush %v912_v47 }
 0x28b   :  { %1389 = vpush %v920_v34  ;;  %v2122_v34 = vstv %s1360_s5 }
 0x2bb   :  { %s1388_s13 = spop %1387 }
 0x2bc   :  { %s2081_s14 = spop %1389 }
 0x2bd   :  { %s922_s15 = smul.f32 %s2081_s14, %s1388_s13 }
 0x2bf   :  { %v923_v20 = vstv %s922_s15 }
 0x2c0   :  { %v2085_v44 = vsub.f32 %v2057_v53, %v923_v20  ;;  %v2087_v35 = vsub.f32 %v878_v60, %v923_v20  ;;  %v2089_v13 = vsub.f32 %v879_v59, %v923_v20  ;;  %v2091_v41 = vsub.f32 %v880_v61, %v923_v20 }
 0x2c2   :  { %v928_v49 = vmul.f32 %v2085_v44, %v2085_v44  ;;  %v929_v37 = vmul.f32 %v2087_v35, %v2087_v35  ;;  %v930_v56 = vmul.f32 %v2089_v13, %v2089_v13  ;;  %v931_v11 = vmul.f32 %v2091_v41, %v2091_v41 }
 0x2c4   :  { %v936_v43 = vrot.slane %v928_v49, 3  ;;  %v937_v54 = vrot.slane %v929_v37, 3  ;;  %v938_v46 = vrot.slane %v930_v56, 3  ;;  %v939_v15 = vrot.slane %v931_v11, 3 }
 0x2c6   :  { %v944_v40 = vsel %vm897_vm0, %v936_v43, 0.0  ;;  %v945_v63 = vsel %vm897_vm0, %v937_v54, 0.0  ;;  %v947_v38 = vsel %vm897_vm0, %v938_v46, 0.0  ;;  %v949_v53 = vsel %vm897_vm0, %v939_v15, 0.0 }
 0x2c7   :  { %v946_v21 = vadd.f32 %v945_v63, %v944_v40 }
 0x2c9   :  { %v948_v2 = vadd.f32 %v947_v38, %v946_v21 }
 0x2cb   :  { %v950_v58 = vadd.f32 %v949_v53, %v948_v2 }
 0x2cd   :  { %951 = vadd.xlane.f32.xlu1 %v950_v58 }
 0x305   :  { %v1207_v45 = vpop.f32.mrf.mxu1 }
 0x306   :  { %v1210_v22 = vmax.f32 %v1207_v45, 0.0 }
 0x308   :  { %1370 = vmatpush.msk.msra.mxu2 %vm1227_vm8, %v1210_v22 }
 0x309   :  { %1371 = vmatmul.msk.f32.vlgmr.msra.gmra.mxu2 %vm1110_vm6, %v1211_v27 }
 0x311   :  { %1372 = vmatmul.msk.f32.gmra.mxu2 %vm1110_vm6, %v1212_v0 }
 0x319   :  { %1373 = vmatmul.msk.f32.gmra.mxu2 %vm1110_vm6, %v1213_v1 }
 0x321   :  { %1374 = vmatmul.msk.f32.gmra.mxu2 %vm1110_vm6, %v1214_v24 }
 0x340   :  { %v952_v23 = vpop.xlane.xlu1 %951 }
 0x341   :  { %v953_v50 = vrot.slane %v952_v23, 4 }
 0x343   :  { %v954_v59 = vadd.f32 %v953_v50, %v952_v23 }
 0x345   :  { %v955_v36 = vrot.slane %v954_v59, 2 }
 0x347   :  { %v956_v60 = vadd.f32 %v955_v36, %v954_v59 }
 0x349   :  { %v957_v61 = vrot.slane %v956_v60, 1 }
 0x34b   :  { %v958_v30 = vadd.f32 %v957_v61, %v956_v60 }
 0x34d   :  { %1391 = vpush %v958_v30 }
 0x37e   :  { %s1392_s22 = spop %1391 }
 0x37f   :  { %s968_s23 = smul.f32 %s1392_s22, %s2081_s14 }
 0x381   :  { %s969_s24 = sadd.f32 1e-05, %s968_s23 }
 0x383   :  { %v970_v48 = vstv %s969_s24 }
 0x384   :  { %1412 = vrsqrt.f32 %v970_v48  ;;  %vm977_vm11 = vweird.f32 %v970_v48 }
 0x38a   :  { %v1413_v62 = vpop.eup %1412 }
 0x38b   :  { %v972_v3 = vmul.f32 %v1413_v62, %v970_v48  ;;  %vm978_vm10 = vweird.f32 %v1413_v62 }
 0x38c   :  { %v1248_v6 = vpop.f32.mrf.mxu2  ;;  %vm979_vm5 = vmor %vm977_vm11, %vm978_vm10 }
 0x38d   :  { %v973_v4 = vmul.f32 %v1413_v62, %v972_v3  ;;  %v1375_v7 = vmul.f32 -1.442695, %v1248_v6 }
 0x38f   :  { %v974_v52 = vmul.f32 0.5, %v973_v4  ;;  %1414 = vpow2.f32 %v1375_v7  ;;  %v987_v7 = vstv %s881_s30 }
 0x391   :  { %v975_v5 = vsub.f32 1.5, %v974_v52 }
 0x393   :  { %v976_v8 = vmul.f32 %v1413_v62, %v975_v5 }
 0x394   :  { %v1251_v10 = vpop.f32.mrf.mxu2 }
 0x395   :  { %v980_v9 = vsel %vm979_vm5, %v1413_v62, %v976_v8  ;;  %v1415_v55 = vpop.eup %1414  ;;  %v1376_v42 = vmul.f32 -1.442695, %v1251_v10 }
 0x396   :  { %1393 = vpush %v980_v9  ;;  %v1272_v12 = vadd.f32 1.0, %v1415_v55 }
 0x397   :  { %1416 = vpow2.f32 %v1376_v42 }
 0x398   :  { %1418 = vrcp.f32 %v1272_v12  ;;  %v1287_v17 = vand.u32 2147483648, %v1272_v12  ;;  %vm1281_vm12 = vweird.f32 %v1272_v12  ;;  %v1285_v39 = vand.u32 2147483647, %v1272_v12 }
 0x39a   :  { %v1288_v33 = vor.u32 1.1754944e-38, %v1287_v17  ;;  %vm1286_vm9 = vcmp.eq.f32.partialorder %v1285_v39, 8.507059e+37 }
 0x39c   :  { %v1254_v16 = vpop.f32.mrf.mxu2 }
 0x39d   :  { %v1417_v18 = vpop.eup %1416  ;;  %v1377_v19 = vmul.f32 -1.442695, %v1254_v16 }
 0x39e   :  { %v1419_v14 = vpop.eup %1418  ;;  %v1273_v51 = vadd.f32 1.0, %v1417_v18 }
 0x39f   :  { %v1277_v25 = vmul.f32 %v1419_v14, %v1272_v12  ;;  %1420 = vpow2.f32 %v1377_v19  ;;  %vm1282_vm14 = vweird.f32 %v1419_v14  ;;  %v992_v12 = vstv %s1358_s9 }
 0x3a0   :  { %1422 = vrcp.f32 %v1273_v51  ;;  %vm1283_vm15 = vmor %vm1281_vm12, %vm1282_vm14  ;;  %vm1296_vm3 = vweird.f32 %v1273_v51  ;;  %v1302_v56 = vand.u32 2147483648, %v1273_v51  ;;  %v1300_v54 = vand.u32 2147483647, %v1273_v51 }
 0x3a1   :  { %v1278_v28 = vsub.f32 1.0, %v1277_v25 }
 0x3a2   :  { %v1303_v63 = vor.u32 1.1754944e-38, %v1302_v56  ;;  %vm1301_vm2 = vcmp.eq.f32.partialorder %v1300_v54, 8.507059e+37 }
 0x3a3   :  { %v1279_v32 = vmul.f32 %v1419_v14, %v1278_v28 }
 0x3a4   :  { %v1257_v46 = vpop.f32.mrf.mxu2 }
 0x3a5   :  { %v1421_v26 = vpop.eup %1420  ;;  %v1280_v31 = vadd.f32 %v1419_v14, %v1279_v32  ;;  %v1378_v15 = vmul.f32 -1.442695, %v1257_v46 }
 0x3a6   :  { %v1423_v47 = vpop.eup %1422  ;;  %v1274_v57 = vadd.f32 1.0, %v1421_v26 }
 0x3a7   :  { %v1284_v20 = vsel %vm1283_vm15, %v1419_v14, %v1280_v31  ;;  %v1292_v49 = vmul.f32 %v1423_v47, %v1273_v51  ;;  %vm1297_vm1 = vweird.f32 %v1423_v47 }
 0x3a8   :  { %v1289_v37 = vsel %vm1286_vm9, %v1288_v33, %v1284_v20  ;;  %1424 = vrcp.f32 %v1274_v57  ;;  %vm1298_vm4 = vmor %vm1296_vm3, %vm1297_vm1  ;;  %vm1311_vm0 = vweird.f32 %v1274_v57  ;;  %v1317_v45 = vand.u32 2147483648, %v1274_v57 }
 0x3a9   :  { %v1337_v11 = vmul.f32 %v2122_v34, %v1289_v37  ;;  %v1293_v43 = vsub.f32 1.0, %v1292_v49  ;;  %1426 = vpow2.f32 %v1378_v15  ;;  %v1315_v0 = vand.u32 2147483647, %v1274_v57 }
 0x3aa   :  { %v1318_v50 = vor.u32 1.1754944e-38, %v1317_v45  ;;  %v1073_v15 = vstv %s1359_s11 }
 0x3ab   :  { %1341 = vst.msk [vmem:[%s2176_s8] sm:$0xff] %vm1110_vm6, %v1337_v11  ;;  %v1294_v40 = vmul.f32 %v1423_v47, %v1293_v43  ;;  %vm1316_vm8 = vcmp.eq.f32.partialorder %v1315_v0, 8.507059e+37 }
 0x3ad   :  { %v1295_v21 = vadd.f32 %v1423_v47, %v1294_v40 }
 0x3ae   :  { %v1425_v38 = vpop.eup %1424 }
 0x3af   :  { %v1299_v2 = vsel %vm1298_vm4, %v1423_v47, %v1295_v21  ;;  %v1307_v53 = vmul.f32 %v1425_v38, %v1274_v57  ;;  %vm1312_vm13 = vweird.f32 %v1425_v38  ;;  %v1427_v1 = vpop.eup %1426 }
 0x3b0   :  { %v1304_v58 = vsel %vm1301_vm2, %v1303_v63, %v1299_v2  ;;  %v1275_v23 = vadd.f32 1.0, %v1427_v1  ;;  %vm1313_vm7 = vmor %vm1311_vm0, %vm1312_vm13 }
 0x3b1   :  { %v1338_v22 = vmul.f32 %v2122_v34, %v1304_v58  ;;  %v1308_v27 = vsub.f32 1.0, %v1307_v53 }
 0x3b2   :  { %1428 = vrcp.f32 %v1275_v23  ;;  %v1332_v4 = vand.u32 2147483648, %v1275_v23  ;;  %vm1326_vm10 = vweird.f32 %v1275_v23  ;;  %v1330_v5 = vand.u32 2147483647, %v1275_v23 }
 0x3b3   :  { %1342 = vst.msk [vmem:[%s2176_s8 + $0x8] sm:$0xff] %vm1110_vm6, %v1338_v22  ;;  %v1309_v24 = vmul.f32 %v1425_v38, %v1308_v27 }
 0x3b4   :  { %v1333_v8 = vor.u32 1.1754944e-38, %v1332_v4  ;;  %vm1331_vm12 = vcmp.eq.f32.partialorder %v1330_v5, 8.507059e+37 }
 0x3b5   :  { %v1310_v59 = vadd.f32 %v1425_v38, %v1309_v24 }
 0x3b7   :  { %v1314_v36 = vsel %vm1313_vm7, %v1425_v38, %v1310_v59 }
 0x3b8   :  { %v1319_v60 = vsel %vm1316_vm8, %v1318_v50, %v1314_v36  ;;  %v1429_v30 = vpop.eup %1428 }
 0x3b9   :  { %v1339_v61 = vmul.f32 %v2122_v34, %v1319_v60  ;;  %v1322_v48 = vmul.f32 %v1429_v30, %v1275_v23  ;;  %vm1327_vm11 = vweird.f32 %v1429_v30 }
 0x3ba   :  { %vm1328_vm5 = vmor %vm1326_vm10, %vm1327_vm11 }
 0x3bb   :  { %1343 = vst.msk [vmem:[%s2176_s8 + $0x10] sm:$0xff] %vm1110_vm6, %v1339_v61  ;;  %v1323_v62 = vsub.f32 1.0, %v1322_v48 }
 0x3bd   :  { %v1324_v3 = vmul.f32 %v1429_v30, %v1323_v62 }
 0x3bf   :  { %v1325_v52 = vadd.f32 %v1429_v30, %v1324_v3 }
 0x3c1   :  { %v1329_v16 = vsel %vm1328_vm5, %v1429_v30, %v1325_v52 }
 0x3c2   :  { %v1334_v25 = vsel %vm1331_vm12, %v1333_v8, %v1329_v16 }
 0x3c7   :  { %s1394_s10 = spop %1393 }
 0x3c8   :  { %v982_v6 = vstv %s1394_s10 }
 0x3c9   :  { %v983_v9 = vmul.f32 %v982_v6, %v2085_v44  ;;  %v984_v10 = vmul.f32 %v982_v6, %v2087_v35  ;;  %v985_v55 = vmul.f32 %v982_v6, %v2089_v13  ;;  %v986_v42 = vmul.f32 %v982_v6, %v2091_v41 }
 0x3ca   :  { %v1340_v44 = vmul.f32 %v2122_v34, %v1334_v25 }
 0x3cb   :  { %v988_v18 = vmul.f32 %v987_v7, %v983_v9  ;;  %v989_v19 = vmul.f32 %v987_v7, %v984_v10  ;;  %v990_v14 = vmul.f32 %v987_v7, %v985_v55  ;;  %v991_v51 = vmul.f32 %v987_v7, %v986_v42 }
 0x3cc   :  { %1344 = vst.msk [vmem:[%s2176_s8 + $0x18] sm:$0xff] %vm1110_vm6, %v1340_v44 }
 0x3cd   :  { %v993_v17 = vadd.f32 %v992_v12, %v988_v18  ;;  %v994_v28 = vadd.f32 %v992_v12, %v989_v19  ;;  %v995_v39 = vadd.f32 %v992_v12, %v990_v14  ;;  %v996_v32 = vadd.f32 %v992_v12, %v991_v51 }
 0x3cf   :  { %v1361_v33 = vmul.f32 -1.442695, %v993_v17  ;;  %v1362_v35 = vmul.f32 -1.442695, %v994_v28  ;;  %v1363_v26 = vmul.f32 -1.442695, %v995_v39 }
 0x3d0   :  { %v1364_v13 = vmul.f32 -1.442695, %v996_v32 }
 0x3d1   :  { %1430 = vpow2.f32 %v1361_v33 }
 0x3d2   :  { %1432 = vpow2.f32 %v1362_v35 }
 0x3d3   :  { %1434 = vpow2.f32 %v1363_v26 }
 0x3d4   :  { %1436 = vpow2.f32 %v1364_v13 }
 0x3d7   :  { %v1431_v41 = vpop.eup %1430 }
 0x3d8   :  { %v1433_v31 = vpop.eup %1432  ;;  %v1009_v47 = vadd.f32 1.0, %v1431_v41 }
 0x3d9   :  { %v1435_v57 = vpop.eup %1434  ;;  %v1010_v20 = vadd.f32 1.0, %v1433_v31 }
 0x3da   :  { %v1437_v34 = vpop.eup %1436  ;;  %v1011_v49 = vadd.f32 1.0, %v1435_v57  ;;  %1438 = vrcp.f32 %v1009_v47  ;;  %v1022_v56 = vand.u32 2147483647, %v1009_v47  ;;  %v1024_v11 = vand.u32 2147483648, %v1009_v47 }
 0x3db   :  { %v1012_v37 = vadd.f32 1.0, %v1437_v34  ;;  %1440 = vrcp.f32 %v1010_v20  ;;  %vm1018_vm6 = vweird.f32 %v1009_v47  ;;  %vm1033_vm14 = vweird.f32 %v1010_v20 }
 0x3dc   :  { %1442 = vrcp.f32 %v1011_v49  ;;  %v1037_v21 = vand.u32 2147483647, %v1010_v20  ;;  %v1039_v38 = vand.u32 2147483648, %v1010_v20  ;;  %vm2148_vm15 = vcmp.eq.f32.partialorder %v1022_v56, 8.507059e+37 }
 0x3dd   :  { %1444 = vrcp.f32 %v1012_v37  ;;  %v1025_v58 = vor.u32 1.1754944e-38, %v1024_v11  ;;  %vm1048_vm9 = vweird.f32 %v1011_v49  ;;  %v1052_v0 = vand.u32 2147483647, %v1011_v49 }
 0x3de   :  { %v1054_v1 = vand.u32 2147483648, %v1011_v49  ;;  %vm2152_vm4 = vcmp.eq.f32.partialorder %v1037_v21, 8.507059e+37  ;;  %v1040_v60 = vor.u32 1.1754944e-38, %v1039_v38  ;;  %vm1063_vm13 = vweird.f32 %v1012_v37 }
 0x3df   :  { %v1067_v3 = vand.u32 2147483647, %v1012_v37  ;;  %v1069_v4 = vand.u32 2147483648, %v1012_v37  ;;  %vm1053_vm11 = vcmp.eq.f32.partialorder %v1052_v0, 8.507059e+37 }
 0x3e0   :  { %v1439_v43 = vpop.eup %1438  ;;  %v1055_v9 = vor.u32 1.1754944e-38, %v1054_v1 }
 0x3e1   :  { %v1441_v54 = vpop.eup %1440  ;;  %v1014_v46 = vmul.f32 %v1439_v43, %v1009_v47  ;;  %vm1019_vm3 = vweird.f32 %v1439_v43  ;;  %v1070_v18 = vor.u32 1.1754944e-38, %v1069_v4  ;;  %vm1068_vm12 = vcmp.eq.f32.partialorder %v1067_v3, 8.507059e+37 }
 0x3e2   :  { %v1443_v40 = vpop.eup %1442  ;;  %v1029_v63 = vmul.f32 %v1441_v54, %v1010_v20  ;;  %vm1034_vm1 = vweird.f32 %v1441_v54  ;;  %vm1020_vm0 = vmor %vm1018_vm6, %vm1019_vm3  ;;  %vm1091_vm6 = vcmp.lt.s32.totalorder %v42_v29, 512 }
 0x3e3   :  { %v1015_v2 = vsub.f32 1.0, %v1014_v46  ;;  %v1044_v45 = vmul.f32 %v1443_v40, %v1011_v49  ;;  %v1445_v22 = vpop.eup %1444  ;;  %vm1049_vm2 = vweird.f32 %v1443_v40  ;;  %vm1035_vm7 = vmor %vm1033_vm14, %vm1034_vm1 }
 0x3e4   :  { %v1030_v27 = vsub.f32 1.0, %v1029_v63  ;;  %v1059_v50 = vmul.f32 %v1445_v22, %v1012_v37  ;;  %vm1064_vm8 = vweird.f32 %v1445_v22  ;;  %vm1050_vm10 = vmor %vm1048_vm9, %vm1049_vm2 }
 0x3e5   :  { %v1016_v24 = vmul.f32 %v1439_v43, %v1015_v2  ;;  %v1045_v23 = vsub.f32 1.0, %v1044_v45  ;;  %vm1065_vm5 = vmor %vm1063_vm13, %vm1064_vm8 }
 0x3e6   :  { %v1031_v59 = vmul.f32 %v1441_v54, %v1030_v27  ;;  %v1060_v48 = vsub.f32 1.0, %v1059_v50 }
 0x3e7   :  { %v1017_v61 = vadd.f32 %v1439_v43, %v1016_v24  ;;  %v1046_v30 = vmul.f32 %v1443_v40, %v1045_v23 }
 0x3e8   :  { %v1032_v62 = vadd.f32 %v1441_v54, %v1031_v59  ;;  %v1061_v6 = vmul.f32 %v1445_v22, %v1060_v48 }
 0x3e9   :  { %v1021_v52 = vsel %vm1020_vm0, %v1439_v43, %v1017_v61  ;;  %v1047_v5 = vadd.f32 %v1443_v40, %v1046_v30 }
 0x3ea   :  { %v1026_v7 = vsel %vm2148_vm15, %v1025_v58, %v1021_v52  ;;  %v1036_v8 = vsel %vm1035_vm7, %v1441_v54, %v1032_v62  ;;  %v1062_v42 = vadd.f32 %v1445_v22, %v1061_v6 }
 0x3eb   :  { %v1041_v10 = vsel %vm2152_vm4, %v1040_v60, %v1036_v8  ;;  %v1051_v55 = vsel %vm1050_vm10, %v1443_v40, %v1047_v5  ;;  %v1074_v12 = vmul.f32 %v1073_v15, %v1026_v7 }
 0x3ec   :  { %v1056_v16 = vsel %vm1053_vm11, %v1055_v9, %v1051_v55  ;;  %v1075_v19 = vmul.f32 %v1073_v15, %v1041_v10  ;;  %v1066_v14 = vsel %vm1065_vm5, %v1445_v22, %v1062_v42 }
 0x3ed   :  { %v1076_v51 = vmul.f32 %v1073_v15, %v1056_v16  ;;  %1082 = vst [vmem:[#allocation1] sm:$0xff] %v1074_v12  ;;  %v1071_v25 = vsel %vm1068_vm12, %v1070_v18, %v1066_v14 }
 0x3ee   :  { %1083 = vst [vmem:[#allocation1 + $0x9] sm:$0xff] %v1075_v19  ;;  %v1077_v17 = vmul.f32 %v1073_v15, %v1071_v25 }
 0x3ef   :  { %1084 = vst [vmem:[#allocation1 + $0x12] sm:$0xff] %v1076_v51 }
 0x3f0   :  { %1085 = vst [vmem:[#allocation1 + $0x1b] sm:$0xff] %v1077_v17 }
 0x3f7   :  { %v1087_v28 = vld [vmem:[#allocation1 + $0x3] ss:$9 sm:$0xff] }
 0x3f8   :  { %1093 = vst.msk [vmem:[%s2175_s7] sm:$0xf] %vm1091_vm6, %v1087_v28 }
 0x3f9   :  { %1353 = vsyncpa [#allocation4], 1 }

</bundles_post_ra>
